<compile_context>
chip_gen: v6e
topology: v6e:2x2x1
jax: 0.10.0
libtpu: 0.0.40
codegen_flags: <defaults>
</compile_context>

<pallas_src>
import functools

import jax
import jax.numpy as jnp
from jax.experimental import pallas as pl
from jax.experimental.pallas import tpu as pltpu

# ----------------------------- configuration --------------------------------
B = 2             # batch
C_IN = 4          # image channels
IMG = 16          # image spatial size (H = W)
C_MID = 8         # synthetic CNN backbone channels
VOCAB = 32        # vocab_size
VOCAB_PAD = 128   # lane-dense padded vocab for the decoder output projection
MAX_LEN = 8       # max_len (sequence length)
HIDDEN = 32       # hidden_size
VOCAB_EMBED = 16  # vocab_embed_size
EMBED_SPACE = 32  # embed_space_size
SOS_ID, EOS_ID = 1, 2


# ----------------------------- CNN kernel -----------------------------------
def _cnn_kernel(p_ref, wc_ref, bc_ref, wf_ref, bf_ref, o_ref, *, b_sz, hw):
    # p_ref: (B*HW, 9*C_IN) im2col patches for the whole batch -> one MXU matmul.
    conv = jnp.dot(p_ref[...], wc_ref[...], preferred_element_type=jnp.float32)
    conv = jnp.maximum(conv + bc_ref[...], 0.0)                      # (B*HW, C_MID)
    # Per-image global average pool as an XLU reduction (1/HW folded into wf
    # by the wrapper) — no iota masks, no (B, B*HW) pool matmul.
    pooled = jnp.sum(conv.reshape(b_sz, hw, conv.shape[-1]), axis=1)  # (B, C_MID)
    o_ref[...] = (jnp.dot(pooled, wf_ref[...], preferred_element_type=jnp.float32)
                  + bf_ref[...])


def encoder_cnn(patches2d, w_conv, b_conv, w_fc_scaled, b_fc, *, b_sz, hw):
    emb = w_fc_scaled.shape[1]
    args = (patches2d, w_conv, b_conv, w_fc_scaled, b_fc)
    return pl.pallas_call(
        functools.partial(_cnn_kernel, b_sz=b_sz, hw=hw),
        out_shape=jax.ShapeDtypeStruct((b_sz, emb), jnp.float32),
        grid=(1,),
        in_specs=[pl.BlockSpec(a.shape, lambda i: (0, 0)) for a in args],
        out_specs=pl.BlockSpec((b_sz, emb), lambda i: (0, 0)),
        compiler_params=pltpu.CompilerParams(dimension_semantics=("arbitrary",)),
    )(*args)


# ------------------- fused sequence kernel (LSTM -> MLP -> LSTM) -------------
def _seq_kernel(seq_ref, lens_ref,
                enc_gw_ref, enc_b_ref, enc_whh_ref,
                ew1_ref, eb1_ref, ew2_ref, eb2_ref,
                dw1_ref, db1_ref, dw2_ref, db2_ref,
                dec_gw_ref, dec_b_ref, dec_whh_ref,
                outw_ref, outb_ref,
                ce_ref, logp_ref, hlast_ref, clast_ref,
                enc_gx_ref, dec_gx_ref, hs_ref,
                *, hidden, t_len, b_sz, vocab):
    tb = t_len * b_sz
    tb_dec = (t_len - 1) * b_sz

    # --- embedding lookup folded into the input->gates projection -----------
    # one_hot(tokens) @ (embed @ W_ih): one flattened lane-dense matmul each.
    ids = seq_ref[...]                                              # (T*B, 1) int32
    lane = jax.lax.broadcasted_iota(jnp.int32, (tb, vocab), 1)
    onehot = (lane == ids).astype(jnp.float32)                      # (T*B, VOCAB)

    enc_gx = (jnp.dot(onehot, enc_gw_ref[...],
                      preferred_element_type=jnp.float32) + enc_b_ref[...])
    enc_gx_ref[...] = enc_gx.reshape(t_len, b_sz, 4 * hidden)       # (T, B, 4H)

    dec_gx = (jnp.dot(onehot[:tb_dec], dec_gw_ref[...],
                      preferred_element_type=jnp.float32) + dec_b_ref[...])
    dec_gx_ref[...] = dec_gx.reshape(t_len - 1, b_sz, 4 * hidden)   # (T-1, B, 4H)

    # --- encoder LSTM (W_hh and state resident for the whole sequence) ------
    enc_whh = enc_whh_ref[...]
    lens = lens_ref[...]                                            # (B, 1) int32
    h0 = jnp.zeros((b_sz, hidden), jnp.float32)
    c0 = jnp.zeros((b_sz, hidden), jnp.float32)

    def enc_step(t, carry):
        h, c = carry
        gates = enc_gx_ref[t] + jnp.dot(h, enc_whh,
                                        preferred_element_type=jnp.float32)  # (B, 4H)
        sg = jax.nn.sigmoid(gates)   # activate the full 4H=128 lane slab once
        tg = jnp.tanh(gates)
        i_g = sg[:, 0 * hidden:1 * hidden]
        f_g = sg[:, 1 * hidden:2 * hidden]
        g_g = tg[:, 2 * hidden:3 * hidden]
        o_g = sg[:, 3 * hidden:4 * hidden]
        c_new = f_g * c + i_g * g_g
        h_new = o_g * jnp.tanh(c_new)
        valid = t < lens             # emulates pack_padded_sequence final hidden
        return jnp.where(valid, h_new, h), jnp.where(valid, c_new, c)

    enc_h, _ = jax.lax.fori_loop(0, t_len, enc_step, (h0, c0), unroll=True)

    # --- encoder_mlp -> caption_embeddings -> decoder_mlp (all in VMEM) -----
    x = jnp.maximum(jnp.dot(enc_h, ew1_ref[...],
                            preferred_element_type=jnp.float32) + eb1_ref[...], 0.0)
    ce = jnp.dot(x, ew2_ref[...], preferred_element_type=jnp.float32) + eb2_ref[...]
    ce_ref[...] = ce
    y = jnp.maximum(jnp.dot(ce, dw1_ref[...],
                            preferred_element_type=jnp.float32) + db1_ref[...], 0.0)
    rh = jnp.dot(y, dw2_ref[...], preferred_element_type=jnp.float32) + db2_ref[...]

    # --- decoder LSTM (output projection deferred off the critical path) ----
    dec_whh = dec_whh_ref[...]

    def dec_step(t, carry):
        h, c = carry
        gates = dec_gx_ref[t] + jnp.dot(h, dec_whh,
                                        preferred_element_type=jnp.float32)
        sg = jax.nn.sigmoid(gates)
        tg = jnp.tanh(gates)
        i_g = sg[:, 0 * hidden:1 * hidden]
        f_g = sg[:, 1 * hidden:2 * hidden]
        g_g = tg[:, 2 * hidden:3 * hidden]
        o_g = sg[:, 3 * hidden:4 * hidden]
        c_new = f_g * c + i_g * g_g
        h_new = o_g * jnp.tanh(c_new)
        hs_ref[t] = h_new            # stash to VMEM scratch; project later
        return h_new, c_new

    dh, dc = jax.lax.fori_loop(0, t_len - 1, dec_step,
                               (rh, jnp.zeros_like(rh)), unroll=True)
    hlast_ref[...] = dh
    clast_ref[...] = dc

    # --- deferred output projection + log-softmax (one lane-dense matmul) ---
    hs = hs_ref[...].reshape(tb_dec, hidden)                        # ((T-1)*B, H)
    logits = (jnp.dot(hs, outw_ref[...], preferred_element_type=jnp.float32)
              + outb_ref[...])                                      # ((T-1)*B, 128)
    z = logits - jnp.max(logits, axis=-1, keepdims=True)
    logp_ref[...] = z - jnp.log(jnp.sum(jnp.exp(z), axis=-1, keepdims=True))


def rae_seq(seq_ids, lens,
            enc_gw, enc_b, enc_whh,
            ew1, eb1, ew2, eb2, dw1, db1, dw2, db2,
            dec_gw, dec_b, dec_whh, out_w_pad, out_b_pad,
            *, hidden, t_len, b_sz, vocab):
    args = (seq_ids, lens, enc_gw, enc_b, enc_whh,
            ew1, eb1, ew2, eb2, dw1, db1, dw2, db2,
            dec_gw, dec_b, dec_whh, out_w_pad, out_b_pad)
    n_dec = (t_len - 1) * b_sz
    return pl.pallas_call(
        functools.partial(_seq_kernel, hidden=hidden, t_len=t_len,
                          b_sz=b_sz, vocab=vocab),
        out_shape=(jax.ShapeDtypeStruct((b_sz, EMBED_SPACE), jnp.float32),
                   jax.ShapeDtypeStruct((n_dec, VOCAB_PAD), jnp.float32),
                   jax.ShapeDtypeStruct((b_sz, hidden), jnp.float32),
                   jax.ShapeDtypeStruct((b_sz, hidden), jnp.float32)),
        grid=(1,),
        in_specs=[pl.BlockSpec(a.shape, lambda i: (0, 0)) for a in args],
        out_specs=(pl.BlockSpec((b_sz, EMBED_SPACE), lambda i: (0, 0)),
                   pl.BlockSpec((n_dec, VOCAB_PAD), lambda i: (0, 0)),
                   pl.BlockSpec((b_sz, hidden), lambda i: (0, 0)),
                   pl.BlockSpec((b_sz, hidden), lambda i: (0, 0))),
        scratch_shapes=[pltpu.VMEM((t_len, b_sz, 4 * hidden), jnp.float32),
                        pltpu.VMEM((t_len - 1, b_sz, 4 * hidden), jnp.float32),
                        pltpu.VMEM((t_len - 1, b_sz, hidden), jnp.float32)],
        compiler_params=pltpu.CompilerParams(dimension_semantics=("arbitrary",)),
    )(*args)


# ----------------------------- parameter init -------------------------------
def init_params(key):
    ks = jax.random.split(key, 16)
    n = lambda k, shape, s=0.1: (s * jax.random.normal(k, shape)).astype(jnp.float32)
    p = {
        # EncoderCNN (synthetic): 3x3 conv -> relu -> gap -> fc
        "cnn_w_conv": n(ks[0], (9 * C_IN, C_MID)),
        "cnn_b_conv": jnp.zeros((1, C_MID), jnp.float32),
        "cnn_w_fc": n(ks[1], (C_MID, EMBED_SPACE)),
        "cnn_b_fc": jnp.zeros((1, EMBED_SPACE), jnp.float32),
        # EncoderRNN: embedding + LSTM(vocab_embed -> hidden)
        "enc_embed": n(ks[2], (VOCAB, VOCAB_EMBED)),
        "enc_w_ih": n(ks[3], (VOCAB_EMBED, 4 * HIDDEN)),
        "enc_w_hh": n(ks[4], (HIDDEN, 4 * HIDDEN)),
        "enc_b": jnp.zeros((1, 4 * HIDDEN), jnp.float32),
        # encoder_mlp: hidden -> hidden (ReLU) -> embed_space
        "emlp_w1": n(ks[5], (HIDDEN, HIDDEN)),
        "emlp_b1": jnp.zeros((1, HIDDEN), jnp.float32),
        "emlp_w2": n(ks[6], (HIDDEN, EMBED_SPACE)),
        "emlp_b2": jnp.zeros((1, EMBED_SPACE), jnp.float32),
        # decoder_mlp: embed_space -> hidden (ReLU) -> hidden
        "dmlp_w1": n(ks[7], (EMBED_SPACE, HIDDEN)),
        "dmlp_b1": jnp.zeros((1, HIDDEN), jnp.float32),
        "dmlp_w2": n(ks[8], (HIDDEN, HIDDEN)),
        "dmlp_b2": jnp.zeros((1, HIDDEN), jnp.float32),
        # DecoderRNN: embedding(vocab, hidden) + LSTM(hidden -> hidden) + out(hidden -> vocab)
        "dec_embed": n(ks[9], (VOCAB, HIDDEN)),
        "dec_w_ih": n(ks[10], (HIDDEN, 4 * HIDDEN)),
        "dec_w_hh": n(ks[11], (HIDDEN, 4 * HIDDEN)),
        "dec_b": jnp.zeros((1, 4 * HIDDEN), jnp.float32),
        "out_w": n(ks[12], (HIDDEN, VOCAB)),
        "out_b": jnp.zeros((1, VOCAB), jnp.float32),
    }
    return p


# ----------------------------- forward (glue + kernels) ---------------------
def im2col_3x3(x_nchw):
    # NCHW -> NHWC -> pad -> (B*H*W, 9*C)
    x = jnp.transpose(x_nchw, (0, 2, 3, 1)).astype(jnp.float32)
    b, h, w, c = x.shape
    xp = jnp.pad(x, ((0, 0), (1, 1), (1, 1), (0, 0)))
    patches = jnp.stack(
        [xp[:, dy:dy + h, dx:dx + w, :] for dy in range(3) for dx in range(3)],
        axis=-2,
    )  # (B, H, W, 9, C)
    return patches.reshape(b * h * w, 9 * c)


def rae_forward(params, sequences, regions, slengths):
    b, t = sequences.shape
    hw = IMG * IMG

    # ---- encode: CNN (independent path) ----
    patches = im2col_3x3(regions)                                    # (B*HW, 9*C)
    features = encoder_cnn(
        patches, params["cnn_w_conv"], params["cnn_b_conv"],
        params["cnn_w_fc"] * jnp.float32(1.0 / hw),                  # fold 1/HW pool scale
        params["cnn_b_fc"], b_sz=b, hw=hw)                           # (B, EMBED_SPACE)

    # ---- fused sequence path (one pallas_call) ----
    # Weight-only folds: embedding lookup -> gates becomes onehot @ (embed @ W_ih).
    enc_gw = jnp.dot(params["enc_embed"], params["enc_w_ih"])        # (VOCAB, 4H)
    dec_gw = jnp.dot(params["dec_embed"], params["dec_w_ih"])        # (VOCAB, 4H)
    # Lane-dense padded output projection (pad bias with -1e30 so softmax is unchanged).
    pad = VOCAB_PAD - VOCAB
    out_w_pad = jnp.pad(params["out_w"], ((0, 0), (0, pad)))
    out_b_pad = jnp.pad(params["out_b"], ((0, 0), (0, pad)), constant_values=-1e30)

    seq_ids = jnp.transpose(sequences, (1, 0)).reshape(t * b, 1).astype(jnp.int32)
    lens = slengths.reshape(b, 1).astype(jnp.int32)

    caption_embeddings, logp_flat, dec_h, dec_c = rae_seq(
        seq_ids, lens,
        enc_gw, params["enc_b"], params["enc_w_hh"],
        params["emlp_w1"], params["emlp_b1"], params["emlp_w2"], params["emlp_b2"],
        params["dmlp_w1"], params["dmlp_b1"], params["dmlp_w2"], params["dmlp_b2"],
        dec_gw, params["dec_b"], params["dec_w_hh"],
        out_w_pad, out_b_pad,
        hidden=HIDDEN, t_len=t, b_sz=b, vocab=VOCAB)

    decoder_outputs = logp_flat[:, :VOCAB].reshape(t - 1, b, VOCAB)  # per-step log-probs
    return (features, caption_embeddings), (decoder_outputs, (dec_h, dec_c))


# ----------------------------- main ------------------------------------------
if __name__ == "__main__":
    key = jax.random.PRNGKey(0)
    k_param, k_seq, k_img = jax.random.split(key, 3)

    params = init_params(k_param)
    sequences = jax.random.randint(k_seq, (B, MAX_LEN), 0, VOCAB, dtype=jnp.int32)
    sequences = sequences.at[:, 0].set(SOS_ID)
    regions = jax.random.normal(k_img, (B, C_IN, IMG, IMG), dtype=jnp.float32)
    slengths = jnp.array([MAX_LEN, MAX_LEN - 2], dtype=jnp.int32)

    (features, caption_embeddings), (decoder_outputs, (dec_h, dec_c)) = jax.jit(
        rae_forward)(params, sequences, regions, slengths)

    jax.block_until_ready((features, caption_embeddings, decoder_outputs, dec_h, dec_c))

    assert features.shape == (B, EMBED_SPACE)
    assert caption_embeddings.shape == (B, EMBED_SPACE)
    assert decoder_outputs.shape == (MAX_LEN - 1, B, VOCAB)
    assert dec_h.shape == (B, HIDDEN) and dec_c.shape == (B, HIDDEN)
    assert bool(jnp.all(jnp.isfinite(decoder_outputs)))
    print("KERNEL_OK")
</pallas_src>

<mosaic_0001>
module attributes {stable_mosaic.version = 11 : i64} {
  func.func @_cnn_kernel(%arg0: i32, %arg1: memref<512x36xf32, #tpu.memory_space<vmem>>, %arg2: memref<36x8xf32, #tpu.memory_space<vmem>>, %arg3: memref<1x8xf32, #tpu.memory_space<vmem>>, %arg4: memref<8x32xf32, #tpu.memory_space<vmem>>, %arg5: memref<1x32xf32, #tpu.memory_space<vmem>>, %arg6: memref<2x32xf32, #tpu.memory_space<vmem>>) attributes {dimension_semantics = [#tpu.dimension_semantics<arbitrary>], iteration_bounds = array<i64: 1>, scalar_prefetch = 0 : i64, scratch_operands = 0 : i64, tpu.core_type = #tpu.core_type<tc>, window_params = [{pipeline_mode = #tpu.pipeline_mode<synchronous>, transform_indices = @transform_0, window_bounds = array<i64: 512, 36>}, {pipeline_mode = #tpu.pipeline_mode<synchronous>, transform_indices = @transform_1, window_bounds = array<i64: 36, 8>}, {pipeline_mode = #tpu.pipeline_mode<synchronous>, transform_indices = @transform_2, window_bounds = array<i64: 1, 8>}, {pipeline_mode = #tpu.pipeline_mode<synchronous>, transform_indices = @transform_3, window_bounds = array<i64: 8, 32>}, {pipeline_mode = #tpu.pipeline_mode<synchronous>, transform_indices = @transform_4, window_bounds = array<i64: 1, 32>}, {pipeline_mode = #tpu.pipeline_mode<synchronous>, transform_indices = @transform_5, window_bounds = array<i64: 2, 32>}]} {
    %c0 = arith.constant 0 : index
    %c0_0 = arith.constant 0 : index
    %0 = vector.load %arg1[%c0, %c0_0] : memref<512x36xf32, #tpu.memory_space<vmem>>, vector<512x36xf32>
    %c0_1 = arith.constant 0 : index
    %c0_2 = arith.constant 0 : index
    %1 = vector.load %arg2[%c0_1, %c0_2] : memref<36x8xf32, #tpu.memory_space<vmem>>, vector<36x8xf32>
    %cst = arith.constant dense<0.000000e+00> : vector<512x8xf32>
    %2 = tpu.matmul %0, %1, %cst {dimension_numbers = #tpu.dot_dimension_numbers<[1], [0], [0], [1], [0, 0, 1, 1], [], []>} : vector<512x36xf32>, vector<36x8xf32>, vector<512x8xf32> -> vector<512x8xf32>
    %c0_3 = arith.constant 0 : index
    %c0_4 = arith.constant 0 : index
    %3 = vector.load %arg3[%c0_3, %c0_4] : memref<1x8xf32, #tpu.memory_space<vmem>>, vector<1x8xf32>
    %4 = vector.broadcast %3 : vector<1x8xf32> to vector<512x8xf32>
    %5 = arith.addf %2, %4 : vector<512x8xf32>
    %cst_5 = arith.constant 0.000000e+00 : f32
    %6 = vector.broadcast %cst_5 : f32 to vector<512x8xf32>
    %7 = arith.maximumf %5, %6 : vector<512x8xf32>
    %8 = vector.shape_cast %7 : vector<512x8xf32> to vector<2x256x8xf32>
    %cst_6 = arith.constant dense<0.000000e+00> : vector<2x8xf32>
    %9 = vector.multi_reduction <add>, %8, %cst_6 [1] : vector<2x256x8xf32> to vector<2x8xf32>
    %c0_7 = arith.constant 0 : index
    %c0_8 = arith.constant 0 : index
    %10 = vector.load %arg4[%c0_7, %c0_8] : memref<8x32xf32, #tpu.memory_space<vmem>>, vector<8x32xf32>
    %cst_9 = arith.constant dense<0.000000e+00> : vector<2x32xf32>
    %11 = tpu.matmul %9, %10, %cst_9 {dimension_numbers = #tpu.dot_dimension_numbers<[1], [0], [0], [1], [0, 0, 1, 1], [], []>} : vector<2x8xf32>, vector<8x32xf32>, vector<2x32xf32> -> vector<2x32xf32>
    %c0_10 = arith.constant 0 : index
    %c0_11 = arith.constant 0 : index
    %12 = vector.load %arg5[%c0_10, %c0_11] : memref<1x32xf32, #tpu.memory_space<vmem>>, vector<1x32xf32>
    %13 = vector.broadcast %12 : vector<1x32xf32> to vector<2x32xf32>
    %14 = arith.addf %11, %13 : vector<2x32xf32>
    %c0_12 = arith.constant 0 : index
    %c0_13 = arith.constant 0 : index
    %15 = vector.load %arg6[%c0_12, %c0_13] : memref<2x32xf32, #tpu.memory_space<vmem>>, vector<2x32xf32>
    tpu.vector_store %arg6[%c0_12, %c0_13], %14 {strides = array<i32>} : memref<2x32xf32, #tpu.memory_space<vmem>>, vector<2x32xf32>,
    return
  }
  func.func @transform_0(%arg0: i32) -> (i32, i32) {
    %c0_i32 = arith.constant 0 : i32
    %c0_i32_0 = arith.constant 0 : i32
    %c0_i32_1 = arith.constant 0 : i32
    return %c0_i32, %c0_i32_0 : i32, i32
  }
  func.func @transform_1(%arg0: i32) -> (i32, i32) {
    %c0_i32 = arith.constant 0 : i32
    %c0_i32_0 = arith.constant 0 : i32
    %c0_i32_1 = arith.constant 0 : i32
    return %c0_i32, %c0_i32_0 : i32, i32
  }
  func.func @transform_2(%arg0: i32) -> (i32, i32) {
    %c0_i32 = arith.constant 0 : i32
    %c0_i32_0 = arith.constant 0 : i32
    %c0_i32_1 = arith.constant 0 : i32
    return %c0_i32, %c0_i32_0 : i32, i32
  }
  func.func @transform_3(%arg0: i32) -> (i32, i32) {
    %c0_i32 = arith.constant 0 : i32
    %c0_i32_0 = arith.constant 0 : i32
    %c0_i32_1 = arith.constant 0 : i32
    return %c0_i32, %c0_i32_0 : i32, i32
  }
  func.func @transform_4(%arg0: i32) -> (i32, i32) {
    %c0_i32 = arith.constant 0 : i32
    %c0_i32_0 = arith.constant 0 : i32
    %c0_i32_1 = arith.constant 0 : i32
    return %c0_i32, %c0_i32_0 : i32, i32
  }
  func.func @transform_5(%arg0: i32) -> (i32, i32) {
    %c0_i32 = arith.constant 0 : i32
    %c0_i32_0 = arith.constant 0 : i32
    %c0_i32_1 = arith.constant 0 : i32
    return %c0_i32, %c0_i32_0 : i32, i32
  }
}

module attributes {stable_mosaic.version = 11 : i64} {
  func.func @_seq_kernel(%arg0: i32, %arg1: memref<16x1xi32, #tpu.memory_space<vmem>>, %arg2: memref<2x1xi32, #tpu.memory_space<vmem>>, %arg3: memref<32x128xf32, #tpu.memory_space<vmem>>, %arg4: memref<1x128xf32, #tpu.memory_space<vmem>>, %arg5: memref<32x128xf32, #tpu.memory_space<vmem>>, %arg6: memref<32x32xf32, #tpu.memory_space<vmem>>, %arg7: memref<1x32xf32, #tpu.memory_space<vmem>>, %arg8: memref<32x32xf32, #tpu.memory_space<vmem>>, %arg9: memref<1x32xf32, #tpu.memory_space<vmem>>, %arg10: memref<32x32xf32, #tpu.memory_space<vmem>>, %arg11: memref<1x32xf32, #tpu.memory_space<vmem>>, %arg12: memref<32x32xf32, #tpu.memory_space<vmem>>, %arg13: memref<1x32xf32, #tpu.memory_space<vmem>>, %arg14: memref<32x128xf32, #tpu.memory_space<vmem>>, %arg15: memref<1x128xf32, #tpu.memory_space<vmem>>, %arg16: memref<32x128xf32, #tpu.memory_space<vmem>>, %arg17: memref<32x128xf32, #tpu.memory_space<vmem>>, %arg18: memref<1x128xf32, #tpu.memory_space<vmem>>, %arg19: memref<2x32xf32, #tpu.memory_space<vmem>>, %arg20: memref<14x128xf32, #tpu.memory_space<vmem>>, %arg21: memref<2x32xf32, #tpu.memory_space<vmem>>, %arg22: memref<2x32xf32, #tpu.memory_space<vmem>>, %arg23: memref<8x2x128xf32, #tpu.memory_space<vmem>>, %arg24: memref<7x2x128xf32, #tpu.memory_space<vmem>>, %arg25: memref<7x2x32xf32, #tpu.memory_space<vmem>>) attributes {dimension_semantics = [#tpu.dimension_semantics<arbitrary>], iteration_bounds = array<i64: 1>, scalar_prefetch = 0 : i64, scratch_operands = 3 : i64, tpu.core_type = #tpu.core_type<tc>, window_params = [{pipeline_mode = #tpu.pipeline_mode<synchronous>, transform_indices = @transform_0, window_bounds = array<i64: 16, 1>}, {pipeline_mode = #tpu.pipeline_mode<synchronous>, transform_indices = @transform_1, window_bounds = array<i64: 2, 1>}, {pipeline_mode = #tpu.pipeline_mode<synchronous>, transform_indices = @transform_2, window_bounds = array<i64: 32, 128>}, {pipeline_mode = #tpu.pipeline_mode<synchronous>, transform_indices = @transform_3, window_bounds = array<i64: 1, 128>}, {pipeline_mode = #tpu.pipeline_mode<synchronous>, transform_indices = @transform_4, window_bounds = array<i64: 32, 128>}, {pipeline_mode = #tpu.pipeline_mode<synchronous>, transform_indices = @transform_5, window_bounds = array<i64: 32, 32>}, {pipeline_mode = #tpu.pipeline_mode<synchronous>, transform_indices = @transform_6, window_bounds = array<i64: 1, 32>}, {pipeline_mode = #tpu.pipeline_mode<synchronous>, transform_indices = @transform_7, window_bounds = array<i64: 32, 32>}, {pipeline_mode = #tpu.pipeline_mode<synchronous>, transform_indices = @transform_8, window_bounds = array<i64: 1, 32>}, {pipeline_mode = #tpu.pipeline_mode<synchronous>, transform_indices = @transform_9, window_bounds = array<i64: 32, 32>}, {pipeline_mode = #tpu.pipeline_mode<synchronous>, transform_indices = @transform_10, window_bounds = array<i64: 1, 32>}, {pipeline_mode = #tpu.pipeline_mode<synchronous>, transform_indices = @transform_11, window_bounds = array<i64: 32, 32>}, {pipeline_mode = #tpu.pipeline_mode<synchronous>, transform_indices = @transform_12, window_bounds = array<i64: 1, 32>}, {pipeline_mode = #tpu.pipeline_mode<synchronous>, transform_indices = @transform_13, window_bounds = array<i64: 32, 128>}, {pipeline_mode = #tpu.pipeline_mode<synchronous>, transform_indices = @transform_14, window_bounds = array<i64: 1, 128>}, {pipeline_mode = #tpu.pipeline_mode<synchronous>, transform_indices = @transform_15, window_bounds = array<i64: 32, 128>}, {pipeline_mode = #tpu.pipeline_mode<synchronous>, transform_indices = @transform_16, window_bounds = array<i64: 32, 128>}, {pipeline_mode = #tpu.pipeline_mode<synchronous>, transform_indices = @transform_17, window_bounds = array<i64: 1, 128>}, {pipeline_mode = #tpu.pipeline_mode<synchronous>, transform_indices = @transform_18, window_bounds = array<i64: 2, 32>}, {pipeline_mode = #tpu.pipeline_mode<synchronous>, transform_indices = @transform_19, window_bounds = array<i64: 14, 128>}, {pipeline_mode = #tpu.pipeline_mode<synchronous>, transform_indices = @transform_20, window_bounds = array<i64: 2, 32>}, {pipeline_mode = #tpu.pipeline_mode<synchronous>, transform_indices = @transform_21, window_bounds = array<i64: 2, 32>}]} {
    %c0 = arith.constant 0 : index
    %c0_0 = arith.constant 0 : index
    %0 = vector.load %arg1[%c0, %c0_0] : memref<16x1xi32, #tpu.memory_space<vmem>>, vector<16x1xi32>
    %1 = tpu.iota {dimensions = array<i32: 1>} : vector<16x32xi32>
    %2 = vector.broadcast %0 : vector<16x1xi32> to vector<16x32xi32>
    %3 = arith.cmpi eq, %1, %2 : vector<16x32xi32>
    %4 = arith.extui %3 : vector<16x32xi1> to vector<16x32xi32>
    %5 = arith.sitofp %4 : vector<16x32xi32> to vector<16x32xf32>
    %c0_1 = arith.constant 0 : index
    %c0_2 = arith.constant 0 : index
    %6 = vector.load %arg3[%c0_1, %c0_2] : memref<32x128xf32, #tpu.memory_space<vmem>>, vector<32x128xf32>
    %cst = arith.constant dense<0.000000e+00> : vector<16x128xf32>
    %7 = tpu.matmul %5, %6, %cst {dimension_numbers = #tpu.dot_dimension_numbers<[1], [0], [0], [1], [0, 0, 1, 1], [], []>} : vector<16x32xf32>, vector<32x128xf32>, vector<16x128xf32> -> vector<16x128xf32>
    %c0_3 = arith.constant 0 : index
    %c0_4 = arith.constant 0 : index
    %8 = vector.load %arg4[%c0_3, %c0_4] : memref<1x128xf32, #tpu.memory_space<vmem>>, vector<1x128xf32>
    %9 = vector.broadcast %8 : vector<1x128xf32> to vector<16x128xf32>
    %10 = arith.addf %7, %9 : vector<16x128xf32>
    %11 = vector.shape_cast %10 : vector<16x128xf32> to vector<8x2x128xf32>
    %c0_5 = arith.constant 0 : index
    %c0_6 = arith.constant 0 : index
    %c0_7 = arith.constant 0 : index
    %12 = vector.load %arg23[%c0_5, %c0_6, %c0_7] : memref<8x2x128xf32, #tpu.memory_space<vmem>>, vector<8x2x128xf32>
    tpu.vector_store %arg23[%c0_5, %c0_6, %c0_7], %11 {strides = array<i32>} : memref<8x2x128xf32, #tpu.memory_space<vmem>>, vector<8x2x128xf32>,
    %13 = vector.extract_strided_slice %5 {offsets = [0, 0], sizes = [14, 32], strides = [1, 1]} : vector<16x32xf32> to vector<14x32xf32>
    %c0_8 = arith.constant 0 : index
    %c0_9 = arith.constant 0 : index
    %14 = vector.load %arg14[%c0_8, %c0_9] : memref<32x128xf32, #tpu.memory_space<vmem>>, vector<32x128xf32>
    %cst_10 = arith.constant dense<0.000000e+00> : vector<14x128xf32>
    %15 = tpu.matmul %13, %14, %cst_10 {dimension_numbers = #tpu.dot_dimension_numbers<[1], [0], [0], [1], [0, 0, 1, 1], [], []>} : vector<14x32xf32>, vector<32x128xf32>, vector<14x128xf32> -> vector<14x128xf32>
    %c0_11 = arith.constant 0 : index
    %c0_12 = arith.constant 0 : index
    %16 = vector.load %arg15[%c0_11, %c0_12] : memref<1x128xf32, #tpu.memory_space<vmem>>, vector<1x128xf32>
    %17 = vector.broadcast %16 : vector<1x128xf32> to vector<14x128xf32>
    %18 = arith.addf %15, %17 : vector<14x128xf32>
    %19 = vector.shape_cast %18 : vector<14x128xf32> to vector<7x2x128xf32>
    %c0_13 = arith.constant 0 : index
    %c0_14 = arith.constant 0 : index
    %c0_15 = arith.constant 0 : index
    %20 = vector.load %arg24[%c0_13, %c0_14, %c0_15] : memref<7x2x128xf32, #tpu.memory_space<vmem>>, vector<7x2x128xf32>
    tpu.vector_store %arg24[%c0_13, %c0_14, %c0_15], %19 {strides = array<i32>} : memref<7x2x128xf32, #tpu.memory_space<vmem>>, vector<7x2x128xf32>,
    %c0_16 = arith.constant 0 : index
    %c0_17 = arith.constant 0 : index
    %21 = vector.load %arg5[%c0_16, %c0_17] : memref<32x128xf32, #tpu.memory_space<vmem>>, vector<32x128xf32>
    %c0_18 = arith.constant 0 : index
    %c0_19 = arith.constant 0 : index
    %22 = vector.load %arg2[%c0_18, %c0_19] : memref<2x1xi32, #tpu.memory_space<vmem>>, vector<2x1xi32>
    %cst_20 = arith.constant 0.000000e+00 : f32
    %23 = vector.broadcast %cst_20 : f32 to vector<2x32xf32>
    %cst_21 = arith.constant 0.000000e+00 : f32
    %24 = vector.broadcast %cst_21 : f32 to vector<2x32xf32>
    %c0_i32 = arith.constant 0 : i32
    %25 = arith.index_cast %c0_i32 : i32 to index
    %c0_22 = arith.constant 0 : index
    %c0_23 = arith.constant 0 : index
    %26 = vector.load %arg23[%25, %c0_22, %c0_23] : memref<8x2x128xf32, #tpu.memory_space<vmem>>, vector<1x2x128xf32>
    %27 = vector.shape_cast %26 : vector<1x2x128xf32> to vector<2x128xf32>
    %cst_24 = arith.constant dense<0.000000e+00> : vector<2x128xf32>
    %28 = tpu.matmul %23, %21, %cst_24 {dimension_numbers = #tpu.dot_dimension_numbers<[1], [0], [0], [1], [0, 0, 1, 1], [], []>} : vector<2x32xf32>, vector<32x128xf32>, vector<2x128xf32> -> vector<2x128xf32>
    %29 = arith.addf %27, %28 : vector<2x128xf32>
    %30 = arith.negf %29 : vector<2x128xf32>
    %31 = math.exp %30 : vector<2x128xf32>
    %cst_25 = arith.constant 1.000000e+00 : f32
    %32 = vector.broadcast %cst_25 : f32 to vector<2x128xf32>
    %33 = arith.addf %32, %31 : vector<2x128xf32>
    %34 = arith.divf %32, %33 : vector<2x128xf32>
    %35 = math.tanh %29 : vector<2x128xf32>
    %36 = vector.extract_strided_slice %34 {offsets = [0, 0], sizes = [2, 32], strides = [1, 1]} : vector<2x128xf32> to vector<2x32xf32>
    %37 = vector.extract_strided_slice %34 {offsets = [0, 32], sizes = [2, 32], strides = [1, 1]} : vector<2x128xf32> to vector<2x32xf32>
    %38 = vector.extract_strided_slice %35 {offsets = [0, 64], sizes = [2, 32], strides = [1, 1]} : vector<2x128xf32> to vector<2x32xf32>
    %39 = vector.extract_strided_slice %34 {offsets = [0, 96], sizes = [2, 32], strides = [1, 1]} : vector<2x128xf32> to vector<2x32xf32>
    %40 = arith.mulf %37, %24 : vector<2x32xf32>
    %41 = arith.mulf %36, %38 : vector<2x32xf32>
    %42 = arith.addf %40, %41 : vector<2x32xf32>
    %43 = math.tanh %42 : vector<2x32xf32>
    %44 = arith.mulf %39, %43 : vector<2x32xf32>
    %45 = vector.broadcast %c0_i32 : i32 to vector<2x1xi32>
    %46 = arith.cmpi slt, %45, %22 : vector<2x1xi32>
    %47 = vector.shape_cast %46 : vector<2x1xi1> to vector<2x1xi1>
    %48 = vector.broadcast %47 : vector<2x1xi1> to vector<2x32xi1>
    %49 = arith.select %48, %44, %23 : vector<2x32xi1>, vector<2x32xf32>
    %50 = vector.shape_cast %46 : vector<2x1xi1> to vector<2x1xi1>
    %51 = vector.broadcast %50 : vector<2x1xi1> to vector<2x32xi1>
    %52 = arith.select %51, %42, %24 : vector<2x32xi1>, vector<2x32xf32>
    %c1_i32 = arith.constant 1 : i32
    %53 = arith.index_cast %c1_i32 : i32 to index
    %c0_26 = arith.constant 0 : index
    %c0_27 = arith.constant 0 : index
    %54 = vector.load %arg23[%53, %c0_26, %c0_27] : memref<8x2x128xf32, #tpu.memory_space<vmem>>, vector<1x2x128xf32>
    %55 = vector.shape_cast %54 : vector<1x2x128xf32> to vector<2x128xf32>
    %cst_28 = arith.constant dense<0.000000e+00> : vector<2x128xf32>
    %56 = tpu.matmul %49, %21, %cst_28 {dimension_numbers = #tpu.dot_dimension_numbers<[1], [0], [0], [1], [0, 0, 1, 1], [], []>} : vector<2x32xf32>, vector<32x128xf32>, vector<2x128xf32> -> vector<2x128xf32>
    %57 = arith.addf %55, %56 : vector<2x128xf32>
    %58 = arith.negf %57 : vector<2x128xf32>
    %59 = math.exp %58 : vector<2x128xf32>
    %cst_29 = arith.constant 1.000000e+00 : f32
    %60 = vector.broadcast %cst_29 : f32 to vector<2x128xf32>
    %61 = arith.addf %60, %59 : vector<2x128xf32>
    %62 = arith.divf %60, %61 : vector<2x128xf32>
    %63 = math.tanh %57 : vector<2x128xf32>
    %64 = vector.extract_strided_slice %62 {offsets = [0, 0], sizes = [2, 32], strides = [1, 1]} : vector<2x128xf32> to vector<2x32xf32>
    %65 = vector.extract_strided_slice %62 {offsets = [0, 32], sizes = [2, 32], strides = [1, 1]} : vector<2x128xf32> to vector<2x32xf32>
    %66 = vector.extract_strided_slice %63 {offsets = [0, 64], sizes = [2, 32], strides = [1, 1]} : vector<2x128xf32> to vector<2x32xf32>
    %67 = vector.extract_strided_slice %62 {offsets = [0, 96], sizes = [2, 32], strides = [1, 1]} : vector<2x128xf32> to vector<2x32xf32>
    %68 = arith.mulf %65, %52 : vector<2x32xf32>
    %69 = arith.mulf %64, %66 : vector<2x32xf32>
    %70 = arith.addf %68, %69 : vector<2x32xf32>
    %71 = math.tanh %70 : vector<2x32xf32>
    %72 = arith.mulf %67, %71 : vector<2x32xf32>
    %73 = vector.broadcast %c1_i32 : i32 to vector<2x1xi32>
    %74 = arith.cmpi slt, %73, %22 : vector<2x1xi32>
    %75 = vector.shape_cast %74 : vector<2x1xi1> to vector<2x1xi1>
    %76 = vector.broadcast %75 : vector<2x1xi1> to vector<2x32xi1>
    %77 = arith.select %76, %72, %49 : vector<2x32xi1>, vector<2x32xf32>
    %78 = vector.shape_cast %74 : vector<2x1xi1> to vector<2x1xi1>
    %79 = vector.broadcast %78 : vector<2x1xi1> to vector<2x32xi1>
    %80 = arith.select %79, %70, %52 : vector<2x32xi1>, vector<2x32xf32>
    %c2_i32 = arith.constant 2 : i32
    %81 = arith.index_cast %c2_i32 : i32 to index
    %c0_30 = arith.constant 0 : index
    %c0_31 = arith.constant 0 : index
    %82 = vector.load %arg23[%81, %c0_30, %c0_31] : memref<8x2x128xf32, #tpu.memory_space<vmem>>, vector<1x2x128xf32>
    %83 = vector.shape_cast %82 : vector<1x2x128xf32> to vector<2x128xf32>
    %cst_32 = arith.constant dense<0.000000e+00> : vector<2x128xf32>
    %84 = tpu.matmul %77, %21, %cst_32 {dimension_numbers = #tpu.dot_dimension_numbers<[1], [0], [0], [1], [0, 0, 1, 1], [], []>} : vector<2x32xf32>, vector<32x128xf32>, vector<2x128xf32> -> vector<2x128xf32>
    %85 = arith.addf %83, %84 : vector<2x128xf32>
    %86 = arith.negf %85 : vector<2x128xf32>
    %87 = math.exp %86 : vector<2x128xf32>
    %cst_33 = arith.constant 1.000000e+00 : f32
    %88 = vector.broadcast %cst_33 : f32 to vector<2x128xf32>
    %89 = arith.addf %88, %87 : vector<2x128xf32>
    %90 = arith.divf %88, %89 : vector<2x128xf32>
    %91 = math.tanh %85 : vector<2x128xf32>
    %92 = vector.extract_strided_slice %90 {offsets = [0, 0], sizes = [2, 32], strides = [1, 1]} : vector<2x128xf32> to vector<2x32xf32>
    %93 = vector.extract_strided_slice %90 {offsets = [0, 32], sizes = [2, 32], strides = [1, 1]} : vector<2x128xf32> to vector<2x32xf32>
    %94 = vector.extract_strided_slice %91 {offsets = [0, 64], sizes = [2, 32], strides = [1, 1]} : vector<2x128xf32> to vector<2x32xf32>
    %95 = vector.extract_strided_slice %90 {offsets = [0, 96], sizes = [2, 32], strides = [1, 1]} : vector<2x128xf32> to vector<2x32xf32>
    %96 = arith.mulf %93, %80 : vector<2x32xf32>
    %97 = arith.mulf %92, %94 : vector<2x32xf32>
    %98 = arith.addf %96, %97 : vector<2x32xf32>
    %99 = math.tanh %98 : vector<2x32xf32>
    %100 = arith.mulf %95, %99 : vector<2x32xf32>
    %101 = vector.broadcast %c2_i32 : i32 to vector<2x1xi32>
    %102 = arith.cmpi slt, %101, %22 : vector<2x1xi32>
    %103 = vector.shape_cast %102 : vector<2x1xi1> to vector<2x1xi1>
    %104 = vector.broadcast %103 : vector<2x1xi1> to vector<2x32xi1>
    %105 = arith.select %104, %100, %77 : vector<2x32xi1>, vector<2x32xf32>
    %106 = vector.shape_cast %102 : vector<2x1xi1> to vector<2x1xi1>
    %107 = vector.broadcast %106 : vector<2x1xi1> to vector<2x32xi1>
    %108 = arith.select %107, %98, %80 : vector<2x32xi1>, vector<2x32xf32>
    %c3_i32 = arith.constant 3 : i32
    %109 = arith.index_cast %c3_i32 : i32 to index
    %c0_34 = arith.constant 0 : index
    %c0_35 = arith.constant 0 : index
    %110 = vector.load %arg23[%109, %c0_34, %c0_35] : memref<8x2x128xf32, #tpu.memory_space<vmem>>, vector<1x2x128xf32>
    %111 = vector.shape_cast %110 : vector<1x2x128xf32> to vector<2x128xf32>
    %cst_36 = arith.constant dense<0.000000e+00> : vector<2x128xf32>
    %112 = tpu.matmul %105, %21, %cst_36 {dimension_numbers = #tpu.dot_dimension_numbers<[1], [0], [0], [1], [0, 0, 1, 1], [], []>} : vector<2x32xf32>, vector<32x128xf32>, vector<2x128xf32> -> vector<2x128xf32>
    %113 = arith.addf %111, %112 : vector<2x128xf32>
    %114 = arith.negf %113 : vector<2x128xf32>
    %115 = math.exp %114 : vector<2x128xf32>
    %cst_37 = arith.constant 1.000000e+00 : f32
    %116 = vector.broadcast %cst_37 : f32 to vector<2x128xf32>
    %117 = arith.addf %116, %115 : vector<2x128xf32>
    %118 = arith.divf %116, %117 : vector<2x128xf32>
    %119 = math.tanh %113 : vector<2x128xf32>
    %120 = vector.extract_strided_slice %118 {offsets = [0, 0], sizes = [2, 32], strides = [1, 1]} : vector<2x128xf32> to vector<2x32xf32>
    %121 = vector.extract_strided_slice %118 {offsets = [0, 32], sizes = [2, 32], strides = [1, 1]} : vector<2x128xf32> to vector<2x32xf32>
    %122 = vector.extract_strided_slice %119 {offsets = [0, 64], sizes = [2, 32], strides = [1, 1]} : vector<2x128xf32> to vector<2x32xf32>
    %123 = vector.extract_strided_slice %118 {offsets = [0, 96], sizes = [2, 32], strides = [1, 1]} : vector<2x128xf32> to vector<2x32xf32>
    %124 = arith.mulf %121, %108 : vector<2x32xf32>
    %125 = arith.mulf %120, %122 : vector<2x32xf32>
    %126 = arith.addf %124, %125 : vector<2x32xf32>
    %127 = math.tanh %126 : vector<2x32xf32>
    %128 = arith.mulf %123, %127 : vector<2x32xf32>
    %129 = vector.broadcast %c3_i32 : i32 to vector<2x1xi32>
    %130 = arith.cmpi slt, %129, %22 : vector<2x1xi32>
    %131 = vector.shape_cast %130 : vector<2x1xi1> to vector<2x1xi1>
    %132 = vector.broadcast %131 : vector<2x1xi1> to vector<2x32xi1>
    %133 = arith.select %132, %128, %105 : vector<2x32xi1>, vector<2x32xf32>
    %134 = vector.shape_cast %130 : vector<2x1xi1> to vector<2x1xi1>
    %135 = vector.broadcast %134 : vector<2x1xi1> to vector<2x32xi1>
    %136 = arith.select %135, %126, %108 : vector<2x32xi1>, vector<2x32xf32>
    %c4_i32 = arith.constant 4 : i32
    %137 = arith.index_cast %c4_i32 : i32 to index
    %c0_38 = arith.constant 0 : index
    %c0_39 = arith.constant 0 : index
    %138 = vector.load %arg23[%137, %c0_38, %c0_39] : memref<8x2x128xf32, #tpu.memory_space<vmem>>, vector<1x2x128xf32>
    %139 = vector.shape_cast %138 : vector<1x2x128xf32> to vector<2x128xf32>
    %cst_40 = arith.constant dense<0.000000e+00> : vector<2x128xf32>
    %140 = tpu.matmul %133, %21, %cst_40 {dimension_numbers = #tpu.dot_dimension_numbers<[1], [0], [0], [1], [0, 0, 1, 1], [], []>} : vector<2x32xf32>, vector<32x128xf32>, vector<2x128xf32> -> vector<2x128xf32>
    %141 = arith.addf %139, %140 : vector<2x128xf32>
    %142 = arith.negf %141 : vector<2x128xf32>
    %143 = math.exp %142 : vector<2x128xf32>
    %cst_41 = arith.constant 1.000000e+00 : f32
    %144 = vector.broadcast %cst_41 : f32 to vector<2x128xf32>
    %145 = arith.addf %144, %143 : vector<2x128xf32>
    %146 = arith.divf %144, %145 : vector<2x128xf32>
    %147 = math.tanh %141 : vector<2x128xf32>
    %148 = vector.extract_strided_slice %146 {offsets = [0, 0], sizes = [2, 32], strides = [1, 1]} : vector<2x128xf32> to vector<2x32xf32>
    %149 = vector.extract_strided_slice %146 {offsets = [0, 32], sizes = [2, 32], strides = [1, 1]} : vector<2x128xf32> to vector<2x32xf32>
    %150 = vector.extract_strided_slice %147 {offsets = [0, 64], sizes = [2, 32], strides = [1, 1]} : vector<2x128xf32> to vector<2x32xf32>
    %151 = vector.extract_strided_slice %146 {offsets = [0, 96], sizes = [2, 32], strides = [1, 1]} : vector<2x128xf32> to vector<2x32xf32>
    %152 = arith.mulf %149, %136 : vector<2x32xf32>
    %153 = arith.mulf %148, %150 : vector<2x32xf32>
    %154 = arith.addf %152, %153 : vector<2x32xf32>
    %155 = math.tanh %154 : vector<2x32xf32>
    %156 = arith.mulf %151, %155 : vector<2x32xf32>
    %157 = vector.broadcast %c4_i32 : i32 to vector<2x1xi32>
    %158 = arith.cmpi slt, %157, %22 : vector<2x1xi32>
    %159 = vector.shape_cast %158 : vector<2x1xi1> to vector<2x1xi1>
    %160 = vector.broadcast %159 : vector<2x1xi1> to vector<2x32xi1>
    %161 = arith.select %160, %156, %133 : vector<2x32xi1>, vector<2x32xf32>
    %162 = vector.shape_cast %158 : vector<2x1xi1> to vector<2x1xi1>
    %163 = vector.broadcast %162 : vector<2x1xi1> to vector<2x32xi1>
    %164 = arith.select %163, %154, %136 : vector<2x32xi1>, vector<2x32xf32>
    %c5_i32 = arith.constant 5 : i32
    %165 = arith.index_cast %c5_i32 : i32 to index
    %c0_42 = arith.constant 0 : index
    %c0_43 = arith.constant 0 : index
    %166 = vector.load %arg23[%165, %c0_42, %c0_43] : memref<8x2x128xf32, #tpu.memory_space<vmem>>, vector<1x2x128xf32>
    %167 = vector.shape_cast %166 : vector<1x2x128xf32> to vector<2x128xf32>
    %cst_44 = arith.constant dense<0.000000e+00> : vector<2x128xf32>
    %168 = tpu.matmul %161, %21, %cst_44 {dimension_numbers = #tpu.dot_dimension_numbers<[1], [0], [0], [1], [0, 0, 1, 1], [], []>} : vector<2x32xf32>, vector<32x128xf32>, vector<2x128xf32> -> vector<2x128xf32>
    %169 = arith.addf %167, %168 : vector<2x128xf32>
    %170 = arith.negf %169 : vector<2x128xf32>
    %171 = math.exp %170 : vector<2x128xf32>
    %cst_45 = arith.constant 1.000000e+00 : f32
    %172 = vector.broadcast %cst_45 : f32 to vector<2x128xf32>
    %173 = arith.addf %172, %171 : vector<2x128xf32>
    %174 = arith.divf %172, %173 : vector<2x128xf32>
    %175 = math.tanh %169 : vector<2x128xf32>
    %176 = vector.extract_strided_slice %174 {offsets = [0, 0], sizes = [2, 32], strides = [1, 1]} : vector<2x128xf32> to vector<2x32xf32>
    %177 = vector.extract_strided_slice %174 {offsets = [0, 32], sizes = [2, 32], strides = [1, 1]} : vector<2x128xf32> to vector<2x32xf32>
    %178 = vector.extract_strided_slice %175 {offsets = [0, 64], sizes = [2, 32], strides = [1, 1]} : vector<2x128xf32> to vector<2x32xf32>
    %179 = vector.extract_strided_slice %174 {offsets = [0, 96], sizes = [2, 32], strides = [1, 1]} : vector<2x128xf32> to vector<2x32xf32>
    %180 = arith.mulf %177, %164 : vector<2x32xf32>
    %181 = arith.mulf %176, %178 : vector<2x32xf32>
    %182 = arith.addf %180, %181 : vector<2x32xf32>
    %183 = math.tanh %182 : vector<2x32xf32>
    %184 = arith.mulf %179, %183 : vector<2x32xf32>
    %185 = vector.broadcast %c5_i32 : i32 to vector<2x1xi32>
    %186 = arith.cmpi slt, %185, %22 : vector<2x1xi32>
    %187 = vector.shape_cast %186 : vector<2x1xi1> to vector<2x1xi1>
    %188 = vector.broadcast %187 : vector<2x1xi1> to vector<2x32xi1>
    %189 = arith.select %188, %184, %161 : vector<2x32xi1>, vector<2x32xf32>
    %190 = vector.shape_cast %186 : vector<2x1xi1> to vector<2x1xi1>
    %191 = vector.broadcast %190 : vector<2x1xi1> to vector<2x32xi1>
    %192 = arith.select %191, %182, %164 : vector<2x32xi1>, vector<2x32xf32>
    %c6_i32 = arith.constant 6 : i32
    %193 = arith.index_cast %c6_i32 : i32 to index
    %c0_46 = arith.constant 0 : index
    %c0_47 = arith.constant 0 : index
    %194 = vector.load %arg23[%193, %c0_46, %c0_47] : memref<8x2x128xf32, #tpu.memory_space<vmem>>, vector<1x2x128xf32>
    %195 = vector.shape_cast %194 : vector<1x2x128xf32> to vector<2x128xf32>
    %cst_48 = arith.constant dense<0.000000e+00> : vector<2x128xf32>
    %196 = tpu.matmul %189, %21, %cst_48 {dimension_numbers = #tpu.dot_dimension_numbers<[1], [0], [0], [1], [0, 0, 1, 1], [], []>} : vector<2x32xf32>, vector<32x128xf32>, vector<2x128xf32> -> vector<2x128xf32>
    %197 = arith.addf %195, %196 : vector<2x128xf32>
    %198 = arith.negf %197 : vector<2x128xf32>
    %199 = math.exp %198 : vector<2x128xf32>
    %cst_49 = arith.constant 1.000000e+00 : f32
    %200 = vector.broadcast %cst_49 : f32 to vector<2x128xf32>
    %201 = arith.addf %200, %199 : vector<2x128xf32>
    %202 = arith.divf %200, %201 : vector<2x128xf32>
    %203 = math.tanh %197 : vector<2x128xf32>
    %204 = vector.extract_strided_slice %202 {offsets = [0, 0], sizes = [2, 32], strides = [1, 1]} : vector<2x128xf32> to vector<2x32xf32>
    %205 = vector.extract_strided_slice %202 {offsets = [0, 32], sizes = [2, 32], strides = [1, 1]} : vector<2x128xf32> to vector<2x32xf32>
    %206 = vector.extract_strided_slice %203 {offsets = [0, 64], sizes = [2, 32], strides = [1, 1]} : vector<2x128xf32> to vector<2x32xf32>
    %207 = vector.extract_strided_slice %202 {offsets = [0, 96], sizes = [2, 32], strides = [1, 1]} : vector<2x128xf32> to vector<2x32xf32>
    %208 = arith.mulf %205, %192 : vector<2x32xf32>
    %209 = arith.mulf %204, %206 : vector<2x32xf32>
    %210 = arith.addf %208, %209 : vector<2x32xf32>
    %211 = math.tanh %210 : vector<2x32xf32>
    %212 = arith.mulf %207, %211 : vector<2x32xf32>
    %213 = vector.broadcast %c6_i32 : i32 to vector<2x1xi32>
    %214 = arith.cmpi slt, %213, %22 : vector<2x1xi32>
    %215 = vector.shape_cast %214 : vector<2x1xi1> to vector<2x1xi1>
    %216 = vector.broadcast %215 : vector<2x1xi1> to vector<2x32xi1>
    %217 = arith.select %216, %212, %189 : vector<2x32xi1>, vector<2x32xf32>
    %218 = vector.shape_cast %214 : vector<2x1xi1> to vector<2x1xi1>
    %219 = vector.broadcast %218 : vector<2x1xi1> to vector<2x32xi1>
    %220 = arith.select %219, %210, %192 : vector<2x32xi1>, vector<2x32xf32>
    %c7_i32 = arith.constant 7 : i32
    %221 = arith.index_cast %c7_i32 : i32 to index
    %c0_50 = arith.constant 0 : index
    %c0_51 = arith.constant 0 : index
    %222 = vector.load %arg23[%221, %c0_50, %c0_51] : memref<8x2x128xf32, #tpu.memory_space<vmem>>, vector<1x2x128xf32>
    %223 = vector.shape_cast %222 : vector<1x2x128xf32> to vector<2x128xf32>
    %cst_52 = arith.constant dense<0.000000e+00> : vector<2x128xf32>
    %224 = tpu.matmul %217, %21, %cst_52 {dimension_numbers = #tpu.dot_dimension_numbers<[1], [0], [0], [1], [0, 0, 1, 1], [], []>} : vector<2x32xf32>, vector<32x128xf32>, vector<2x128xf32> -> vector<2x128xf32>
    %225 = arith.addf %223, %224 : vector<2x128xf32>
    %226 = arith.negf %225 : vector<2x128xf32>
    %227 = math.exp %226 : vector<2x128xf32>
    %cst_53 = arith.constant 1.000000e+00 : f32
    %228 = vector.broadcast %cst_53 : f32 to vector<2x128xf32>
    %229 = arith.addf %228, %227 : vector<2x128xf32>
    %230 = arith.divf %228, %229 : vector<2x128xf32>
    %231 = math.tanh %225 : vector<2x128xf32>
    %232 = vector.extract_strided_slice %230 {offsets = [0, 0], sizes = [2, 32], strides = [1, 1]} : vector<2x128xf32> to vector<2x32xf32>
    %233 = vector.extract_strided_slice %230 {offsets = [0, 32], sizes = [2, 32], strides = [1, 1]} : vector<2x128xf32> to vector<2x32xf32>
    %234 = vector.extract_strided_slice %231 {offsets = [0, 64], sizes = [2, 32], strides = [1, 1]} : vector<2x128xf32> to vector<2x32xf32>
    %235 = vector.extract_strided_slice %230 {offsets = [0, 96], sizes = [2, 32], strides = [1, 1]} : vector<2x128xf32> to vector<2x32xf32>
    %236 = arith.mulf %233, %220 : vector<2x32xf32>
    %237 = arith.mulf %232, %234 : vector<2x32xf32>
    %238 = arith.addf %236, %237 : vector<2x32xf32>
    %239 = math.tanh %238 : vector<2x32xf32>
    %240 = arith.mulf %235, %239 : vector<2x32xf32>
    %241 = vector.broadcast %c7_i32 : i32 to vector<2x1xi32>
    %242 = arith.cmpi slt, %241, %22 : vector<2x1xi32>
    %243 = vector.shape_cast %242 : vector<2x1xi1> to vector<2x1xi1>
    %244 = vector.broadcast %243 : vector<2x1xi1> to vector<2x32xi1>
    %245 = arith.select %244, %240, %217 : vector<2x32xi1>, vector<2x32xf32>
    %246 = vector.shape_cast %242 : vector<2x1xi1> to vector<2x1xi1>
    %247 = vector.broadcast %246 : vector<2x1xi1> to vector<2x32xi1>
    %248 = arith.select %247, %238, %220 : vector<2x32xi1>, vector<2x32xf32>
    %c8_i32 = arith.constant 8 : i32
    %c0_54 = arith.constant 0 : index
    %c0_55 = arith.constant 0 : index
    %249 = vector.load %arg6[%c0_54, %c0_55] : memref<32x32xf32, #tpu.memory_space<vmem>>, vector<32x32xf32>
    %cst_56 = arith.constant dense<0.000000e+00> : vector<2x32xf32>
    %250 = tpu.matmul %245, %249, %cst_56 {dimension_numbers = #tpu.dot_dimension_numbers<[1], [0], [0], [1], [0, 0, 1, 1], [], []>} : vector<2x32xf32>, vector<32x32xf32>, vector<2x32xf32> -> vector<2x32xf32>
    %c0_57 = arith.constant 0 : index
    %c0_58 = arith.constant 0 : index
    %251 = vector.load %arg7[%c0_57, %c0_58] : memref<1x32xf32, #tpu.memory_space<vmem>>, vector<1x32xf32>
    %252 = vector.broadcast %251 : vector<1x32xf32> to vector<2x32xf32>
    %253 = arith.addf %250, %252 : vector<2x32xf32>
    %cst_59 = arith.constant 0.000000e+00 : f32
    %254 = vector.broadcast %cst_59 : f32 to vector<2x32xf32>
    %255 = arith.maximumf %253, %254 : vector<2x32xf32>
    %c0_60 = arith.constant 0 : index
    %c0_61 = arith.constant 0 : index
    %256 = vector.load %arg8[%c0_60, %c0_61] : memref<32x32xf32, #tpu.memory_space<vmem>>, vector<32x32xf32>
    %cst_62 = arith.constant dense<0.000000e+00> : vector<2x32xf32>
    %257 = tpu.matmul %255, %256, %cst_62 {dimension_numbers = #tpu.dot_dimension_numbers<[1], [0], [0], [1], [0, 0, 1, 1], [], []>} : vector<2x32xf32>, vector<32x32xf32>, vector<2x32xf32> -> vector<2x32xf32>
    %c0_63 = arith.constant 0 : index
    %c0_64 = arith.constant 0 : index
    %258 = vector.load %arg9[%c0_63, %c0_64] : memref<1x32xf32, #tpu.memory_space<vmem>>, vector<1x32xf32>
    %259 = vector.broadcast %258 : vector<1x32xf32> to vector<2x32xf32>
    %260 = arith.addf %257, %259 : vector<2x32xf32>
    %c0_65 = arith.constant 0 : index
    %c0_66 = arith.constant 0 : index
    %261 = vector.load %arg19[%c0_65, %c0_66] : memref<2x32xf32, #tpu.memory_space<vmem>>, vector<2x32xf32>
    tpu.vector_store %arg19[%c0_65, %c0_66], %260 {strides = array<i32>} : memref<2x32xf32, #tpu.memory_space<vmem>>, vector<2x32xf32>,
    %c0_67 = arith.constant 0 : index
    %c0_68 = arith.constant 0 : index
    %262 = vector.load %arg10[%c0_67, %c0_68] : memref<32x32xf32, #tpu.memory_space<vmem>>, vector<32x32xf32>
    %cst_69 = arith.constant dense<0.000000e+00> : vector<2x32xf32>
    %263 = tpu.matmul %260, %262, %cst_69 {dimension_numbers = #tpu.dot_dimension_numbers<[1], [0], [0], [1], [0, 0, 1, 1], [], []>} : vector<2x32xf32>, vector<32x32xf32>, vector<2x32xf32> -> vector<2x32xf32>
    %c0_70 = arith.constant 0 : index
    %c0_71 = arith.constant 0 : index
    %264 = vector.load %arg11[%c0_70, %c0_71] : memref<1x32xf32, #tpu.memory_space<vmem>>, vector<1x32xf32>
    %265 = vector.broadcast %264 : vector<1x32xf32> to vector<2x32xf32>
    %266 = arith.addf %263, %265 : vector<2x32xf32>
    %cst_72 = arith.constant 0.000000e+00 : f32
    %267 = vector.broadcast %cst_72 : f32 to vector<2x32xf32>
    %268 = arith.maximumf %266, %267 : vector<2x32xf32>
    %c0_73 = arith.constant 0 : index
    %c0_74 = arith.constant 0 : index
    %269 = vector.load %arg12[%c0_73, %c0_74] : memref<32x32xf32, #tpu.memory_space<vmem>>, vector<32x32xf32>
    %cst_75 = arith.constant dense<0.000000e+00> : vector<2x32xf32>
    %270 = tpu.matmul %268, %269, %cst_75 {dimension_numbers = #tpu.dot_dimension_numbers<[1], [0], [0], [1], [0, 0, 1, 1], [], []>} : vector<2x32xf32>, vector<32x32xf32>, vector<2x32xf32> -> vector<2x32xf32>
    %c0_76 = arith.constant 0 : index
    %c0_77 = arith.constant 0 : index
    %271 = vector.load %arg13[%c0_76, %c0_77] : memref<1x32xf32, #tpu.memory_space<vmem>>, vector<1x32xf32>
    %272 = vector.broadcast %271 : vector<1x32xf32> to vector<2x32xf32>
    %273 = arith.addf %270, %272 : vector<2x32xf32>
    %c0_78 = arith.constant 0 : index
    %c0_79 = arith.constant 0 : index
    %274 = vector.load %arg16[%c0_78, %c0_79] : memref<32x128xf32, #tpu.memory_space<vmem>>, vector<32x128xf32>
    %cst_80 = arith.constant 0.000000e+00 : f32
    %275 = vector.broadcast %cst_80 : f32 to vector<2x32xf32>
    %c0_i32_81 = arith.constant 0 : i32
    %276 = arith.index_cast %c0_i32_81 : i32 to index
    %c0_82 = arith.constant 0 : index
    %c0_83 = arith.constant 0 : index
    %277 = vector.load %arg24[%276, %c0_82, %c0_83] : memref<7x2x128xf32, #tpu.memory_space<vmem>>, vector<1x2x128xf32>
    %278 = vector.shape_cast %277 : vector<1x2x128xf32> to vector<2x128xf32>
    %cst_84 = arith.constant dense<0.000000e+00> : vector<2x128xf32>
    %279 = tpu.matmul %273, %274, %cst_84 {dimension_numbers = #tpu.dot_dimension_numbers<[1], [0], [0], [1], [0, 0, 1, 1], [], []>} : vector<2x32xf32>, vector<32x128xf32>, vector<2x128xf32> -> vector<2x128xf32>
    %280 = arith.addf %278, %279 : vector<2x128xf32>
    %281 = arith.negf %280 : vector<2x128xf32>
    %282 = math.exp %281 : vector<2x128xf32>
    %cst_85 = arith.constant 1.000000e+00 : f32
    %283 = vector.broadcast %cst_85 : f32 to vector<2x128xf32>
    %284 = arith.addf %283, %282 : vector<2x128xf32>
    %285 = arith.divf %283, %284 : vector<2x128xf32>
    %286 = math.tanh %280 : vector<2x128xf32>
    %287 = vector.extract_strided_slice %285 {offsets = [0, 0], sizes = [2, 32], strides = [1, 1]} : vector<2x128xf32> to vector<2x32xf32>
    %288 = vector.extract_strided_slice %285 {offsets = [0, 32], sizes = [2, 32], strides = [1, 1]} : vector<2x128xf32> to vector<2x32xf32>
    %289 = vector.extract_strided_slice %286 {offsets = [0, 64], sizes = [2, 32], strides = [1, 1]} : vector<2x128xf32> to vector<2x32xf32>
    %290 = vector.extract_strided_slice %285 {offsets = [0, 96], sizes = [2, 32], strides = [1, 1]} : vector<2x128xf32> to vector<2x32xf32>
    %291 = arith.mulf %288, %275 : vector<2x32xf32>
    %292 = arith.mulf %287, %289 : vector<2x32xf32>
    %293 = arith.addf %291, %292 : vector<2x32xf32>
    %294 = math.tanh %293 : vector<2x32xf32>
    %295 = arith.mulf %290, %294 : vector<2x32xf32>
    %296 = arith.index_cast %c0_i32_81 : i32 to index
    %c0_86 = arith.constant 0 : index
    %c0_87 = arith.constant 0 : index
    %297 = vector.load %arg25[%296, %c0_86, %c0_87] : memref<7x2x32xf32, #tpu.memory_space<vmem>>, vector<1x2x32xf32>
    %298 = vector.shape_cast %297 : vector<1x2x32xf32> to vector<2x32xf32>
    %299 = vector.shape_cast %295 : vector<2x32xf32> to vector<1x2x32xf32>
    tpu.vector_store %arg25[%296, %c0_86, %c0_87], %299 {strides = array<i32>} : memref<7x2x32xf32, #tpu.memory_space<vmem>>, vector<1x2x32xf32>,
    %c1_i32_88 = arith.constant 1 : i32
    %300 = arith.index_cast %c1_i32_88 : i32 to index
    %c0_89 = arith.constant 0 : index
    %c0_90 = arith.constant 0 : index
    %301 = vector.load %arg24[%300, %c0_89, %c0_90] : memref<7x2x128xf32, #tpu.memory_space<vmem>>, vector<1x2x128xf32>
    %302 = vector.shape_cast %301 : vector<1x2x128xf32> to vector<2x128xf32>
    %cst_91 = arith.constant dense<0.000000e+00> : vector<2x128xf32>
    %303 = tpu.matmul %295, %274, %cst_91 {dimension_numbers = #tpu.dot_dimension_numbers<[1], [0], [0], [1], [0, 0, 1, 1], [], []>} : vector<2x32xf32>, vector<32x128xf32>, vector<2x128xf32> -> vector<2x128xf32>
    %304 = arith.addf %302, %303 : vector<2x128xf32>
    %305 = arith.negf %304 : vector<2x128xf32>
    %306 = math.exp %305 : vector<2x128xf32>
    %cst_92 = arith.constant 1.000000e+00 : f32
    %307 = vector.broadcast %cst_92 : f32 to vector<2x128xf32>
    %308 = arith.addf %307, %306 : vector<2x128xf32>
    %309 = arith.divf %307, %308 : vector<2x128xf32>
    %310 = math.tanh %304 : vector<2x128xf32>
    %311 = vector.extract_strided_slice %309 {offsets = [0, 0], sizes = [2, 32], strides = [1, 1]} : vector<2x128xf32> to vector<2x32xf32>
    %312 = vector.extract_strided_slice %309 {offsets = [0, 32], sizes = [2, 32], strides = [1, 1]} : vector<2x128xf32> to vector<2x32xf32>
    %313 = vector.extract_strided_slice %310 {offsets = [0, 64], sizes = [2, 32], strides = [1, 1]} : vector<2x128xf32> to vector<2x32xf32>
    %314 = vector.extract_strided_slice %309 {offsets = [0, 96], sizes = [2, 32], strides = [1, 1]} : vector<2x128xf32> to vector<2x32xf32>
    %315 = arith.mulf %312, %293 : vector<2x32xf32>
    %316 = arith.mulf %311, %313 : vector<2x32xf32>
    %317 = arith.addf %315, %316 : vector<2x32xf32>
    %318 = math.tanh %317 : vector<2x32xf32>
    %319 = arith.mulf %314, %318 : vector<2x32xf32>
    %320 = arith.index_cast %c1_i32_88 : i32 to index
    %c0_93 = arith.constant 0 : index
    %c0_94 = arith.constant 0 : index
    %321 = vector.load %arg25[%320, %c0_93, %c0_94] : memref<7x2x32xf32, #tpu.memory_space<vmem>>, vector<1x2x32xf32>
    %322 = vector.shape_cast %321 : vector<1x2x32xf32> to vector<2x32xf32>
    %323 = vector.shape_cast %319 : vector<2x32xf32> to vector<1x2x32xf32>
    tpu.vector_store %arg25[%320, %c0_93, %c0_94], %323 {strides = array<i32>} : memref<7x2x32xf32, #tpu.memory_space<vmem>>, vector<1x2x32xf32>,
    %c2_i32_95 = arith.constant 2 : i32
    %324 = arith.index_cast %c2_i32_95 : i32 to index
    %c0_96 = arith.constant 0 : index
    %c0_97 = arith.constant 0 : index
    %325 = vector.load %arg24[%324, %c0_96, %c0_97] : memref<7x2x128xf32, #tpu.memory_space<vmem>>, vector<1x2x128xf32>
    %326 = vector.shape_cast %325 : vector<1x2x128xf32> to vector<2x128xf32>
    %cst_98 = arith.constant dense<0.000000e+00> : vector<2x128xf32>
    %327 = tpu.matmul %319, %274, %cst_98 {dimension_numbers = #tpu.dot_dimension_numbers<[1], [0], [0], [1], [0, 0, 1, 1], [], []>} : vector<2x32xf32>, vector<32x128xf32>, vector<2x128xf32> -> vector<2x128xf32>
    %328 = arith.addf %326, %327 : vector<2x128xf32>
    %329 = arith.negf %328 : vector<2x128xf32>
    %330 = math.exp %329 : vector<2x128xf32>
    %cst_99 = arith.constant 1.000000e+00 : f32
    %331 = vector.broadcast %cst_99 : f32 to vector<2x128xf32>
    %332 = arith.addf %331, %330 : vector<2x128xf32>
    %333 = arith.divf %331, %332 : vector<2x128xf32>
    %334 = math.tanh %328 : vector<2x128xf32>
    %335 = vector.extract_strided_slice %333 {offsets = [0, 0], sizes = [2, 32], strides = [1, 1]} : vector<2x128xf32> to vector<2x32xf32>
    %336 = vector.extract_strided_slice %333 {offsets = [0, 32], sizes = [2, 32], strides = [1, 1]} : vector<2x128xf32> to vector<2x32xf32>
    %337 = vector.extract_strided_slice %334 {offsets = [0, 64], sizes = [2, 32], strides = [1, 1]} : vector<2x128xf32> to vector<2x32xf32>
    %338 = vector.extract_strided_slice %333 {offsets = [0, 96], sizes = [2, 32], strides = [1, 1]} : vector<2x128xf32> to vector<2x32xf32>
    %339 = arith.mulf %336, %317 : vector<2x32xf32>
    %340 = arith.mulf %335, %337 : vector<2x32xf32>
    %341 = arith.addf %339, %340 : vector<2x32xf32>
    %342 = math.tanh %341 : vector<2x32xf32>
    %343 = arith.mulf %338, %342 : vector<2x32xf32>
    %344 = arith.index_cast %c2_i32_95 : i32 to index
    %c0_100 = arith.constant 0 : index
    %c0_101 = arith.constant 0 : index
    %345 = vector.load %arg25[%344, %c0_100, %c0_101] : memref<7x2x32xf32, #tpu.memory_space<vmem>>, vector<1x2x32xf32>
    %346 = vector.shape_cast %345 : vector<1x2x32xf32> to vector<2x32xf32>
    %347 = vector.shape_cast %343 : vector<2x32xf32> to vector<1x2x32xf32>
    tpu.vector_store %arg25[%344, %c0_100, %c0_101], %347 {strides = array<i32>} : memref<7x2x32xf32, #tpu.memory_space<vmem>>, vector<1x2x32xf32>,
    %c3_i32_102 = arith.constant 3 : i32
    %348 = arith.index_cast %c3_i32_102 : i32 to index
    %c0_103 = arith.constant 0 : index
    %c0_104 = arith.constant 0 : index
    %349 = vector.load %arg24[%348, %c0_103, %c0_104] : memref<7x2x128xf32, #tpu.memory_space<vmem>>, vector<1x2x128xf32>
    %350 = vector.shape_cast %349 : vector<1x2x128xf32> to vector<2x128xf32>
    %cst_105 = arith.constant dense<0.000000e+00> : vector<2x128xf32>
    %351 = tpu.matmul %343, %274, %cst_105 {dimension_numbers = #tpu.dot_dimension_numbers<[1], [0], [0], [1], [0, 0, 1, 1], [], []>} : vector<2x32xf32>, vector<32x128xf32>, vector<2x128xf32> -> vector<2x128xf32>
    %352 = arith.addf %350, %351 : vector<2x128xf32>
    %353 = arith.negf %352 : vector<2x128xf32>
    %354 = math.exp %353 : vector<2x128xf32>
    %cst_106 = arith.constant 1.000000e+00 : f32
    %355 = vector.broadcast %cst_106 : f32 to vector<2x128xf32>
    %356 = arith.addf %355, %354 : vector<2x128xf32>
    %357 = arith.divf %355, %356 : vector<2x128xf32>
    %358 = math.tanh %352 : vector<2x128xf32>
    %359 = vector.extract_strided_slice %357 {offsets = [0, 0], sizes = [2, 32], strides = [1, 1]} : vector<2x128xf32> to vector<2x32xf32>
    %360 = vector.extract_strided_slice %357 {offsets = [0, 32], sizes = [2, 32], strides = [1, 1]} : vector<2x128xf32> to vector<2x32xf32>
    %361 = vector.extract_strided_slice %358 {offsets = [0, 64], sizes = [2, 32], strides = [1, 1]} : vector<2x128xf32> to vector<2x32xf32>
    %362 = vector.extract_strided_slice %357 {offsets = [0, 96], sizes = [2, 32], strides = [1, 1]} : vector<2x128xf32> to vector<2x32xf32>
    %363 = arith.mulf %360, %341 : vector<2x32xf32>
    %364 = arith.mulf %359, %361 : vector<2x32xf32>
    %365 = arith.addf %363, %364 : vector<2x32xf32>
    %366 = math.tanh %365 : vector<2x32xf32>
    %367 = arith.mulf %362, %366 : vector<2x32xf32>
    %368 = arith.index_cast %c3_i32_102 : i32 to index
    %c0_107 = arith.constant 0 : index
    %c0_108 = arith.constant 0 : index
    %369 = vector.load %arg25[%368, %c0_107, %c0_108] : memref<7x2x32xf32, #tpu.memory_space<vmem>>, vector<1x2x32xf32>
    %370 = vector.shape_cast %369 : vector<1x2x32xf32> to vector<2x32xf32>
    %371 = vector.shape_cast %367 : vector<2x32xf32> to vector<1x2x32xf32>
    tpu.vector_store %arg25[%368, %c0_107, %c0_108], %371 {strides = array<i32>} : memref<7x2x32xf32, #tpu.memory_space<vmem>>, vector<1x2x32xf32>,
    %c4_i32_109 = arith.constant 4 : i32
    %372 = arith.index_cast %c4_i32_109 : i32 to index
    %c0_110 = arith.constant 0 : index
    %c0_111 = arith.constant 0 : index
    %373 = vector.load %arg24[%372, %c0_110, %c0_111] : memref<7x2x128xf32, #tpu.memory_space<vmem>>, vector<1x2x128xf32>
    %374 = vector.shape_cast %373 : vector<1x2x128xf32> to vector<2x128xf32>
    %cst_112 = arith.constant dense<0.000000e+00> : vector<2x128xf32>
    %375 = tpu.matmul %367, %274, %cst_112 {dimension_numbers = #tpu.dot_dimension_numbers<[1], [0], [0], [1], [0, 0, 1, 1], [], []>} : vector<2x32xf32>, vector<32x128xf32>, vector<2x128xf32> -> vector<2x128xf32>
    %376 = arith.addf %374, %375 : vector<2x128xf32>
    %377 = arith.negf %376 : vector<2x128xf32>
    %378 = math.exp %377 : vector<2x128xf32>
    %cst_113 = arith.constant 1.000000e+00 : f32
    %379 = vector.broadcast %cst_113 : f32 to vector<2x128xf32>
    %380 = arith.addf %379, %378 : vector<2x128xf32>
    %381 = arith.divf %379, %380 : vector<2x128xf32>
    %382 = math.tanh %376 : vector<2x128xf32>
    %383 = vector.extract_strided_slice %381 {offsets = [0, 0], sizes = [2, 32], strides = [1, 1]} : vector<2x128xf32> to vector<2x32xf32>
    %384 = vector.extract_strided_slice %381 {offsets = [0, 32], sizes = [2, 32], strides = [1, 1]} : vector<2x128xf32> to vector<2x32xf32>
    %385 = vector.extract_strided_slice %382 {offsets = [0, 64], sizes = [2, 32], strides = [1, 1]} : vector<2x128xf32> to vector<2x32xf32>
    %386 = vector.extract_strided_slice %381 {offsets = [0, 96], sizes = [2, 32], strides = [1, 1]} : vector<2x128xf32> to vector<2x32xf32>
    %387 = arith.mulf %384, %365 : vector<2x32xf32>
    %388 = arith.mulf %383, %385 : vector<2x32xf32>
    %389 = arith.addf %387, %388 : vector<2x32xf32>
    %390 = math.tanh %389 : vector<2x32xf32>
    %391 = arith.mulf %386, %390 : vector<2x32xf32>
    %392 = arith.index_cast %c4_i32_109 : i32 to index
    %c0_114 = arith.constant 0 : index
    %c0_115 = arith.constant 0 : index
    %393 = vector.load %arg25[%392, %c0_114, %c0_115] : memref<7x2x32xf32, #tpu.memory_space<vmem>>, vector<1x2x32xf32>
    %394 = vector.shape_cast %393 : vector<1x2x32xf32> to vector<2x32xf32>
    %395 = vector.shape_cast %391 : vector<2x32xf32> to vector<1x2x32xf32>
    tpu.vector_store %arg25[%392, %c0_114, %c0_115], %395 {strides = array<i32>} : memref<7x2x32xf32, #tpu.memory_space<vmem>>, vector<1x2x32xf32>,
    %c5_i32_116 = arith.constant 5 : i32
    %396 = arith.index_cast %c5_i32_116 : i32 to index
    %c0_117 = arith.constant 0 : index
    %c0_118 = arith.constant 0 : index
    %397 = vector.load %arg24[%396, %c0_117, %c0_118] : memref<7x2x128xf32, #tpu.memory_space<vmem>>, vector<1x2x128xf32>
    %398 = vector.shape_cast %397 : vector<1x2x128xf32> to vector<2x128xf32>
    %cst_119 = arith.constant dense<0.000000e+00> : vector<2x128xf32>
    %399 = tpu.matmul %391, %274, %cst_119 {dimension_numbers = #tpu.dot_dimension_numbers<[1], [0], [0], [1], [0, 0, 1, 1], [], []>} : vector<2x32xf32>, vector<32x128xf32>, vector<2x128xf32> -> vector<2x128xf32>
    %400 = arith.addf %398, %399 : vector<2x128xf32>
    %401 = arith.negf %400 : vector<2x128xf32>
    %402 = math.exp %401 : vector<2x128xf32>
    %cst_120 = arith.constant 1.000000e+00 : f32
    %403 = vector.broadcast %cst_120 : f32 to vector<2x128xf32>
    %404 = arith.addf %403, %402 : vector<2x128xf32>
    %405 = arith.divf %403, %404 : vector<2x128xf32>
    %406 = math.tanh %400 : vector<2x128xf32>
    %407 = vector.extract_strided_slice %405 {offsets = [0, 0], sizes = [2, 32], strides = [1, 1]} : vector<2x128xf32> to vector<2x32xf32>
    %408 = vector.extract_strided_slice %405 {offsets = [0, 32], sizes = [2, 32], strides = [1, 1]} : vector<2x128xf32> to vector<2x32xf32>
    %409 = vector.extract_strided_slice %406 {offsets = [0, 64], sizes = [2, 32], strides = [1, 1]} : vector<2x128xf32> to vector<2x32xf32>
    %410 = vector.extract_strided_slice %405 {offsets = [0, 96], sizes = [2, 32], strides = [1, 1]} : vector<2x128xf32> to vector<2x32xf32>
    %411 = arith.mulf %408, %389 : vector<2x32xf32>
    %412 = arith.mulf %407, %409 : vector<2x32xf32>
    %413 = arith.addf %411, %412 : vector<2x32xf32>
    %414 = math.tanh %413 : vector<2x32xf32>
    %415 = arith.mulf %410, %414 : vector<2x32xf32>
    %416 = arith.index_cast %c5_i32_116 : i32 to index
    %c0_121 = arith.constant 0 : index
    %c0_122 = arith.constant 0 : index
    %417 = vector.load %arg25[%416, %c0_121, %c0_122] : memref<7x2x32xf32, #tpu.memory_space<vmem>>, vector<1x2x32xf32>
    %418 = vector.shape_cast %417 : vector<1x2x32xf32> to vector<2x32xf32>
    %419 = vector.shape_cast %415 : vector<2x32xf32> to vector<1x2x32xf32>
    tpu.vector_store %arg25[%416, %c0_121, %c0_122], %419 {strides = array<i32>} : memref<7x2x32xf32, #tpu.memory_space<vmem>>, vector<1x2x32xf32>,
    %c6_i32_123 = arith.constant 6 : i32
    %420 = arith.index_cast %c6_i32_123 : i32 to index
    %c0_124 = arith.constant 0 : index
    %c0_125 = arith.constant 0 : index
    %421 = vector.load %arg24[%420, %c0_124, %c0_125] : memref<7x2x128xf32, #tpu.memory_space<vmem>>, vector<1x2x128xf32>
    %422 = vector.shape_cast %421 : vector<1x2x128xf32> to vector<2x128xf32>
    %cst_126 = arith.constant dense<0.000000e+00> : vector<2x128xf32>
    %423 = tpu.matmul %415, %274, %cst_126 {dimension_numbers = #tpu.dot_dimension_numbers<[1], [0], [0], [1], [0, 0, 1, 1], [], []>} : vector<2x32xf32>, vector<32x128xf32>, vector<2x128xf32> -> vector<2x128xf32>
    %424 = arith.addf %422, %423 : vector<2x128xf32>
    %425 = arith.negf %424 : vector<2x128xf32>
    %426 = math.exp %425 : vector<2x128xf32>
    %cst_127 = arith.constant 1.000000e+00 : f32
    %427 = vector.broadcast %cst_127 : f32 to vector<2x128xf32>
    %428 = arith.addf %427, %426 : vector<2x128xf32>
    %429 = arith.divf %427, %428 : vector<2x128xf32>
    %430 = math.tanh %424 : vector<2x128xf32>
    %431 = vector.extract_strided_slice %429 {offsets = [0, 0], sizes = [2, 32], strides = [1, 1]} : vector<2x128xf32> to vector<2x32xf32>
    %432 = vector.extract_strided_slice %429 {offsets = [0, 32], sizes = [2, 32], strides = [1, 1]} : vector<2x128xf32> to vector<2x32xf32>
    %433 = vector.extract_strided_slice %430 {offsets = [0, 64], sizes = [2, 32], strides = [1, 1]} : vector<2x128xf32> to vector<2x32xf32>
    %434 = vector.extract_strided_slice %429 {offsets = [0, 96], sizes = [2, 32], strides = [1, 1]} : vector<2x128xf32> to vector<2x32xf32>
    %435 = arith.mulf %432, %413 : vector<2x32xf32>
    %436 = arith.mulf %431, %433 : vector<2x32xf32>
    %437 = arith.addf %435, %436 : vector<2x32xf32>
    %438 = math.tanh %437 : vector<2x32xf32>
    %439 = arith.mulf %434, %438 : vector<2x32xf32>
    %440 = arith.index_cast %c6_i32_123 : i32 to index
    %c0_128 = arith.constant 0 : index
    %c0_129 = arith.constant 0 : index
    %441 = vector.load %arg25[%440, %c0_128, %c0_129] : memref<7x2x32xf32, #tpu.memory_space<vmem>>, vector<1x2x32xf32>
    %442 = vector.shape_cast %441 : vector<1x2x32xf32> to vector<2x32xf32>
    %443 = vector.shape_cast %439 : vector<2x32xf32> to vector<1x2x32xf32>
    tpu.vector_store %arg25[%440, %c0_128, %c0_129], %443 {strides = array<i32>} : memref<7x2x32xf32, #tpu.memory_space<vmem>>, vector<1x2x32xf32>,
    %c7_i32_130 = arith.constant 7 : i32
    %c0_131 = arith.constant 0 : index
    %c0_132 = arith.constant 0 : index
    %444 = vector.load %arg21[%c0_131, %c0_132] : memref<2x32xf32, #tpu.memory_space<vmem>>, vector<2x32xf32>
    tpu.vector_store %arg21[%c0_131, %c0_132], %439 {strides = array<i32>} : memref<2x32xf32, #tpu.memory_space<vmem>>, vector<2x32xf32>,
    %c0_133 = arith.constant 0 : index
    %c0_134 = arith.constant 0 : index
    %445 = vector.load %arg22[%c0_133, %c0_134] : memref<2x32xf32, #tpu.memory_space<vmem>>, vector<2x32xf32>
    tpu.vector_store %arg22[%c0_133, %c0_134], %437 {strides = array<i32>} : memref<2x32xf32, #tpu.memory_space<vmem>>, vector<2x32xf32>,
    %c0_135 = arith.constant 0 : index
    %c0_136 = arith.constant 0 : index
    %c0_137 = arith.constant 0 : index
    %446 = vector.load %arg25[%c0_135, %c0_136, %c0_137] : memref<7x2x32xf32, #tpu.memory_space<vmem>>, vector<7x2x32xf32>
    %447 = vector.shape_cast %446 : vector<7x2x32xf32> to vector<14x32xf32>
    %c0_138 = arith.constant 0 : index
    %c0_139 = arith.constant 0 : index
    %448 = vector.load %arg17[%c0_138, %c0_139] : memref<32x128xf32, #tpu.memory_space<vmem>>, vector<32x128xf32>
    %cst_140 = arith.constant dense<0.000000e+00> : vector<14x128xf32>
    %449 = tpu.matmul %447, %448, %cst_140 {dimension_numbers = #tpu.dot_dimension_numbers<[1], [0], [0], [1], [0, 0, 1, 1], [], []>} : vector<14x32xf32>, vector<32x128xf32>, vector<14x128xf32> -> vector<14x128xf32>
    %c0_141 = arith.constant 0 : index
    %c0_142 = arith.constant 0 : index
    %450 = vector.load %arg18[%c0_141, %c0_142] : memref<1x128xf32, #tpu.memory_space<vmem>>, vector<1x128xf32>
    %451 = vector.broadcast %450 : vector<1x128xf32> to vector<14x128xf32>
    %452 = arith.addf %449, %451 : vector<14x128xf32>
    %cst_143 = arith.constant dense<0xFF800000> : vector<14xf32>
    %453 = vector.multi_reduction <maximumf>, %452, %cst_143 [1] : vector<14x128xf32> to vector<14xf32>
    %454 = vector.shape_cast %453 : vector<14xf32> to vector<14x1xf32>
    %455 = vector.broadcast %454 : vector<14x1xf32> to vector<14x128xf32>
    %456 = arith.subf %452, %455 : vector<14x128xf32>
    %457 = math.exp %456 : vector<14x128xf32>
    %cst_144 = arith.constant dense<0.000000e+00> : vector<14xf32>
    %458 = vector.multi_reduction <add>, %457, %cst_144 [1] : vector<14x128xf32> to vector<14xf32>
    %459 = vector.shape_cast %458 : vector<14xf32> to vector<14x1xf32>
    %460 = math.log %459 : vector<14x1xf32>
    %461 = vector.broadcast %460 : vector<14x1xf32> to vector<14x128xf32>
    %462 = arith.subf %456, %461 : vector<14x128xf32>
    %c0_145 = arith.constant 0 : index
    %c0_146 = arith.constant 0 : index
    %463 = vector.load %arg20[%c0_145, %c0_146] : memref<14x128xf32, #tpu.memory_space<vmem>>, vector<14x128xf32>
    tpu.vector_store %arg20[%c0_145, %c0_146], %462 {strides = array<i32>} : memref<14x128xf32, #tpu.memory_space<vmem>>, vector<14x128xf32>,
    return
  }
  func.func @transform_0(%arg0: i32) -> (i32, i32) {
    %c0_i32 = arith.constant 0 : i32
    %c0_i32_0 = arith.constant 0 : i32
    %c0_i32_1 = arith.constant 0 : i32
    return %c0_i32, %c0_i32_0 : i32, i32
  }
  func.func @transform_1(%arg0: i32) -> (i32, i32) {
    %c0_i32 = arith.constant 0 : i32
    %c0_i32_0 = arith.constant 0 : i32
    %c0_i32_1 = arith.constant 0 : i32
    return %c0_i32, %c0_i32_0 : i32, i32
  }
  func.func @transform_2(%arg0: i32) -> (i32, i32) {
    %c0_i32 = arith.constant 0 : i32
    %c0_i32_0 = arith.constant 0 : i32
    %c0_i32_1 = arith.constant 0 : i32
    return %c0_i32, %c0_i32_0 : i32, i32
  }
  func.func @transform_3(%arg0: i32) -> (i32, i32) {
    %c0_i32 = arith.constant 0 : i32
    %c0_i32_0 = arith.constant 0 : i32
    %c0_i32_1 = arith.constant 0 : i32
    return %c0_i32, %c0_i32_0 : i32, i32
  }
  func.func @transform_4(%arg0: i32) -> (i32, i32) {
    %c0_i32 = arith.constant 0 : i32
    %c0_i32_0 = arith.constant 0 : i32
    %c0_i32_1 = arith.constant 0 : i32
    return %c0_i32, %c0_i32_0 : i32, i32
  }
  func.func @transform_5(%arg0: i32) -> (i32, i32) {
    %c0_i32 = arith.constant 0 : i32
    %c0_i32_0 = arith.constant 0 : i32
    %c0_i32_1 = arith.constant 0 : i32
    return %c0_i32, %c0_i32_0 : i32, i32
  }
  func.func @transform_6(%arg0: i32) -> (i32, i32) {
    %c0_i32 = arith.constant 0 : i32
    %c0_i32_0 = arith.constant 0 : i32
    %c0_i32_1 = arith.constant 0 : i32
    return %c0_i32, %c0_i32_0 : i32, i32
  }
  func.func @transform_7(%arg0: i32) -> (i32, i32) {
    %c0_i32 = arith.constant 0 : i32
    %c0_i32_0 = arith.constant 0 : i32
    %c0_i32_1 = arith.constant 0 : i32
    return %c0_i32, %c0_i32_0 : i32, i32
  }
  func.func @transform_8(%arg0: i32) -> (i32, i32) {
    %c0_i32 = arith.constant 0 : i32
    %c0_i32_0 = arith.constant 0 : i32
    %c0_i32_1 = arith.constant 0 : i32
    return %c0_i32, %c0_i32_0 : i32, i32
  }
  func.func @transform_9(%arg0: i32) -> (i32, i32) {
    %c0_i32 = arith.constant 0 : i32
    %c0_i32_0 = arith.constant 0 : i32
    %c0_i32_1 = arith.constant 0 : i32
    return %c0_i32, %c0_i32_0 : i32, i32
  }
  func.func @transform_10(%arg0: i32) -> (i32, i32) {
    %c0_i32 = arith.constant 0 : i32
    %c0_i32_0 = arith.constant 0 : i32
    %c0_i32_1 = arith.constant 0 : i32
    return %c0_i32, %c0_i32_0 : i32, i32
  }
  func.func @transform_11(%arg0: i32) -> (i32, i32) {
    %c0_i32 = arith.constant 0 : i32
    %c0_i32_0 = arith.constant 0 : i32
    %c0_i32_1 = arith.constant 0 : i32
    return %c0_i32, %c0_i32_0 : i32, i32
  }
  func.func @transform_12(%arg0: i32) -> (i32, i32) {
    %c0_i32 = arith.constant 0 : i32
    %c0_i32_0 = arith.constant 0 : i32
    %c0_i32_1 = arith.constant 0 : i32
    return %c0_i32, %c0_i32_0 : i32, i32
  }
  func.func @transform_13(%arg0: i32) -> (i32, i32) {
    %c0_i32 = arith.constant 0 : i32
    %c0_i32_0 = arith.constant 0 : i32
    %c0_i32_1 = arith.constant 0 : i32
    return %c0_i32, %c0_i32_0 : i32, i32
  }
  func.func @transform_14(%arg0: i32) -> (i32, i32) {
    %c0_i32 = arith.constant 0 : i32
    %c0_i32_0 = arith.constant 0 : i32
    %c0_i32_1 = arith.constant 0 : i32
    return %c0_i32, %c0_i32_0 : i32, i32
  }
  func.func @transform_15(%arg0: i32) -> (i32, i32) {
    %c0_i32 = arith.constant 0 : i32
    %c0_i32_0 = arith.constant 0 : i32
    %c0_i32_1 = arith.constant 0 : i32
    return %c0_i32, %c0_i32_0 : i32, i32
  }
  func.func @transform_16(%arg0: i32) -> (i32, i32) {
    %c0_i32 = arith.constant 0 : i32
    %c0_i32_0 = arith.constant 0 : i32
    %c0_i32_1 = arith.constant 0 : i32
    return %c0_i32, %c0_i32_0 : i32, i32
  }
  func.func @transform_17(%arg0: i32) -> (i32, i32) {
    %c0_i32 = arith.constant 0 : i32
    %c0_i32_0 = arith.constant 0 : i32
    %c0_i32_1 = arith.constant 0 : i32
    return %c0_i32, %c0_i32_0 : i32, i32
  }
  func.func @transform_18(%arg0: i32) -> (i32, i32) {
    %c0_i32 = arith.constant 0 : i32
    %c0_i32_0 = arith.constant 0 : i32
    %c0_i32_1 = arith.constant 0 : i32
    return %c0_i32, %c0_i32_0 : i32, i32
  }
  func.func @transform_19(%arg0: i32) -> (i32, i32) {
    %c0_i32 = arith.constant 0 : i32
    %c0_i32_0 = arith.constant 0 : i32
    %c0_i32_1 = arith.constant 0 : i32
    return %c0_i32, %c0_i32_0 : i32, i32
  }
  func.func @transform_20(%arg0: i32) -> (i32, i32) {
    %c0_i32 = arith.constant 0 : i32
    %c0_i32_0 = arith.constant 0 : i32
    %c0_i32_1 = arith.constant 0 : i32
    return %c0_i32, %c0_i32_0 : i32, i32
  }
  func.func @transform_21(%arg0: i32) -> (i32, i32) {
    %c0_i32 = arith.constant 0 : i32
    %c0_i32_0 = arith.constant 0 : i32
    %c0_i32_1 = arith.constant 0 : i32
    return %c0_i32, %c0_i32_0 : i32, i32
  }
}

</mosaic_0001>

<bundles_post_ra>
// kernel: rae_forward.2
= control target key start
LH: loop header
LB: loop body
LE: loop exit
PB: predicated region body
PF: predicated region fallthrough
CT: control target
= control target key end

     0   :  { %vm290_vm0 = vcmask 1043456   ;;  %vm97_vm1 = vcmask 293888   ;;  %s1772_s0 = inlined_call_operand.vmem [shape: f32[512,36], index: 0, kind: input, shape index: {}]   ;;  %s1773_s1 = inlined_call_operand.vmem [shape: f32[36,8], index: 1, kind: input, shape index: {}]   ;;  %s1774_s2 = inlined_call_operand.vmem [shape: f32[1,8], index: 2, kind: input, shape index: {}]   ;;  %s1775_s3 = inlined_call_operand.vmem [shape: f32[8,32], index: 3, kind: input, shape index: {}]   ;;  %s1776_s4 = inlined_call_operand.vmem [shape: f32[1,32], index: 4, kind: input, shape index: {}]   ;;  %s1777_s5 = inlined_call_operand.hbm [shape: f32[2,32], index: 5, kind: output, shape index: {}]  }
   0x1   :  { %v89_v0 = vld [vmem:[%s1773_s1 + $0x20] sm:$0xf]  ;;  %v88_v1 = vld [vmem:[%s1773_s1 + $0x18] sm:$0xff]  ;;  %v87_v3 = vld [vmem:[%s1773_s1 + $0x10] sm:$0xff] }
   0x2   :  { %1121 = vmatprep.subr.msk.mxu0 %vm290_vm0, %v89_v0  ;;  %v21_v2 = vld [vmem:[%s1772_s0] sm:$0xff]  ;;  %1232 = vmatprep.subr.msk.mxu1 %vm290_vm0, %v89_v0  ;;  %v86_v4 = vld [vmem:[%s1773_s1 + $0x8] sm:$0xff]  ;;  %v23_v7 = vld [vmem:[%s1772_s0 + $0x10] sm:$0xff] }
   0x3   :  { %1122 = vmatpush3.msk.msra.mxu0 %vm290_vm0, %v89_v0  ;;  %1131 = vmatprep.mubr.msk.f32.mxu0 %vm97_vm1, %v21_v2  ;;  %v85_v5 = vld [vmem:[%s1773_s1] sm:$0xff]  ;;  %v22_v6 = vld [vmem:[%s1772_s0 + $0x8] sm:$0xff]  ;;  %v24_v8 = vld [vmem:[%s1772_s0 + $0x18] sm:$0xff] }
   0x4   :  { %1123 = vmatprep.subr.mxu0 %v88_v1  ;;  %1237 = vmatpush3.msk.msra.mxu1 %vm290_vm0, %v89_v0  ;;  %v55_v9 = vld [vmem:[%s1772_s0 + $0x110] sm:$0xff]  ;;  %v25_v10 = vld [vmem:[%s1772_s0 + $0x20] sm:$0xff]  ;;  %v56_v11 = vld [vmem:[%s1772_s0 + $0x118] sm:$0xff] }
   0x5   :  { %1124 = vmatpush3.msra.mxu0 %v88_v1  ;;  %1233 = vmatprep.subr.mxu1 %v88_v1  ;;  %v57_v12 = vld [vmem:[%s1772_s0 + $0x120] sm:$0xff]  ;;  %v58_v13 = vld [vmem:[%s1772_s0 + $0x128] sm:$0xff]  ;;  %v59_v15 = vld [vmem:[%s1772_s0 + $0x130] sm:$0xff] }
   0x6   :  { %1125 = vmatprep.subr.mxu0 %v87_v3  ;;  %1238 = vmatpush3.msra.mxu1 %v88_v1  ;;  %v26_v14 = vld [vmem:[%s1772_s0 + $0x28] sm:$0xff]  ;;  %v27_v16 = vld [vmem:[%s1772_s0 + $0x30] sm:$0xff]  ;;  %v60_v17 = vld [vmem:[%s1772_s0 + $0x138] sm:$0xff] }
   0x7   :  { %1126 = vmatpush3.msra.mxu0 %v87_v3  ;;  %1234 = vmatprep.subr.mxu1 %v87_v3  ;;  %v28_v18 = vld [vmem:[%s1772_s0 + $0x38] sm:$0xff]  ;;  %v61_v19 = vld [vmem:[%s1772_s0 + $0x140] sm:$0xff]  ;;  %v62_v21 = vld [vmem:[%s1772_s0 + $0x148] sm:$0xff] }
   0x8   :  { %1127 = vmatprep.subr.mxu0 %v86_v4  ;;  %1239 = vmatpush3.msra.mxu1 %v87_v3  ;;  %v29_v20 = vld [vmem:[%s1772_s0 + $0x40] sm:$0xff] }
   0x9   :  { %1128 = vmatpush3.msra.mxu0 %v86_v4  ;;  %1235 = vmatprep.subr.mxu1 %v86_v4 }
   0xa   :  { %1129 = vmatprep.subr.mxu0 %v85_v5  ;;  %1240 = vmatpush3.msra.mxu1 %v86_v4 }
   0xb   :  { %1130 = vmatpush3.msra.mxu0 %v85_v5  ;;  %1236 = vmatprep.subr.mxu1 %v85_v5 }
   0xc   :  { %1132 = vmatmul.mubr.msk.f32.vlgmr.msra.gmra.mxu0 %vm97_vm1, %v22_v6  ;;  %1241 = vmatpush3.msra.mxu1 %v85_v5 }
   0xd   :  { %1134 = vmatprep.mubr.msk.f32.mxu0 %vm97_vm1, %v23_v7  ;;  %1182 = vmatprep.mubr.msk.f32.mxu1 %vm97_vm1, %v55_v9 }
   0xe   :  { %1183 = vmatmul.mubr.msk.f32.vlgmr.msra.gmra.mxu1 %vm97_vm1, %v56_v11 }
   0xf   :  { %1185 = vmatprep.mubr.msk.f32.mxu1 %vm97_vm1, %v57_v12 }
  0x10   :  { %1135 = vmatmul.mubr.msk.f32.gmra.mxu0 %vm97_vm1, %v24_v8 }
  0x11   :  { %1137 = vmatprep.mubr.msk.f32.mxu0 %vm97_vm1, %v25_v10 }
  0x12   :  { %1186 = vmatmul.mubr.msk.f32.gmra.mxu1 %vm97_vm1, %v58_v13 }
  0x13   :  { %1188 = vmatprep.mubr.msk.f32.mxu1 %vm97_vm1, %v59_v15 }
  0x14   :  { %1138 = vmatmul.mubr.msk.f32.gmra.mxu0 %vm97_vm1, %v26_v14 }
  0x15   :  { %1140 = vmatprep.mubr.msk.f32.mxu0 %vm97_vm1, %v27_v16 }
  0x16   :  { %1189 = vmatmul.mubr.msk.f32.gmra.mxu1 %vm97_vm1, %v60_v17 }
  0x17   :  { %1191 = vmatprep.mubr.msk.f32.mxu1 %vm97_vm1, %v61_v19 }
  0x18   :  { %1141 = vmatmul.mubr.msk.f32.gmra.mxu0 %vm97_vm1, %v28_v18 }
  0x19   :  { %10 = vsyncpa [#allocation3], 0  ;;  %1143 = vmatprep.mubr.msk.f32.mxu0 %vm97_vm1, %v29_v20  ;;  %v30_v22 = vld [vmem:[%s1772_s0 + $0x48] sm:$0xff]  ;;  %v63_v23 = vld [vmem:[%s1772_s0 + $0x150] sm:$0xff]  ;;  %v1267_v6 = vmov 0.0   ;;  %vm743_vm2 = vcmask 64512  }
  0x1a   :  { %v31_v24 = vld [vmem:[%s1772_s0 + $0x50] sm:$0xff]  ;;  %1192 = vmatmul.mubr.msk.f32.gmra.mxu1 %vm97_vm1, %v62_v21  ;;  %v64_v25 = vld [vmem:[%s1772_s0 + $0x158] sm:$0xff]  ;;  %v65_v27 = vld [vmem:[%s1772_s0 + $0x160] sm:$0xff]  ;;  %1227 = vmatprep.subr.mxu1 %v1267_v6  ;;  %vm1268_vm3 = vmmov 0   ;;  %vm892_vm4 = vcmask 1041409   ;;  %vm966_vm5 = vcmask 254976  }
  0x1b   :  { %1194 = vmatprep.mubr.msk.f32.mxu1 %vm97_vm1, %v63_v23  ;;  %v32_v26 = vld [vmem:[%s1772_s0 + $0x58] sm:$0xff]  ;;  %v33_v28 = vld [vmem:[%s1772_s0 + $0x60] sm:$0xff]  ;;  %v66_v29 = vld [vmem:[%s1772_s0 + $0x168] sm:$0xff] }
  0x1c   :  { %1144 = vmatmul.mubr.msk.f32.gmra.mxu0 %vm97_vm1, %v30_v22  ;;  %v34_v30 = vld [vmem:[%s1772_s0 + $0x68] sm:$0xff]  ;;  %v67_v31 = vld [vmem:[%s1772_s0 + $0x170] sm:$0xff]  ;;  %v68_v33 = vld [vmem:[%s1772_s0 + $0x178] sm:$0xff] }
  0x1d   :  { %1146 = vmatprep.mubr.msk.f32.mxu0 %vm97_vm1, %v31_v24  ;;  %v35_v32 = vld [vmem:[%s1772_s0 + $0x70] sm:$0xff]  ;;  %v36_v34 = vld [vmem:[%s1772_s0 + $0x78] sm:$0xff]  ;;  %v69_v35 = vld [vmem:[%s1772_s0 + $0x180] sm:$0xff] }
  0x1e   :  { %1195 = vmatmul.mubr.msk.f32.gmra.mxu1 %vm97_vm1, %v64_v25  ;;  %v37_v36 = vld [vmem:[%s1772_s0 + $0x80] sm:$0xff]  ;;  %v70_v37 = vld [vmem:[%s1772_s0 + $0x188] sm:$0xff]  ;;  %v71_v39 = vld [vmem:[%s1772_s0 + $0x190] sm:$0xff] }
  0x1f   :  { %1197 = vmatprep.mubr.msk.f32.mxu1 %vm97_vm1, %v65_v27  ;;  %v38_v38 = vld [vmem:[%s1772_s0 + $0x88] sm:$0xff]  ;;  %v39_v40 = vld [vmem:[%s1772_s0 + $0x90] sm:$0xff]  ;;  %v72_v41 = vld [vmem:[%s1772_s0 + $0x198] sm:$0xff] }
  0x20   :  { %1147 = vmatmul.mubr.msk.f32.gmra.mxu0 %vm97_vm1, %v32_v26  ;;  %v40_v42 = vld [vmem:[%s1772_s0 + $0x98] sm:$0xff]  ;;  %v73_v43 = vld [vmem:[%s1772_s0 + $0x1a0] sm:$0xff]  ;;  %v74_v45 = vld [vmem:[%s1772_s0 + $0x1a8] sm:$0xff] }
  0x21   :  { %1149 = vmatprep.mubr.msk.f32.mxu0 %vm97_vm1, %v33_v28  ;;  %v41_v44 = vld [vmem:[%s1772_s0 + $0xa0] sm:$0xff]  ;;  %v42_v46 = vld [vmem:[%s1772_s0 + $0xa8] sm:$0xff]  ;;  %v75_v47 = vld [vmem:[%s1772_s0 + $0x1b0] sm:$0xff] }
  0x22   :  { %1198 = vmatmul.mubr.msk.f32.gmra.mxu1 %vm97_vm1, %v66_v29  ;;  %v43_v48 = vld [vmem:[%s1772_s0 + $0xb0] sm:$0xff]  ;;  %v76_v49 = vld [vmem:[%s1772_s0 + $0x1b8] sm:$0xff]  ;;  %v77_v51 = vld [vmem:[%s1772_s0 + $0x1c0] sm:$0xff] }
  0x23   :  { %1200 = vmatprep.mubr.msk.f32.mxu1 %vm97_vm1, %v67_v31  ;;  %v44_v50 = vld [vmem:[%s1772_s0 + $0xb8] sm:$0xff]  ;;  %v45_v52 = vld [vmem:[%s1772_s0 + $0xc0] sm:$0xff]  ;;  %v78_v53 = vld [vmem:[%s1772_s0 + $0x1c8] sm:$0xff] }
  0x24   :  { %1150 = vmatmul.mubr.msk.f32.gmra.mxu0 %vm97_vm1, %v34_v30  ;;  %v46_v54 = vld [vmem:[%s1772_s0 + $0xc8] sm:$0xff]  ;;  %v79_v55 = vld [vmem:[%s1772_s0 + $0x1d0] sm:$0xff]  ;;  %v80_v57 = vld [vmem:[%s1772_s0 + $0x1d8] sm:$0xff] }
  0x25   :  { %1152 = vmatprep.mubr.msk.f32.mxu0 %vm97_vm1, %v35_v32  ;;  %v47_v56 = vld [vmem:[%s1772_s0 + $0xd0] sm:$0xff]  ;;  %v48_v58 = vld [vmem:[%s1772_s0 + $0xd8] sm:$0xff]  ;;  %v81_v59 = vld [vmem:[%s1772_s0 + $0x1e0] sm:$0xff] }
  0x26   :  { %1201 = vmatmul.mubr.msk.f32.gmra.mxu1 %vm97_vm1, %v68_v33  ;;  %v49_v60 = vld [vmem:[%s1772_s0 + $0xe0] sm:$0xff]  ;;  %v82_v61 = vld [vmem:[%s1772_s0 + $0x1e8] sm:$0xff]  ;;  %v83_v63 = vld [vmem:[%s1772_s0 + $0x1f0] sm:$0xff] }
  0x27   :  { %1203 = vmatprep.mubr.msk.f32.mxu1 %vm97_vm1, %v69_v35  ;;  %v50_v62 = vld [vmem:[%s1772_s0 + $0xe8] sm:$0xff]  ;;  %v51_v0 = vld [vmem:[%s1772_s0 + $0xf0] sm:$0xff]  ;;  %v84_v1 = vld [vmem:[%s1772_s0 + $0x1f8] sm:$0xff] }
  0x28   :  { %1153 = vmatmul.mubr.msk.f32.gmra.mxu0 %vm97_vm1, %v36_v34  ;;  %v52_v2 = vld [vmem:[%s1772_s0 + $0xf8] sm:$0xff]  ;;  %v53_v3 = vld [vmem:[%s1772_s0 + $0x100] sm:$0xff]  ;;  %v54_v4 = vld [vmem:[%s1772_s0 + $0x108] sm:$0xff] }
  0x29   :  { %1155 = vmatprep.mubr.msk.f32.mxu0 %vm97_vm1, %v37_v36  ;;  %v882_v5 = vld [vmem:[%s1775_s3] sm:$0xff]  ;;  %s1269_s3 = smov [#allocation2]  }
  0x2a   :  { %1204 = vmatmul.mubr.msk.f32.gmra.mxu1 %vm97_vm1, %v70_v37  ;;  %v1577_v7 = vld [vmem:[%s1774_s2] ss:$0 sm:$0xff]  ;;  %s974_s30 = sshll.u32 %s1269_s3, 4  ;;  %s975_s30 = int_to_ptr.vmem [resolvable:$true] %s974_s30 }
  0x2b   :  { %1206 = vmatprep.mubr.msk.f32.mxu1 %vm97_vm1, %v71_v39  ;;  %1228 = vmatpush3.msra.mxu1 %v882_v5  ;;  %s1245_s6 = scalar_lea.vmem %s975_s30, 32  ;;  %p1250_p1 = scmp.lt.s32.totalorder %s975_s30, %s975_s30 }
  0x2c   :  { %1156 = vmatmul.mubr.msk.f32.gmra.mxu0 %vm97_vm1, %v38_v38  ;;  %p1246_p0 = scmp.ne.s32.totalorder %s975_s30, %s1245_s6  ;;  %p1251_p2 = scmp.lt.s32.totalorder %s1245_s6, %s1245_s6 }
  0x2d   :  { %1158 = vmatprep.mubr.msk.f32.mxu0 %vm97_vm1, %v39_v40 }
  0x2e   :  { %1207 = vmatmul.mubr.msk.f32.gmra.mxu1 %vm97_vm1, %v72_v41  ;;  %p1252_p3 = por %p1251_p2, %p1250_p1 }
  0x2f   :  { %1209 = vmatprep.mubr.msk.f32.mxu1 %vm97_vm1, %v73_v43 }
  0x30   :  { %1159 = vmatmul.mubr.msk.f32.gmra.mxu0 %vm97_vm1, %v40_v42  ;;  %p1253_p4 = pnand %p1252_p3, %p1246_p0 }
  0x31   :  { %1161 = vmatprep.mubr.msk.f32.mxu0 %vm97_vm1, %v41_v44 }
  0x32   :  { %1210 = vmatmul.mubr.msk.f32.gmra.mxu1 %vm97_vm1, %v74_v45 }
  0x33   :  { %1212 = vmatprep.mubr.msk.f32.mxu1 %vm97_vm1, %v75_v47 }
  0x34   :  { %1162 = vmatmul.mubr.msk.f32.gmra.mxu0 %vm97_vm1, %v42_v46 }
  0x35   :  { %1164 = vmatprep.mubr.msk.f32.mxu0 %vm97_vm1, %v43_v48 }
  0x36   :  { %1213 = vmatmul.mubr.msk.f32.gmra.mxu1 %vm97_vm1, %v76_v49 }
  0x37   :  { %1215 = vmatprep.mubr.msk.f32.mxu1 %vm97_vm1, %v77_v51 }
  0x38   :  { %1165 = vmatmul.mubr.msk.f32.gmra.mxu0 %vm97_vm1, %v44_v50 }
  0x39   :  { %1167 = vmatprep.mubr.msk.f32.mxu0 %vm97_vm1, %v45_v52 }
  0x3a   :  { %1216 = vmatmul.mubr.msk.f32.gmra.mxu1 %vm97_vm1, %v78_v53 }
  0x3b   :  { %1218 = vmatprep.mubr.msk.f32.mxu1 %vm97_vm1, %v79_v55 }
  0x3c   :  { %1168 = vmatmul.mubr.msk.f32.gmra.mxu0 %vm97_vm1, %v46_v54 }
  0x3d   :  { %1170 = vmatprep.mubr.msk.f32.mxu0 %vm97_vm1, %v47_v56 }
  0x3e   :  { %1219 = vmatmul.mubr.msk.f32.gmra.mxu1 %vm97_vm1, %v80_v57 }
  0x3f   :  { %1221 = vmatprep.mubr.msk.f32.mxu1 %vm97_vm1, %v81_v59 }
  0x40   :  { %1171 = vmatmul.mubr.msk.f32.gmra.mxu0 %vm97_vm1, %v48_v58 }
  0x41   :  { %1173 = vmatprep.mubr.msk.f32.mxu0 %vm97_vm1, %v49_v60 }
  0x42   :  { %1222 = vmatmul.mubr.msk.f32.gmra.mxu1 %vm97_vm1, %v82_v61 }
  0x43   :  { %1224 = vmatprep.mubr.msk.f32.mxu1 %vm97_vm1, %v83_v63 }
  0x44   :  { %1174 = vmatmul.mubr.msk.f32.gmra.mxu0 %vm97_vm1, %v50_v62 }
  0x45   :  { %1176 = vmatprep.mubr.msk.f32.mxu0 %vm97_vm1, %v51_v0 }
  0x46   :  { %1225 = vmatmul.mubr.msk.f32.gmra.mxu1 %vm97_vm1, %v84_v1 }
  0x47   :  { %1229 = vmatprep.mubr.msk.f32.mxu1 %vm1268_vm3, %v1267_v6 }
  0x48   :  { %1177 = vmatmul.mubr.msk.f32.gmra.mxu0 %vm97_vm1, %v52_v2 }
  0x49   :  { %1179 = vmatprep.mubr.msk.f32.mxu0 %vm97_vm1, %v53_v3 }
  0x4c   :  { %1180 = vmatmul.mubr.msk.f32.gmra.mxu0 %vm97_vm1, %v54_v4 }
  0xcc   :  { %v1133_v8 = vpop.f32.mrf.mxu0 }
  0xcd   :  { %v366_v9 = vadd.f32 %v1133_v8, %v1577_v7 }
  0xce   :  { %v360_v10 = vpop.f32.mrf.mxu0  ;;  %v1581_v13 = vpop.f32.mrf.mxu1 }
  0xcf   :  { %v680_v11 = vmax.f32 %v366_v9, 0.0  ;;  %v361_v12 = vadd.f32 %v1577_v7, %v360_v10 }
  0xd0   :  { %v1136_v14 = vpop.f32.mrf.mxu0  ;;  %v1584_v18 = vpop.f32.mrf.mxu1 }
  0xd1   :  { %v679_v15 = vmax.f32 %v361_v12, 0.0  ;;  %v376_v16 = vadd.f32 %v1136_v14, %v1577_v7  ;;  %v745_v19 = vsel %vm743_vm2, %v680_v11, 0.0 }
  0xd2   :  { %v370_v17 = vpop.f32.mrf.mxu0  ;;  %v1590_v28 = vpop.f32.mrf.mxu1 }
  0xd3   :  { %v744_v20 = vsel %vm743_vm2, %v679_v15, 0.0  ;;  %v371_v21 = vadd.f32 %v1577_v7, %v370_v17  ;;  %v682_v24 = vmax.f32 %v376_v16, 0.0 }
  0xd4   :  { %v746_v22 = vadd.f32 %v745_v19, %v744_v20  ;;  %v1139_v23 = vpop.f32.mrf.mxu0  ;;  %v1596_v39 = vpop.f32.mrf.mxu1 }
  0xd5   :  { %v681_v25 = vmax.f32 %v371_v21, 0.0  ;;  %v386_v26 = vadd.f32 %v1139_v23, %v1577_v7  ;;  %v749_v34 = vsel %vm743_vm2, %v682_v24, 0.0 }
  0xd6   :  { %v380_v27 = vpop.f32.mrf.mxu0  ;;  %v1602_v50 = vpop.f32.mrf.mxu1 }
  0xd7   :  { %v747_v29 = vsel %vm743_vm2, %v681_v25, 0.0  ;;  %v381_v30 = vadd.f32 %v1577_v7, %v380_v27  ;;  %v684_v32 = vmax.f32 %v386_v26, 0.0 }
  0xd8   :  { %v748_v31 = vadd.f32 %v747_v29, %v746_v22  ;;  %v1142_v33 = vpop.f32.mrf.mxu0  ;;  %v1608_v61 = vpop.f32.mrf.mxu1 }
  0xd9   :  { %v683_v35 = vmax.f32 %v381_v30, 0.0  ;;  %v396_v36 = vadd.f32 %v1142_v33, %v1577_v7  ;;  %v753_v42 = vsel %vm743_vm2, %v684_v32, 0.0 }
  0xda   :  { %v750_v37 = vadd.f32 %v749_v34, %v748_v31  ;;  %v390_v38 = vpop.f32.mrf.mxu0  ;;  %v1614_v9 = vpop.f32.mrf.mxu1 }
  0xdb   :  { %v751_v40 = vsel %vm743_vm2, %v683_v35, 0.0  ;;  %v391_v41 = vadd.f32 %v1577_v7, %v390_v38  ;;  %v686_v45 = vmax.f32 %v396_v36, 0.0 }
  0xdc   :  { %v752_v43 = vadd.f32 %v751_v40, %v750_v37  ;;  %v1145_v44 = vpop.f32.mrf.mxu0  ;;  %v1620_v22 = vpop.f32.mrf.mxu1 }
  0xdd   :  { %v685_v46 = vmax.f32 %v391_v41, 0.0  ;;  %v406_v47 = vadd.f32 %v1145_v44, %v1577_v7  ;;  %v757_v55 = vsel %vm743_vm2, %v686_v45, 0.0 }
  0xde   :  { %v754_v48 = vadd.f32 %v753_v42, %v752_v43  ;;  %v400_v49 = vpop.f32.mrf.mxu0  ;;  %v1626_v34 = vpop.f32.mrf.mxu1 }
  0xdf   :  { %v755_v51 = vsel %vm743_vm2, %v685_v46, 0.0  ;;  %v401_v52 = vadd.f32 %v1577_v7, %v400_v49  ;;  %v688_v56 = vmax.f32 %v406_v47, 0.0 }
  0xe0   :  { %v756_v53 = vadd.f32 %v755_v51, %v754_v48  ;;  %v1148_v54 = vpop.f32.mrf.mxu0  ;;  %v1632_v46 = vpop.f32.mrf.mxu1 }
  0xe1   :  { %v687_v57 = vmax.f32 %v401_v52, 0.0  ;;  %v416_v58 = vadd.f32 %v1148_v54, %v1577_v7  ;;  %v761_v2 = vsel %vm743_vm2, %v688_v56, 0.0 }
  0xe2   :  { %v758_v59 = vadd.f32 %v757_v55, %v756_v53  ;;  %v410_v60 = vpop.f32.mrf.mxu0 }
  0xe3   :  { %v759_v62 = vsel %vm743_vm2, %v687_v57, 0.0  ;;  %v411_v63 = vadd.f32 %v1577_v7, %v410_v60  ;;  %v690_v3 = vmax.f32 %v416_v58, 0.0  ;;  %v1638_v58 = vpop.f32.mrf.mxu1 }
  0xe4   :  { %v760_v0 = vadd.f32 %v759_v62, %v758_v59  ;;  %v1151_v1 = vpop.f32.mrf.mxu0 }
  0xe5   :  { %v689_v4 = vmax.f32 %v411_v63, 0.0  ;;  %v426_v5 = vadd.f32 %v1151_v1, %v1577_v7  ;;  %v765_v15 = vsel %vm743_vm2, %v690_v3, 0.0 }
  0xe6   :  { %v762_v6 = vadd.f32 %v761_v2, %v760_v0  ;;  %v420_v8 = vpop.f32.mrf.mxu0 }
  0xe7   :  { %v763_v10 = vsel %vm743_vm2, %v689_v4, 0.0  ;;  %v421_v11 = vadd.f32 %v1577_v7, %v420_v8  ;;  %v692_v16 = vmax.f32 %v426_v5, 0.0 }
  0xe8   :  { %v764_v12 = vadd.f32 %v763_v10, %v762_v6  ;;  %v1154_v14 = vpop.f32.mrf.mxu0  ;;  %v1644_v6 = vpop.f32.mrf.mxu1 }
  0xe9   :  { %v691_v17 = vmax.f32 %v421_v11, 0.0  ;;  %v436_v19 = vadd.f32 %v1154_v14, %v1577_v7  ;;  %v769_v27 = vsel %vm743_vm2, %v692_v16, 0.0 }
  0xea   :  { %v766_v20 = vadd.f32 %v765_v15, %v764_v12  ;;  %v430_v21 = vpop.f32.mrf.mxu0 }
  0xeb   :  { %v767_v23 = vsel %vm743_vm2, %v691_v17, 0.0  ;;  %v431_v24 = vadd.f32 %v1577_v7, %v430_v21  ;;  %v694_v29 = vmax.f32 %v436_v19, 0.0  ;;  %v1650_v21 = vpop.f32.mrf.mxu1 }
  0xec   :  { %v768_v25 = vadd.f32 %v767_v23, %v766_v20  ;;  %v1157_v26 = vpop.f32.mrf.mxu0 }
  0xed   :  { %v693_v30 = vmax.f32 %v431_v24, 0.0  ;;  %v446_v31 = vadd.f32 %v1157_v26, %v1577_v7  ;;  %v773_v40 = vsel %vm743_vm2, %v694_v29, 0.0 }
  0xee   :  { %v770_v32 = vadd.f32 %v769_v27, %v768_v25  ;;  %v440_v33 = vpop.f32.mrf.mxu0 }
  0xef   :  { %v771_v35 = vsel %vm743_vm2, %v693_v30, 0.0  ;;  %v441_v36 = vadd.f32 %v1577_v7, %v440_v33  ;;  %v696_v41 = vmax.f32 %v446_v31, 0.0 }
  0xf0   :  { %v772_v37 = vadd.f32 %v771_v35, %v770_v32  ;;  %v1160_v38 = vpop.f32.mrf.mxu0  ;;  %v1656_v35 = vpop.f32.mrf.mxu1 }
  0xf1   :  { %v695_v42 = vmax.f32 %v441_v36, 0.0  ;;  %v456_v43 = vadd.f32 %v1160_v38, %v1577_v7  ;;  %v777_v52 = vsel %vm743_vm2, %v696_v41, 0.0 }
  0xf2   :  { %v774_v44 = vadd.f32 %v773_v40, %v772_v37  ;;  %v450_v45 = vpop.f32.mrf.mxu0 }
  0xf3   :  { %v775_v47 = vsel %vm743_vm2, %v695_v42, 0.0  ;;  %v451_v48 = vadd.f32 %v1577_v7, %v450_v45  ;;  %v698_v53 = vmax.f32 %v456_v43, 0.0 }
  0xf4   :  { %v776_v49 = vadd.f32 %v775_v47, %v774_v44  ;;  %v1163_v51 = vpop.f32.mrf.mxu0 }
  0xf5   :  { %v697_v54 = vmax.f32 %v451_v48, 0.0  ;;  %v466_v55 = vadd.f32 %v1163_v51, %v1577_v7  ;;  %v781_v0 = vsel %vm743_vm2, %v698_v53, 0.0  ;;  %v1662_v48 = vpop.f32.mrf.mxu1 }
  0xf6   :  { %v778_v56 = vadd.f32 %v777_v52, %v776_v49  ;;  %v460_v57 = vpop.f32.mrf.mxu0 }
  0xf7   :  { %v779_v59 = vsel %vm743_vm2, %v697_v54, 0.0  ;;  %v461_v60 = vadd.f32 %v1577_v7, %v460_v57  ;;  %v700_v1 = vmax.f32 %v466_v55, 0.0 }
  0xf8   :  { %v780_v62 = vadd.f32 %v779_v59, %v778_v56  ;;  %v1166_v63 = vpop.f32.mrf.mxu0 }
  0xf9   :  { %v699_v2 = vmax.f32 %v461_v60, 0.0  ;;  %v476_v3 = vadd.f32 %v1166_v63, %v1577_v7  ;;  %v785_v14 = vsel %vm743_vm2, %v700_v1, 0.0 }
  0xfa   :  { %v782_v4 = vadd.f32 %v781_v0, %v780_v62  ;;  %v470_v5 = vpop.f32.mrf.mxu0  ;;  %v1668_v62 = vpop.f32.mrf.mxu1 }
  0xfb   :  { %v783_v8 = vsel %vm743_vm2, %v699_v2, 0.0  ;;  %v471_v10 = vadd.f32 %v1577_v7, %v470_v5  ;;  %v702_v15 = vmax.f32 %v476_v3, 0.0  ;;  %v531_v3 = vadd.f32 %v1577_v7, %v1584_v18 }
  0xfc   :  { %v784_v11 = vadd.f32 %v783_v8, %v782_v4  ;;  %v1169_v12 = vpop.f32.mrf.mxu0 }
  0xfd   :  { %v701_v16 = vmax.f32 %v471_v10, 0.0  ;;  %v486_v17 = vadd.f32 %v1169_v12, %v1577_v7  ;;  %v789_v27 = vsel %vm743_vm2, %v702_v15, 0.0 }
  0xfe   :  { %v786_v19 = vadd.f32 %v785_v14, %v784_v11  ;;  %v480_v20 = vpop.f32.mrf.mxu0  ;;  %v1676_v14 = vpop.f32.mrf.mxu1 }
  0xff   :  { %v787_v23 = vsel %vm743_vm2, %v701_v16, 0.0  ;;  %v481_v24 = vadd.f32 %v1577_v7, %v480_v20  ;;  %v704_v29 = vmax.f32 %v486_v17, 0.0  ;;  %v536_v17 = vadd.f32 %v1581_v13, %v1577_v7 }
 0x100   :  { %v788_v25 = vadd.f32 %v787_v23, %v786_v19  ;;  %v1172_v26 = vpop.f32.mrf.mxu0  ;;  %v546_v13 = vadd.f32 %v1590_v28, %v1577_v7 }
 0x101   :  { %v703_v30 = vmax.f32 %v481_v24, 0.0  ;;  %v496_v31 = vadd.f32 %v1172_v26, %v1577_v7  ;;  %v793_v41 = vsel %vm743_vm2, %v704_v29, 0.0  ;;  %v713_v24 = vmax.f32 %v531_v3, 0.0 }
 0x102   :  { %v790_v32 = vadd.f32 %v789_v27, %v788_v25  ;;  %v490_v33 = vpop.f32.mrf.mxu0  ;;  %v541_v25 = vadd.f32 %v1577_v7, %v1596_v39  ;;  %v610_v27 = vpop.f32.mrf.mxu1 }
 0x103   :  { %v791_v36 = vsel %vm743_vm2, %v703_v30, 0.0  ;;  %v491_v37 = vadd.f32 %v1577_v7, %v490_v33  ;;  %v706_v42 = vmax.f32 %v496_v31, 0.0  ;;  %v714_v30 = vmax.f32 %v536_v17, 0.0 }
 0x104   :  { %v792_v38 = vadd.f32 %v791_v36, %v790_v32  ;;  %v1175_v40 = vpop.f32.mrf.mxu0  ;;  %v816_v33 = vsel %vm743_vm2, %v713_v24, 0.0  ;;  %v715_v36 = vmax.f32 %v541_v25, 0.0  ;;  %v1694_v39 = vpop.f32.mrf.mxu1  ;;  %v596_v17 = vadd.f32 %v1650_v21, %v1577_v7 }
 0x105   :  { %v705_v43 = vmax.f32 %v491_v37, 0.0  ;;  %v506_v44 = vadd.f32 %v1175_v40, %v1577_v7  ;;  %v797_v54 = vsel %vm743_vm2, %v706_v42, 0.0  ;;  %v551_v37 = vadd.f32 %v1577_v7, %v1608_v61 }
 0x106   :  { %v794_v45 = vadd.f32 %v793_v41, %v792_v38  ;;  %v500_v47 = vpop.f32.mrf.mxu0  ;;  %v818_v40 = vsel %vm743_vm2, %v714_v30, 0.0  ;;  %v716_v41 = vmax.f32 %v546_v13, 0.0  ;;  %v556_v42 = vadd.f32 %v1602_v50, %v1577_v7 }
 0x107   :  { %v795_v49 = vsel %vm743_vm2, %v705_v43, 0.0  ;;  %v501_v51 = vadd.f32 %v1577_v7, %v500_v47  ;;  %v708_v55 = vmax.f32 %v506_v44, 0.0  ;;  %v820_v44 = vsel %vm743_vm2, %v715_v36, 0.0 }
 0x108   :  { %v796_v52 = vadd.f32 %v795_v49, %v794_v45  ;;  %v1178_v53 = vpop.f32.mrf.mxu0  ;;  %v717_v28 = vmax.f32 %v551_v37, 0.0  ;;  %v561_v45 = vadd.f32 %v1577_v7, %v1620_v22  ;;  %v620_v49 = vpop.f32.mrf.mxu1  ;;  %v822_v61 = vsel %vm743_vm2, %v716_v41, 0.0 }
 0x109   :  { %v707_v56 = vmax.f32 %v501_v51, 0.0  ;;  %v516_v57 = vadd.f32 %v1178_v53, %v1577_v7  ;;  %v801_v4 = vsel %vm743_vm2, %v708_v55, 0.0  ;;  %v718_v51 = vmax.f32 %v556_v42, 0.0 }
 0x10a   :  { %v798_v59 = vadd.f32 %v797_v54, %v796_v52  ;;  %v510_v60 = vpop.f32.mrf.mxu0  ;;  %v566_v52 = vadd.f32 %v1614_v9, %v1577_v7  ;;  %v824_v54 = vsel %vm743_vm2, %v717_v28, 0.0  ;;  %v719_v55 = vmax.f32 %v561_v45, 0.0 }
 0x10b   :  { %v799_v63 = vsel %vm743_vm2, %v707_v56, 0.0  ;;  %v511_v0 = vadd.f32 %v1577_v7, %v510_v60  ;;  %v710_v5 = vmax.f32 %v516_v57, 0.0  ;;  %v571_v50 = vadd.f32 %v1577_v7, %v1632_v46  ;;  %v1214_v57 = vpop.f32.mrf.mxu1 }
 0x10c   :  { %v800_v1 = vadd.f32 %v799_v63, %v798_v59  ;;  %v1181_v2 = vpop.f32.mrf.mxu0  ;;  %v826_v59 = vsel %vm743_vm2, %v718_v51, 0.0  ;;  %v720_v22 = vmax.f32 %v566_v52, 0.0  ;;  %v576_v60 = vadd.f32 %v1626_v34, %v1577_v7 }
 0x10d   :  { %v709_v8 = vmax.f32 %v511_v0, 0.0  ;;  %v526_v10 = vadd.f32 %v1181_v2, %v1577_v7  ;;  %v805_v18 = vsel %vm743_vm2, %v710_v5, 0.0  ;;  %v828_v0 = vsel %vm743_vm2, %v719_v55, 0.0  ;;  %v630_v3 = vpop.f32.mrf.mxu1 }
 0x10e   :  { %v802_v11 = vadd.f32 %v801_v4, %v800_v1  ;;  %v520_v12 = vpop.f32.mrf.mxu0  ;;  %v721_v1 = vmax.f32 %v571_v50, 0.0  ;;  %v581_v9 = vadd.f32 %v1577_v7, %v1644_v6  ;;  %v830_v4 = vsel %vm743_vm2, %v720_v22, 0.0 }
 0x10f   :  { %v803_v15 = vsel %vm743_vm2, %v709_v8, 0.0  ;;  %v712_v16 = vmax.f32 %v526_v10, 0.0  ;;  %v521_v19 = vadd.f32 %v1577_v7, %v520_v12  ;;  %v722_v46 = vmax.f32 %v576_v60, 0.0 }
 0x110   :  { %v804_v20 = vadd.f32 %v803_v15, %v802_v11  ;;  %v586_v5 = vadd.f32 %v1638_v58, %v1577_v7  ;;  %v832_v10 = vsel %vm743_vm2, %v721_v1, 0.0  ;;  %v723_v11 = vmax.f32 %v581_v9, 0.0  ;;  %v1217_v15 = vpop.f32.mrf.mxu1 }
 0x111   :  { %v711_v23 = vmax.f32 %v521_v19, 0.0  ;;  %v814_v29 = vsel %vm743_vm2, %v712_v16, 0.0  ;;  %v591_v34 = vadd.f32 %v1577_v7, %v1656_v35  ;;  %v834_v16 = vsel %vm743_vm2, %v722_v46, 0.0 }
 0x112   :  { %v1685_v26 = vadd.f32 %v805_v18, %v804_v20  ;;  %v724_v6 = vmax.f32 %v586_v5, 0.0  ;;  %v836_v20 = vsel %vm743_vm2, %v723_v11, 0.0  ;;  %v601_v58 = vadd.f32 %v1577_v7, %v1668_v62  ;;  %v640_v24 = vpop.f32.mrf.mxu1 }
 0x113   :  { %v813_v31 = vsel %vm743_vm2, %v711_v23, 0.0  ;;  %v725_v18 = vmax.f32 %v591_v34, 0.0  ;;  %v726_v35 = vmax.f32 %v596_v17, 0.0  ;;  %v611_v21 = vadd.f32 %v1577_v7, %v610_v27 }
 0x114   :  { %v815_v32 = vadd.f32 %v814_v29, %v813_v31  ;;  %v838_v25 = vsel %vm743_vm2, %v724_v6, 0.0  ;;  %v606_v29 = vadd.f32 %v1662_v48, %v1577_v7  ;;  %v727_v13 = vmax.f32 %v601_v58, 0.0 }
 0x115   :  { %v840_v31 = vsel %vm743_vm2, %v725_v18, 0.0  ;;  %v842_v36 = vsel %vm743_vm2, %v726_v35, 0.0  ;;  %v616_v62 = vadd.f32 %v1676_v14, %v1577_v7  ;;  %v729_v41 = vmax.f32 %v611_v21, 0.0 }
 0x116   :  { %v817_v38 = vadd.f32 %v816_v33, %v815_v32  ;;  %v1220_v33 = vpop.f32.mrf.mxu1  ;;  %v728_v37 = vmax.f32 %v606_v29, 0.0  ;;  %v621_v48 = vadd.f32 %v1577_v7, %v620_v49  ;;  %v626_v27 = vadd.f32 %v1694_v39, %v1577_v7 }
 0x117   :  { %v730_v28 = vmax.f32 %v616_v62, 0.0  ;;  %v631_v14 = vadd.f32 %v1577_v7, %v630_v3  ;;  %v636_v49 = vadd.f32 %v1214_v57, %v1577_v7 }
 0x118   :  { %v819_v43 = vadd.f32 %v818_v40, %v817_v38  ;;  %v844_v40 = vsel %vm743_vm2, %v727_v13, 0.0 }
 0x11a   :  { %v821_v47 = vadd.f32 %v820_v44, %v819_v43  ;;  %v650_v43 = vpop.f32.mrf.mxu1  ;;  %v846_v44 = vsel %vm743_vm2, %v728_v37, 0.0 }
 0x11b   :  { %v651_v3 = vadd.f32 %v1577_v7, %v650_v43 }
 0x11c   :  { %v823_v53 = vadd.f32 %v822_v61, %v821_v47  ;;  %v848_v47 = vsel %vm743_vm2, %v729_v41, 0.0  ;;  %v731_v61 = vmax.f32 %v621_v48, 0.0  ;;  %v1223_v52 = vpop.f32.mrf.mxu1 }
 0x11d   :  { %v737_v34 = vmax.f32 %v651_v3, 0.0 }
 0x11e   :  { %v825_v56 = vadd.f32 %v824_v54, %v823_v53  ;;  %v850_v53 = vsel %vm743_vm2, %v730_v28, 0.0  ;;  %v732_v54 = vmax.f32 %v626_v27, 0.0  ;;  %v852_v50 = vsel %vm743_vm2, %v731_v61, 0.0  ;;  %v660_v22 = vpop.f32.mrf.mxu1 }
 0x11f   :  { %v864_v18 = vsel %vm743_vm2, %v737_v34, 0.0 }
 0x120   :  { %v827_v63 = vadd.f32 %v826_v59, %v825_v56  ;;  %v733_v56 = vmax.f32 %v631_v14, 0.0  ;;  %v641_v59 = vadd.f32 %v1577_v7, %v640_v24  ;;  %v854_v60 = vsel %vm743_vm2, %v732_v54, 0.0 }
 0x122   :  { %v829_v2 = vadd.f32 %v828_v0, %v827_v63  ;;  %v734_v63 = vmax.f32 %v636_v49, 0.0  ;;  %v646_v0 = vadd.f32 %v1217_v15, %v1577_v7  ;;  %v856_v9 = vsel %vm743_vm2, %v733_v56, 0.0 }
 0x124   :  { %v831_v8 = vadd.f32 %v830_v4, %v829_v2  ;;  %v735_v2 = vmax.f32 %v641_v59, 0.0  ;;  %v1226_v4 = vpop.f32.mrf.mxu1  ;;  %v858_v46 = vsel %vm743_vm2, %v734_v63, 0.0  ;;  %v736_v5 = vmax.f32 %v646_v0, 0.0 }
 0x125   :  { %v676_v29 = vadd.f32 %v1226_v4, %v1577_v7 }
 0x126   :  { %v833_v12 = vadd.f32 %v832_v10, %v831_v8  ;;  %v656_v8 = vadd.f32 %v1220_v33, %v1577_v7  ;;  %v860_v11 = vsel %vm743_vm2, %v735_v2, 0.0  ;;  %v862_v6 = vsel %vm743_vm2, %v736_v5, 0.0 }
 0x128   :  { %v835_v19 = vadd.f32 %v834_v16, %v833_v12  ;;  %v661_v12 = vadd.f32 %v1577_v7, %v660_v22  ;;  %v670_v16 = vpop.f32.mrf.mxu1  ;;  %v738_v17 = vmax.f32 %v656_v8, 0.0 }
 0x12a   :  { %v837_v23 = vadd.f32 %v836_v20, %v835_v19  ;;  %v666_v19 = vadd.f32 %v1223_v52, %v1577_v7  ;;  %v739_v58 = vmax.f32 %v661_v12, 0.0 }
 0x12c   :  { %v839_v30 = vadd.f32 %v838_v25, %v837_v23  ;;  %v671_v23 = vadd.f32 %v1577_v7, %v670_v16  ;;  %v866_v25 = vsel %vm743_vm2, %v738_v17, 0.0  ;;  %v740_v35 = vmax.f32 %v666_v19, 0.0 }
 0x12d   :  { %v868_v13 = vsel %vm743_vm2, %v739_v58, 0.0 }
 0x12e   :  { %v841_v32 = vadd.f32 %v840_v31, %v839_v30  ;;  %v807_v30 = vrot.slane %v1685_v26, 4  ;;  %v741_v21 = vmax.f32 %v671_v23, 0.0  ;;  %v870_v33 = vsel %vm743_vm2, %v740_v35, 0.0 }
 0x130   :  { %v843_v38 = vadd.f32 %v842_v36, %v841_v32  ;;  %v742_v36 = vmax.f32 %v676_v29, 0.0  ;;  %v808_v37 = vadd.f32 %v807_v30, %v1685_v26  ;;  %v1048_v26 = vld [vmem:[%s1776_s4] ss:$0 sm:$0xff] }
 0x132   :  { %v845_v42 = vadd.f32 %v844_v40, %v843_v38  ;;  %v872_v38 = vsel %vm743_vm2, %v741_v21, 0.0  ;;  %v874_v41 = vsel %vm743_vm2, %v742_v36, 0.0  ;;  %v809_v48 = vrot.slane %v808_v37, 2 }
 0x134   :  { %v847_v45 = vadd.f32 %v846_v44, %v845_v42  ;;  %v810_v43 = vadd.f32 %v809_v48, %v808_v37 }
 0x136   :  { %v849_v51 = vadd.f32 %v848_v47, %v847_v45  ;;  %v811_v27 = vrot.slane %v810_v43, 1 }
 0x138   :  { %v851_v55 = vadd.f32 %v850_v53, %v849_v51  ;;  %v812_v61 = vadd.f32 %v811_v27, %v810_v43 }
 0x13a   :  { %v853_v39 = vadd.f32 %v852_v50, %v851_v55 }
 0x13c   :  { %v855_v1 = vadd.f32 %v854_v60, %v853_v39 }
 0x13e   :  { %v857_v57 = vadd.f32 %v856_v9, %v855_v1 }
 0x140   :  { %v859_v10 = vadd.f32 %v858_v46, %v857_v57 }
 0x142   :  { %v861_v15 = vadd.f32 %v860_v11, %v859_v10 }
 0x144   :  { %v863_v20 = vadd.f32 %v862_v6, %v861_v15 }
 0x146   :  { %v865_v24 = vadd.f32 %v864_v18, %v863_v20 }
 0x148   :  { %v867_v31 = vadd.f32 %v866_v25, %v865_v24 }
 0x14a   :  { %v869_v32 = vadd.f32 %v868_v13, %v867_v31 }
 0x14c   :  { %v871_v62 = vadd.f32 %v870_v33, %v869_v32 }
 0x14e   :  { %v873_v40 = vadd.f32 %v872_v38, %v871_v62 }
 0x150   :  { %v875_v7 = vadd.f32 %v874_v41, %v873_v40 }
 0x152   :  { %v876_v42 = vrot.slane %v875_v7, 4 }
 0x154   :  { %v877_v44 = vadd.f32 %v876_v42, %v875_v7 }
 0x156   :  { %v878_v28 = vrot.slane %v877_v44, 2 }
 0x158   :  { %v879_v45 = vadd.f32 %v878_v28, %v877_v44 }
 0x15a   :  { %v880_v47 = vrot.slane %v879_v45, 1 }
 0x15c   :  { %v881_v14 = vadd.f32 %v880_v47, %v879_v45 }
 0x15e   :  { %v893_v51 = vsel %vm892_vm4, %v881_v14, %v812_v61 }
 0x15f   :  { %1230 = vmatmul.mubr.msk.f32.vlgmr.msra.gmra.mxu1 %vm743_vm2, %v893_v51 }
 0x21f   :  { %v962_v52 = vpop.f32.mrf.mxu1 }
 0x220   :  { %v963_v53 = vadd.f32 %v1048_v26, %v962_v52 }
 0x221   :  { %v1231_v54 = vpop.f32.mrf.mxu1 }
 0x222   :  { %967 = vst.msk [vmem:[#allocation2] sm:$0x3] %vm966_vm5, %v963_v53 }
 0x223   :  { %1256 = shalt.err (!%p1253_p4)
}
 0x224   :  { %977 = dma.vmem_to_hbm [thread:$0]  %s975_s30, 32, %s1777_s5, [#allocation3]  }
 0x225   :  { %1265 = dma.done.wait [#allocation3], 32  }
 0x226   :  { %1266 = vsyncadd [#allocation3], 4294967264 }
 0x227   :  { %981 = vsyncpa [#allocation3], 1 }

// kernel: rae_forward.3
= control target key start
LH: loop header
LB: loop body
LE: loop exit
PB: predicated region body
PF: predicated region fallthrough
CT: control target
= control target key end

     0   :  { %s3759_s0 = inlined_call_operand.vmem [shape: s32[16,1], index: 0, kind: input, shape index: {}]   ;;  %s3760_s1 = inlined_call_operand.vmem [shape: s32[2,1], index: 1, kind: input, shape index: {}]   ;;  %s3761_s2 = inlined_call_operand.vmem [shape: f32[32,128], index: 2, kind: input, shape index: {}]   ;;  %s3762_s3 = inlined_call_operand.vmem [shape: f32[1,128], index: 3, kind: input, shape index: {}]   ;;  %s3763_s4 = inlined_call_operand.vmem [shape: f32[32,128], index: 4, kind: input, shape index: {}]   ;;  %s3764_s5 = inlined_call_operand.vmem [shape: f32[32,32], index: 5, kind: input, shape index: {}]   ;;  %s3765_s6 = inlined_call_operand.vmem [shape: f32[1,32], index: 6, kind: input, shape index: {}]   ;;  %s3766_s7 = inlined_call_operand.vmem [shape: f32[32,32], index: 7, kind: input, shape index: {}]   ;;  %s3767_s8 = inlined_call_operand.vmem [shape: f32[1,32], index: 8, kind: input, shape index: {}]   ;;  %s3768_s9 = inlined_call_operand.vmem [shape: f32[32,32], index: 9, kind: input, shape index: {}]   ;;  %s3769_s10 = inlined_call_operand.vmem [shape: f32[1,32], index: 10, kind: input, shape index: {}]   ;;  %s3770_s11 = inlined_call_operand.vmem [shape: f32[32,32], index: 11, kind: input, shape index: {}]   ;;  %s3771_s12 = inlined_call_operand.vmem [shape: f32[1,32], index: 12, kind: input, shape index: {}]   ;;  %s3772_s13 = inlined_call_operand.vmem [shape: f32[32,128], index: 13, kind: input, shape index: {}]   ;;  %s3773_s14 = inlined_call_operand.vmem [shape: f32[1,128], index: 14, kind: input, shape index: {}]   ;;  %s3774_s15 = inlined_call_operand.vmem [shape: f32[32,128], index: 15, kind: input, shape index: {}]   ;;  %s3775_s16 = inlined_call_operand.vmem [shape: f32[32,128], index: 16, kind: input, shape index: {}]   ;;  %s3776_s17 = inlined_call_operand.vmem [shape: f32[1,128], index: 17, kind: input, shape index: {}]   ;;  %s3777_s18 = inlined_call_operand.hbm [shape: f32[2,32], index: 18, kind: output, shape index: {0}]   ;;  %s3778_s19 = inlined_call_operand.vmem [shape: f32[14,128], index: 19, kind: output, shape index: {1}]   ;;  %s3779_s20 = inlined_call_operand.hbm [shape: f32[2,32], index: 20, kind: output, shape index: {2}]   ;;  %s3780_s21 = inlined_call_operand.hbm [shape: f32[2,32], index: 21, kind: output, shape index: {3}]  }
   0x1   :  { %3785 = sst [smem:[#allocation12_spill]] %s3759_s0 }
   0x2   :  { %3786 = sst [smem:[#allocation13_spill]] %s3760_s1 }
   0x3   :  { %3787 = sst [smem:[#allocation14_spill]] %s3761_s2 }
   0x4   :  { %3788 = sst [smem:[#allocation15_spill]] %s3762_s3 }
   0x5   :  { %3789 = sst [smem:[#allocation16_spill]] %s3763_s4 }
   0x6   :  { %3790 = sst [smem:[#allocation17_spill]] %s3764_s5 }
   0x7   :  { %27 = vsyncpa [#allocation6], 0  ;;  %s3791_s26 = sld [smem:[#allocation12_spill]]  ;;  %v3151_v2 = vmov 0   ;;  %v229_v4 = vld [vmem:[%s3772_s13 + $0x18] sm:$0xff]  ;;  %v228_v6 = vld [vmem:[%s3772_s13 + $0x10] sm:$0xff] }
   0x8   :  { %s3792_s28 = sld [smem:[#allocation13_spill]]  ;;  %2957 = vset.pattern.permute.xlu0 %v3151_v2  ;;  %2958 = vset.pattern.permute.xlu1 %v3151_v2 }
   0x9   :  { %s3793_s4 = sld [smem:[#allocation14_spill]]  ;;  %2716 = vmatprep.subr.mxu1 %v229_v4 }
   0xd   :  { %v65_v0 = vld [vmem:[%s3791_s26] sm:$0xff]  ;;  %v66_v7 = vld [vmem:[%s3791_s26 + $0x8] sm:$0xff] }
   0xe   :  { %v3277_v1 = vld [vmem:[%s3792_s28] sm:$0x3]  ;;  %70 = vperm.xlu0 %2957, %v65_v0  }
   0xf   :  { %v84_v3 = vld [vmem:[%s3793_s4 + $0x18] sm:$0xff]  ;;  %v83_v5 = vld [vmem:[%s3793_s4 + $0x10] sm:$0xff] }
  0x10   :  { %2705 = vmatprep.subr.mxu0 %v84_v3 }
  0x11   :  { %2706 = vmatpush3.msra.mxu0 %v84_v3 }
  0x12   :  { %28 = vsyncpa [#allocation8], 0  ;;  %vm465_vm0 = vcmp.gt.s32.totalorder %v3277_v1, 0  ;;  %2717 = vmatpush3.msra.mxu1 %v229_v4  ;;  %2707 = vmatprep.subr.mxu0 %v83_v5  ;;  %v82_v8 = vld [vmem:[%s3793_s4 + $0x8] sm:$0xff]  ;;  %v81_v10 = vld [vmem:[%s3793_s4] sm:$0xff]  ;;  %v3152_v13 = vmov 0.0   ;;  %v67_v14 = vlaneseq }
  0x13   :  { %v227_v9 = vld [vmem:[%s3772_s13 + $0x8] sm:$0xff]  ;;  %2718 = vmatprep.subr.mxu1 %v228_v6  ;;  %2708 = vmatpush3.msra.mxu0 %v83_v5  ;;  %v226_v11 = vld [vmem:[%s3772_s13] sm:$0xff]  ;;  %v466_v12 = vsel %vm465_vm0, 1, %v3151_v2  ;;  %vm92_vm1 = vcmask 261120   ;;  %s3794_s22 = sld [smem:[#allocation16_spill]]  ;;  %vm3153_vm4 = vmmov 0  }
  0x14   :  { %73 = vperm.xlu0 %2957, %v66_v7   ;;  %2719 = vmatpush3.msra.mxu1 %v228_v6  ;;  %v68_v15 = vand.u32 127, %v67_v14  ;;  %v3154_v24 = vmov 1983009808   ;;  %v181_v27 = vshrl.u32 %v67_v14, 7  ;;  %s3795_s29 = sld [smem:[#allocation15_spill]]  ;;  %s3156_s30 = smov 32  }
  0x15   :  { %2709 = vmatprep.subr.mxu0 %v82_v8  ;;  %2720 = vmatprep.subr.mxu1 %v227_v9  ;;  %v178_v25 = vunpack.c.l.s4 %v3154_v24  ;;  %v2544_v29 = vld [vmem:[%s3773_s14] ss:$0 sm:$0xff]  ;;  %s3155_s14 = smov 64   ;;  %vm575_vm6 = vcmp.gt.s32.totalorder %v3277_v1, 1  ;;  %vm685_vm8 = vcmp.gt.s32.totalorder %v3277_v1, 2  ;;  %vm795_vm10 = vcmp.gt.s32.totalorder %v3277_v1, 3 }
  0x16   :  { %2710 = vmatpush3.msra.mxu0 %v82_v8  ;;  %2721 = vmatpush3.msra.mxu1 %v227_v9  ;;  %vm905_vm12 = vcmp.gt.s32.totalorder %v3277_v1, 4  ;;  %vm1015_vm14 = vcmp.gt.s32.totalorder %v3277_v1, 5  ;;  %vm1125_vm0 = vcmp.gt.s32.totalorder %v3277_v1, 6  ;;  %s3796_s4 = sld [smem:[#allocation17_spill]]  ;;  %s3159_s13 = smov [#allocation5]  }
  0x17   :  { %2711 = vmatprep.subr.mxu0 %v81_v10  ;;  %2722 = vmatprep.subr.mxu1 %v226_v11  ;;  %v179_v26 = vunpack.c.0.s8 %v178_v25  ;;  %v576_v25 = vsel %vm575_vm6, 1, %v3151_v2  ;;  %vm1413_vm6 = vcmask 254976  }
  0x18   :  { %468 = vperm.xlu0 %2957, %v466_v12   ;;  %2712 = vmatpush3.msra.mxu0 %v81_v10 }
  0x19   :  { %2723 = vmatpush3.msra.mxu1 %v226_v11  ;;  %2727 = vmatprep.subr.mxu0 %v3152_v13  ;;  %v3318_v19 = vld [vmem:[%s3794_s22 + $0x18] sm:$0xff]  ;;  %v3326_v21 = vld [vmem:[%s3794_s22 + $0x10] sm:$0xff]  ;;  %v3335_v22 = vld [vmem:[%s3794_s22 + $0x8] sm:$0xff]  ;;  %v3375_v30 = vsub.s32 %v179_v26, %v181_v27 }
  0x1a   :  { %2738 = vmatprep.subr.mxu1 %v3152_v13  ;;  %v3344_v23 = vld [vmem:[%s3794_s22] sm:$0xff] }
  0x1b   :  { %v2537_v28 = vld [vmem:[%s3795_s29] ss:$0 sm:$0xff] }
  0x89   :  { %v71_v16 = vpop.permute.xlu0 %70 }
  0x8a   :  { %vm75_vm2 = vcmp.eq.s32.totalorder %v68_v15, %v71_v16 }
  0x8b   :  { %v2535_v17 = vsel %vm75_vm2, 1.0, %v3152_v13 }
  0x8c   :  { %2713 = vmatprep.mubr.msk.f32.mxu0 %vm92_vm1, %v2535_v17  ;;  %2724 = vmatprep.mubr.msk.f32.mxu1 %vm92_vm1, %v2535_v17 }
  0x8f   :  { %v74_v18 = vpop.permute.xlu0 %73 }
  0x90   :  { %vm76_vm3 = vcmp.eq.s32.totalorder %v68_v15, %v74_v18 }
  0x91   :  { %v2536_v20 = vsel %vm76_vm3, 1.0, %v3152_v13  ;;  %vm1235_vm3 = vcmp.gt.s32.totalorder %v3277_v1, 7 }
  0x92   :  { %2714 = vmatmul.mubr.msk.f32.vlgmr.msra.gmra.mxu0 %vm92_vm1, %v2536_v20  ;;  %2725 = vmatmul.mubr.msk.f32.vlgmr.msra.gmra.mxu1 %vm92_vm1, %v2536_v20 }
  0x93   :  { %2728 = vmatpush3.msra.mxu0 %v3318_v19  ;;  %2735 = vmatprep.mubr.msk.f32.mxu0 %vm3153_vm4, %v3152_v13  ;;  %v469_v10 = vpop.permute.xlu0 %468 }
  0x94   :  { %2729 = vmatprep.subr.mxu0 %v3152_v13  ;;  %2739 = vmatpush3.msra.mxu1 %v3318_v19  ;;  %vm470_vm5 = vcmp.eq.s32.totalorder %v469_v10, 1 }
  0x95   :  { %2730 = vmatpush3.msra.mxu0 %v3326_v21  ;;  %2740 = vmatprep.subr.mxu1 %v3152_v13 }
  0x96   :  { %2731 = vmatprep.subr.mxu0 %v3152_v13  ;;  %2741 = vmatpush3.msra.mxu1 %v3326_v21 }
  0x97   :  { %2732 = vmatpush3.msra.mxu0 %v3335_v22  ;;  %2742 = vmatprep.subr.mxu1 %v3152_v13 }
  0x98   :  { %2733 = vmatprep.subr.mxu0 %v3152_v13  ;;  %2743 = vmatpush3.msra.mxu1 %v3335_v22 }
  0x99   :  { %2734 = vmatpush3.msra.mxu0 %v3344_v23  ;;  %2744 = vmatprep.subr.mxu1 %v3152_v13 }
  0x9a   :  { %2736 = vmatmul.mubr.f32.vlgmr.msra.gmra.mxu0 %v3152_v13  ;;  %2745 = vmatpush3.msra.mxu1 %v3344_v23 }
  0x9b   :  { %2746 = vmatprep.mubr.msk.f32.mxu1 %vm3153_vm4, %v3152_v13  ;;  %2749 = vmatprep.subr.mxu0 %v3152_v13 }
  0x9c   :  { %2750 = vmatpush3.msra.mxu0 %v3318_v19  ;;  %2757 = vmatprep.mubr.msk.f32.mxu0 %vm3153_vm4, %v3152_v13 }
  0x9d   :  { %2751 = vmatprep.subr.mxu0 %v3152_v13  ;;  %2760 = vmatprep.subr.mxu1 %v3152_v13 }
  0x9e   :  { %2752 = vmatpush3.msra.mxu0 %v3326_v21 }
  0x9f   :  { %2753 = vmatprep.subr.mxu0 %v3152_v13 }
  0xa0   :  { %2754 = vmatpush3.msra.mxu0 %v3335_v22 }
  0xa1   :  { %2755 = vmatprep.subr.mxu0 %v3152_v13 }
  0xa2   :  { %2756 = vmatpush3.msra.mxu0 %v3344_v23 }
  0xa3   :  { %2771 = vmatprep.subr.mxu0 %v3152_v13 }
 0x152   :  { %v2715_v31 = vpop.f32.mrf.mxu0  ;;  %v2726_v32 = vpop.f32.mrf.mxu1 }
 0x153   :  { %v171_v33 = vadd.f32 %v2715_v31, %v2537_v28  ;;  %v309_v34 = vadd.f32 %v2726_v32, %v2544_v29 }
 0x154   :  { %v165_v35 = vpop.f32.mrf.mxu0  ;;  %v303_v36 = vpop.f32.mrf.mxu1 }
 0x155   :  { %v193_v37 = vcombine.high %v171_v33, %v171_v33  ;;  %v200_v38 = vrot.slane %v171_v33, %v3375_v30  ;;  %2542 = vst.sshfl [vmem:[#allocation2 + $0x8] sm:$0x3 pattern:$0x76325410] %v171_v33  ;;  %v331_v39 = vcombine.high %v309_v34, %v309_v34  ;;  %v338_v40 = vrot.slane %v309_v34, %v3375_v30 }
 0x156   :  { %2549 = vst.sshfl [vmem:[#allocation3 + $0x8] sm:$0x3 pattern:$0x76325410] %v309_v34  ;;  %v166_v41 = vadd.f32 %v2537_v28, %v165_v35  ;;  %v304_v42 = vadd.f32 %v2544_v29, %v303_v36 }
 0x157   :  { %v207_v43 = vrot.slane %v193_v37, %v3375_v30  ;;  %v208_v44 = vcombine.high %v200_v38, %v200_v38  ;;  %2543 = vst.sshfl [vmem:[#allocation2 + $0xc] sm:$0x3 pattern:$0x76325410] %v193_v37  ;;  %v346_v45 = vcombine.high %v338_v40, %v338_v40 }
 0x158   :  { %2550 = vst.sshfl [vmem:[#allocation3 + $0xc] sm:$0x3 pattern:$0x76325410] %v331_v39  ;;  %v176_v46 = vcombine.high %v166_v41, %v166_v41  ;;  %v183_v47 = vrot.slane %v166_v41, %v3375_v30  ;;  %v314_v48 = vcombine.high %v304_v42, %v304_v42  ;;  %v321_v49 = vrot.slane %v304_v42, %v3375_v30 }
 0x159   :  { %2540 = vst.sshfl [vmem:[#allocation2] sm:$0x3 pattern:$0x76325410] %v166_v41  ;;  %v209_v50 = vcombine.high %v207_v43, %v207_v43  ;;  %223 = vst [vmem:[#allocation2 + $0xa] sm:$0x3] %v208_v44 }
 0x15a   :  { %2547 = vst.sshfl [vmem:[#allocation3] sm:$0x3 pattern:$0x76325410] %v304_v42  ;;  %359 = vst [vmem:[#allocation3 + $0xa] sm:$0x3] %v346_v45  ;;  %v190_v51 = vrot.slane %v176_v46, %v3375_v30  ;;  %v191_v52 = vcombine.high %v183_v47, %v183_v47  ;;  %v328_v53 = vrot.slane %v314_v48, %v3375_v30  ;;  %v436_v55 = vpop.f32.mrf.mxu0 }
 0x15b   :  { %2541 = vst.sshfl [vmem:[#allocation2 + $0x4] sm:$0x3 pattern:$0x76325410] %v176_v46  ;;  %v329_v54 = vcombine.high %v321_v49, %v321_v49  ;;  %225 = vst [vmem:[#allocation2 + $0xe] sm:$0x3] %v209_v50 }
 0x15c   :  { %2548 = vst.sshfl [vmem:[#allocation3 + $0x4] sm:$0x3 pattern:$0x76325410] %v314_v48  ;;  %v192_v56 = vcombine.high %v190_v51, %v190_v51  ;;  %219 = vst [vmem:[#allocation2 + $0x2] sm:$0x3] %v191_v52  ;;  %v330_v57 = vcombine.high %v328_v53, %v328_v53  ;;  %v2737_v58 = vpop.f32.mrf.mxu0 }
 0x15d   :  { %355 = vst [vmem:[#allocation3 + $0x2] sm:$0x3] %v329_v54  ;;  %v686_v48 = vsel %vm685_vm8, 1, %v3151_v2 }
 0x15e   :  { %221 = vst [vmem:[#allocation2 + $0x6] sm:$0x3] %v192_v56  ;;  %357 = vst [vmem:[#allocation3 + $0x6] sm:$0x3] %v330_v57 }
 0x160   :  { %v366_v59 = vld [vmem:[#allocation2] sm:$0x3] }
 0x161   :  { %v440_v60 = vadd.f32 %v436_v55, %v366_v59 }
 0x162   :  { %v584_v43 = vld [vmem:[#allocation2 + $0x4] sm:$0x3] }
 0x163   :  { %2959 = vtanh.f32 %v440_v60  ;;  %v2551_v62 = vmul.f32 -1.442695, %v440_v60  ;;  %v474_v16 = vld [vmem:[#allocation2 + $0x2] sm:$0x3] }
 0x165   :  { %2961 = vpow2.f32 %v2551_v62 }
 0x170   :  { %v2960_v61 = vpop.eup %2959 }
 0x171   :  { %450 = vrot.lane.b32.xlu1 %v2960_v61, %s3155_s14 }
 0x172   :  { %v2962_v63 = vpop.eup %2961 }
 0x173   :  { %v444_v0 = vadd.f32 1.0, %v2962_v63 }
 0x175   :  { %2963 = vrcp.f32 %v444_v0 }
 0x182   :  { %v2964_v3 = vpop.eup %2963 }
 0x183   :  { %v448_v6 = vmul.f32 0.0, %v2964_v3 }
 0x1e3   :  { %v451_v4 = vpop.permute.xlu1 %450 }
 0x1e4   :  { %v453_v5 = vmul.f32 %v2964_v3, %v451_v4 }
 0x1e6   :  { %455 = vrot.lane.b32.xlu1 %v453_v5, %s3156_s30 }
 0x258   :  { %v456_v7 = vpop.permute.xlu1 %455 }
 0x259   :  { %v458_v8 = vadd.f32 %v456_v7, %v448_v6 }
 0x25b   :  { %2965 = vtanh.f32 %v458_v8  ;;  %v472_v33 = vsel %vm470_vm5, %v458_v8, 0.0  ;;  %v796_v8 = vsel %vm795_vm10, 1, %v3151_v2 }
 0x268   :  { %v2966_v9 = vpop.eup %2965 }
 0x269   :  { %461 = vrot.lane.b32.xlu1 %v2966_v9, %s3155_s14 }
 0x2db   :  { %v462_v11 = vpop.permute.xlu1 %461 }
 0x2dc   :  { %v464_v12 = vmul.f32 %v2964_v3, %v462_v11  ;;  %v694_v3 = vld [vmem:[#allocation2 + $0x6] sm:$0x3] }
 0x2de   :  { %v471_v14 = vsel %vm470_vm5, %v464_v12, 0.0 }
 0x2df   :  { %476 = vrot.lane.b32.xlu0 %v471_v14, %s3156_s30 }
 0x351   :  { %v477_v15 = vpop.permute.xlu0 %476 }
 0x352   :  { %2747 = vmatmul.mubr.msk.f32.vlgmr.msra.gmra.mxu1 %vm92_vm1, %v477_v15 }
 0x353   :  { %2761 = vmatpush3.msra.mxu1 %v3318_v19  ;;  %2768 = vmatprep.mubr.msk.f32.mxu1 %vm3153_vm4, %v3152_v13 }
 0x354   :  { %2762 = vmatprep.subr.mxu1 %v3152_v13 }
 0x355   :  { %2763 = vmatpush3.msra.mxu1 %v3326_v21 }
 0x356   :  { %2764 = vmatprep.subr.mxu1 %v3152_v13 }
 0x357   :  { %2765 = vmatpush3.msra.mxu1 %v3335_v22 }
 0x358   :  { %2766 = vmatprep.subr.mxu1 %v3152_v13 }
 0x359   :  { %2767 = vmatpush3.msra.mxu1 %v3344_v23 }
 0x35a   :  { %2782 = vmatprep.subr.mxu1 %v3152_v13 }
 0x412   :  { %v546_v17 = vpop.f32.mrf.mxu1 }
 0x413   :  { %v550_v18 = vadd.f32 %v546_v17, %v474_v16 }
 0x414   :  { %v2748_v20 = vpop.f32.mrf.mxu1 }
 0x415   :  { %2967 = vtanh.f32 %v550_v18  ;;  %v2553_v26 = vmul.f32 -1.442695, %v550_v18 }
 0x417   :  { %2969 = vpow2.f32 %v2553_v26 }
 0x422   :  { %v2968_v24 = vpop.eup %2967 }
 0x423   :  { %560 = vrot.lane.b32.xlu1 %v2968_v24, %s3155_s14 }
 0x424   :  { %v2970_v27 = vpop.eup %2969 }
 0x425   :  { %v554_v28 = vadd.f32 1.0, %v2970_v27 }
 0x427   :  { %578 = vperm.xlu1 %2958, %v576_v25   ;;  %2971 = vrcp.f32 %v554_v28 }
 0x434   :  { %v2972_v29 = vpop.eup %2971 }
 0x435   :  { %v558_v34 = vmul.f32 %v2972_v29, %v472_v33 }
 0x495   :  { %v561_v31 = vpop.permute.xlu1 %560 }
 0x496   :  { %v563_v32 = vmul.f32 %v2972_v29, %v561_v31  ;;  %v804_v31 = vld [vmem:[#allocation2 + $0x8] sm:$0x3] }
 0x498   :  { %565 = vrot.lane.b32.xlu0 %v563_v32, %s3156_s30 }
 0x4a2   :  { %v579_v38 = vpop.permute.xlu1 %578 }
 0x4a3   :  { %vm580_vm7 = vcmp.eq.s32.totalorder %v579_v38, 1 }
 0x50a   :  { %v566_v35 = vpop.permute.xlu0 %565 }
 0x50b   :  { %v568_v36 = vadd.f32 %v566_v35, %v558_v34 }
 0x50d   :  { %2973 = vtanh.f32 %v568_v36  ;;  %v582_v55 = vsel %vm580_vm7, %v568_v36, %v472_v33  ;;  %v906_v36 = vsel %vm905_vm12, 1, %v3151_v2 }
 0x51a   :  { %v2974_v37 = vpop.eup %2973 }
 0x51b   :  { %571 = vrot.lane.b32.xlu0 %v2974_v37, %s3155_s14 }
 0x58d   :  { %v572_v39 = vpop.permute.xlu0 %571 }
 0x58e   :  { %v574_v40 = vmul.f32 %v2972_v29, %v572_v39 }
 0x590   :  { %v581_v41 = vsel %vm580_vm7, %v574_v40, %v471_v14 }
 0x591   :  { %586 = vrot.lane.b32.xlu1 %v581_v41, %s3156_s30 }
 0x603   :  { %v587_v42 = vpop.permute.xlu1 %586 }
 0x604   :  { %2758 = vmatmul.mubr.msk.f32.vlgmr.msra.gmra.mxu0 %vm92_vm1, %v587_v42 }
 0x605   :  { %2772 = vmatpush3.msra.mxu0 %v3318_v19  ;;  %2779 = vmatprep.mubr.msk.f32.mxu0 %vm3153_vm4, %v3152_v13 }
 0x606   :  { %2773 = vmatprep.subr.mxu0 %v3152_v13 }
 0x607   :  { %2774 = vmatpush3.msra.mxu0 %v3326_v21 }
 0x608   :  { %2775 = vmatprep.subr.mxu0 %v3152_v13 }
 0x609   :  { %2776 = vmatpush3.msra.mxu0 %v3335_v22 }
 0x60a   :  { %2777 = vmatprep.subr.mxu0 %v3152_v13 }
 0x60b   :  { %2778 = vmatpush3.msra.mxu0 %v3344_v23 }
 0x60c   :  { %2793 = vmatprep.subr.mxu0 %v3152_v13 }
 0x6c4   :  { %v656_v44 = vpop.f32.mrf.mxu0 }
 0x6c5   :  { %v660_v45 = vadd.f32 %v656_v44, %v584_v43 }
 0x6c6   :  { %v2759_v46 = vpop.f32.mrf.mxu0 }
 0x6c7   :  { %2975 = vtanh.f32 %v660_v45  ;;  %v2555_v49 = vmul.f32 -1.442695, %v660_v45 }
 0x6c9   :  { %2977 = vpow2.f32 %v2555_v49 }
 0x6d4   :  { %v2976_v47 = vpop.eup %2975 }
 0x6d5   :  { %670 = vrot.lane.b32.xlu0 %v2976_v47, %s3155_s14 }
 0x6d6   :  { %v2978_v50 = vpop.eup %2977 }
 0x6d7   :  { %v664_v51 = vadd.f32 1.0, %v2978_v50 }
 0x6d9   :  { %688 = vperm.xlu0 %2957, %v686_v48   ;;  %2979 = vrcp.f32 %v664_v51 }
 0x6e6   :  { %v2980_v52 = vpop.eup %2979 }
 0x6e7   :  { %v668_v56 = vmul.f32 %v2980_v52, %v582_v55 }
 0x747   :  { %v671_v53 = vpop.permute.xlu0 %670 }
 0x748   :  { %v673_v54 = vmul.f32 %v2980_v52, %v671_v53  ;;  %v914_v53 = vld [vmem:[#allocation2 + $0xa] sm:$0x3] }
 0x74a   :  { %675 = vrot.lane.b32.xlu1 %v673_v54, %s3156_s30 }
 0x754   :  { %v689_v60 = vpop.permute.xlu0 %688 }
 0x755   :  { %vm690_vm9 = vcmp.eq.s32.totalorder %v689_v60, 1 }
 0x7bc   :  { %v676_v57 = vpop.permute.xlu1 %675 }
 0x7bd   :  { %v678_v58 = vadd.f32 %v676_v57, %v668_v56 }
 0x7bf   :  { %2981 = vtanh.f32 %v678_v58  ;;  %v692_v16 = vsel %vm690_vm9, %v678_v58, %v582_v55 }
 0x7cc   :  { %v2982_v59 = vpop.eup %2981 }
 0x7cd   :  { %681 = vrot.lane.b32.xlu1 %v2982_v59, %s3155_s14 }
 0x83f   :  { %v682_v61 = vpop.permute.xlu1 %681 }
 0x840   :  { %v684_v62 = vmul.f32 %v2980_v52, %v682_v61 }
 0x842   :  { %v691_v63 = vsel %vm690_vm9, %v684_v62, %v581_v41 }
 0x843   :  { %696 = vrot.lane.b32.xlu0 %v691_v63, %s3156_s30 }
 0x8b5   :  { %v697_v0 = vpop.permute.xlu0 %696 }
 0x8b6   :  { %2769 = vmatmul.mubr.msk.f32.vlgmr.msra.gmra.mxu1 %vm92_vm1, %v697_v0 }
 0x8b7   :  { %2783 = vmatpush3.msra.mxu1 %v3318_v19  ;;  %2790 = vmatprep.mubr.msk.f32.mxu1 %vm3153_vm4, %v3152_v13 }
 0x8b8   :  { %2784 = vmatprep.subr.mxu1 %v3152_v13 }
 0x8b9   :  { %2785 = vmatpush3.msra.mxu1 %v3326_v21 }
 0x8ba   :  { %2786 = vmatprep.subr.mxu1 %v3152_v13 }
 0x8bb   :  { %2787 = vmatpush3.msra.mxu1 %v3335_v22 }
 0x8bc   :  { %2788 = vmatprep.subr.mxu1 %v3152_v13 }
 0x8bd   :  { %2789 = vmatpush3.msra.mxu1 %v3344_v23 }
 0x8be   :  { %2804 = vmatprep.subr.mxu1 %v3152_v13 }
 0x976   :  { %v766_v4 = vpop.f32.mrf.mxu1 }
 0x977   :  { %v770_v5 = vadd.f32 %v766_v4, %v694_v3 }
 0x978   :  { %v2770_v6 = vpop.f32.mrf.mxu1 }
 0x979   :  { %2983 = vtanh.f32 %v770_v5  ;;  %v2557_v9 = vmul.f32 -1.442695, %v770_v5 }
 0x97b   :  { %2985 = vpow2.f32 %v2557_v9  ;;  %v1024_v9 = vld [vmem:[#allocation2 + $0xc] sm:$0x3] }
 0x986   :  { %v2984_v7 = vpop.eup %2983 }
 0x987   :  { %780 = vrot.lane.b32.xlu1 %v2984_v7, %s3155_s14 }
 0x988   :  { %v2986_v10 = vpop.eup %2985 }
 0x989   :  { %v774_v11 = vadd.f32 1.0, %v2986_v10 }
 0x98b   :  { %798 = vperm.xlu1 %2958, %v796_v8   ;;  %2987 = vrcp.f32 %v774_v11 }
 0x998   :  { %v2988_v12 = vpop.eup %2987 }
 0x999   :  { %v778_v17 = vmul.f32 %v2988_v12, %v692_v16 }
 0x9f9   :  { %v781_v14 = vpop.permute.xlu1 %780 }
 0x9fa   :  { %v783_v15 = vmul.f32 %v2988_v12, %v781_v14 }
 0x9fc   :  { %785 = vrot.lane.b32.xlu0 %v783_v15, %s3156_s30  ;;  %v1126_v15 = vsel %vm1125_vm0, 1, %v3151_v2 }
 0xa06   :  { %v799_v25 = vpop.permute.xlu1 %798 }
 0xa07   :  { %vm800_vm11 = vcmp.eq.s32.totalorder %v799_v25, 1 }
 0xa6e   :  { %v786_v18 = vpop.permute.xlu0 %785 }
 0xa6f   :  { %v788_v20 = vadd.f32 %v786_v18, %v778_v17 }
 0xa71   :  { %2989 = vtanh.f32 %v788_v20  ;;  %v802_v43 = vsel %vm800_vm11, %v788_v20, %v692_v16 }
 0xa7e   :  { %v2990_v24 = vpop.eup %2989 }
 0xa7f   :  { %791 = vrot.lane.b32.xlu0 %v2990_v24, %s3155_s14 }
 0xaf1   :  { %v792_v26 = vpop.permute.xlu0 %791 }
 0xaf2   :  { %v794_v27 = vmul.f32 %v2988_v12, %v792_v26 }
 0xaf4   :  { %v801_v28 = vsel %vm800_vm11, %v794_v27, %v691_v63 }
 0xaf5   :  { %806 = vrot.lane.b32.xlu1 %v801_v28, %s3156_s30 }
 0xb67   :  { %v807_v29 = vpop.permute.xlu1 %806 }
 0xb68   :  { %2780 = vmatmul.mubr.msk.f32.vlgmr.msra.gmra.mxu0 %vm92_vm1, %v807_v29 }
 0xb69   :  { %2794 = vmatpush3.msra.mxu0 %v3318_v19  ;;  %2801 = vmatprep.mubr.msk.f32.mxu0 %vm3153_vm4, %v3152_v13 }
 0xb6a   :  { %2795 = vmatprep.subr.mxu0 %v3152_v13 }
 0xb6b   :  { %2796 = vmatpush3.msra.mxu0 %v3326_v21 }
 0xb6c   :  { %2797 = vmatprep.subr.mxu0 %v3152_v13 }
 0xb6d   :  { %2798 = vmatpush3.msra.mxu0 %v3335_v22 }
 0xb6e   :  { %2799 = vmatprep.subr.mxu0 %v3152_v13 }
 0xb6f   :  { %2800 = vmatpush3.msra.mxu0 %v3344_v23 }
 0xb70   :  { %2815 = vmatprep.subr.mxu0 %v3152_v13 }
 0xc28   :  { %v876_v32 = vpop.f32.mrf.mxu0 }
 0xc29   :  { %v880_v33 = vadd.f32 %v876_v32, %v804_v31 }
 0xc2a   :  { %v2781_v34 = vpop.f32.mrf.mxu0 }
 0xc2b   :  { %2991 = vtanh.f32 %v880_v33  ;;  %v2559_v37 = vmul.f32 -1.442695, %v880_v33 }
 0xc2d   :  { %2993 = vpow2.f32 %v2559_v37  ;;  %v1134_v37 = vld [vmem:[#allocation2 + $0xe] sm:$0x3] }
 0xc38   :  { %v2992_v35 = vpop.eup %2991 }
 0xc39   :  { %890 = vrot.lane.b32.xlu0 %v2992_v35, %s3155_s14 }
 0xc3a   :  { %v2994_v38 = vpop.eup %2993 }
 0xc3b   :  { %v884_v39 = vadd.f32 1.0, %v2994_v38 }
 0xc3d   :  { %908 = vperm.xlu0 %2957, %v906_v36   ;;  %2995 = vrcp.f32 %v884_v39 }
 0xc4a   :  { %v2996_v40 = vpop.eup %2995 }
 0xc4b   :  { %v888_v44 = vmul.f32 %v2996_v40, %v802_v43 }
 0xcab   :  { %v891_v41 = vpop.permute.xlu0 %890 }
 0xcac   :  { %v893_v42 = vmul.f32 %v2996_v40, %v891_v41 }
 0xcae   :  { %895 = vrot.lane.b32.xlu1 %v893_v42, %s3156_s30  ;;  %v1236_v42 = vsel %vm1235_vm3, 1, %v3151_v2 }
 0xcb8   :  { %v909_v48 = vpop.permute.xlu0 %908 }
 0xcb9   :  { %vm910_vm13 = vcmp.eq.s32.totalorder %v909_v48, 1 }
 0xd20   :  { %v896_v45 = vpop.permute.xlu1 %895 }
 0xd21   :  { %v898_v46 = vadd.f32 %v896_v45, %v888_v44 }
 0xd23   :  { %2997 = vtanh.f32 %v898_v46  ;;  %v912_v61 = vsel %vm910_vm13, %v898_v46, %v802_v43 }
 0xd30   :  { %v2998_v47 = vpop.eup %2997 }
 0xd31   :  { %901 = vrot.lane.b32.xlu1 %v2998_v47, %s3155_s14 }
 0xda3   :  { %v902_v49 = vpop.permute.xlu1 %901 }
 0xda4   :  { %v904_v50 = vmul.f32 %v2996_v40, %v902_v49 }
 0xda6   :  { %v911_v51 = vsel %vm910_vm13, %v904_v50, %v801_v28 }
 0xda7   :  { %916 = vrot.lane.b32.xlu0 %v911_v51, %s3156_s30 }
 0xe19   :  { %v917_v52 = vpop.permute.xlu0 %916 }
 0xe1a   :  { %2791 = vmatmul.mubr.msk.f32.vlgmr.msra.gmra.mxu1 %vm92_vm1, %v917_v52  ;;  %v1244_v52 = vld [vmem:[%s3796_s4 + $0x10] sm:$0xff] }
 0xe1b   :  { %2805 = vmatpush3.msra.mxu1 %v3318_v19  ;;  %2812 = vmatprep.mubr.msk.f32.mxu1 %vm3153_vm4, %v3152_v13 }
 0xe1c   :  { %2806 = vmatprep.subr.mxu1 %v3152_v13 }
 0xe1d   :  { %2807 = vmatpush3.msra.mxu1 %v3326_v21  ;;  %v1016_v21 = vsel %vm1015_vm14, 1, %v3151_v2  ;;  %v1245_v2 = vld [vmem:[%s3796_s4 + $0x18] sm:$0xff] }
 0xe1e   :  { %2808 = vmatprep.subr.mxu1 %v3152_v13 }
 0xe1f   :  { %2809 = vmatpush3.msra.mxu1 %v3335_v22 }
 0xe20   :  { %2810 = vmatprep.subr.mxu1 %v3152_v13 }
 0xe21   :  { %2811 = vmatpush3.msra.mxu1 %v3344_v23 }
 0xe22   :  { %2826 = vmatprep.subr.mxu1 %v3152_v13 }
 0xeda   :  { %v986_v54 = vpop.f32.mrf.mxu1 }
 0xedb   :  { %v990_v19 = vadd.f32 %v986_v54, %v914_v53  ;;  %v1243_v53 = vld [vmem:[%s3796_s4 + $0x8] sm:$0xff]  ;;  %v1242_v54 = vld [vmem:[%s3796_s4] sm:$0xff]  ;;  %s2496_s4 = sshll.u32 %s3159_s13, 4  ;;  %s2497_s4 = int_to_ptr.vmem [resolvable:$true] %s2496_s4 }
 0xedc   :  { %v2792_v55 = vpop.f32.mrf.mxu1 }
 0xedd   :  { %2999 = vtanh.f32 %v990_v19  ;;  %v2561_v22 = vmul.f32 -1.442695, %v990_v19  ;;  %v1332_v55 = vld [vmem:[%s3766_s7 + $0x18] sm:$0xff] }
 0xedf   :  { %3001 = vpow2.f32 %v2561_v22 }
 0xeea   :  { %v3000_v56 = vpop.eup %2999 }
 0xeeb   :  { %1000 = vrot.lane.b32.xlu1 %v3000_v56, %s3155_s14 }
 0xeec   :  { %v3002_v57 = vpop.eup %3001 }
 0xeed   :  { %v994_v58 = vadd.f32 1.0, %v3002_v57 }
 0xeef   :  { %1018 = vperm.xlu1 %2958, %v1016_v21   ;;  %3003 = vrcp.f32 %v994_v58 }
 0xefc   :  { %v3004_v23 = vpop.eup %3003 }
 0xefd   :  { %v998_v62 = vmul.f32 %v3004_v23, %v912_v61 }
 0xf5d   :  { %v1001_v59 = vpop.permute.xlu1 %1000 }
 0xf5e   :  { %v1003_v60 = vmul.f32 %v3004_v23, %v1001_v59  ;;  %v1330_v59 = vld [vmem:[%s3766_s7 + $0x8] sm:$0xff] }
 0xf60   :  { %1005 = vrot.lane.b32.xlu0 %v1003_v60, %s3156_s30  ;;  %v1329_v60 = vld [vmem:[%s3766_s7] sm:$0xff] }
 0xf6a   :  { %v1019_v4 = vpop.permute.xlu1 %1018 }
 0xf6b   :  { %vm1020_vm15 = vcmp.eq.s32.totalorder %v1019_v4, 1 }
 0xfd2   :  { %v1006_v63 = vpop.permute.xlu0 %1005 }
 0xfd3   :  { %v1008_v0 = vadd.f32 %v1006_v63, %v998_v62  ;;  %v1417_v62 = vld [vmem:[%s3768_s9 + $0x10] sm:$0xff]  ;;  %v2566_v63 = vld [vmem:[%s3765_s6] ss:$0 sm:$0xff] }
 0xfd5   :  { %3005 = vtanh.f32 %v1008_v0  ;;  %v1022_v26 = vsel %vm1020_vm15, %v1008_v0, %v912_v61  ;;  %v1418_v61 = vld [vmem:[%s3768_s9 + $0x18] sm:$0xff] }
 0xfe2   :  { %v3006_v3 = vpop.eup %3005 }
 0xfe3   :  { %1011 = vrot.lane.b32.xlu0 %v3006_v3, %s3155_s14 }
0x1055   :  { %v1012_v5 = vpop.permute.xlu0 %1011 }
0x1056   :  { %v1014_v6 = vmul.f32 %v3004_v23, %v1012_v5  ;;  %v1331_v23 = vld [vmem:[%s3766_s7 + $0x10] sm:$0xff] }
0x1058   :  { %v1021_v7 = vsel %vm1020_vm15, %v1014_v6, %v911_v51  ;;  %v1416_v6 = vld [vmem:[%s3768_s9 + $0x8] sm:$0xff] }
0x1059   :  { %1026 = vrot.lane.b32.xlu1 %v1021_v7, %s3156_s30 }
0x10cb   :  { %v1027_v8 = vpop.permute.xlu1 %1026 }
0x10cc   :  { %2802 = vmatmul.mubr.msk.f32.vlgmr.msra.gmra.mxu0 %vm92_vm1, %v1027_v8  ;;  %v1503_v8 = vld [vmem:[%s3770_s11 + $0x18] sm:$0xff] }
0x10cd   :  { %2823 = vmatprep.mubr.msk.f32.mxu0 %vm3153_vm4, %v3152_v13  ;;  %2816 = vmatpush3.msra.mxu0 %v1245_v2  ;;  %v1693_v2 = vld [vmem:[#allocation3 + $0x2] sm:$0x3] }
0x10ce   :  { %2817 = vmatprep.subr.mxu0 %v3152_v13 }
0x10cf   :  { %2818 = vmatpush3.msra.mxu0 %v1244_v52 }
0x10d0   :  { %2819 = vmatprep.subr.mxu0 %v3152_v13 }
0x10d1   :  { %2820 = vmatpush3.msra.mxu0 %v1243_v53 }
0x10d2   :  { %2821 = vmatprep.subr.mxu0 %v3152_v13 }
0x10d3   :  { %2822 = vmatpush3.msra.mxu0 %v1242_v54 }
0x10d4   :  { %2837 = vmatprep.subr.mxu0 %v3152_v13 }
0x118c   :  { %v1096_v10 = vpop.f32.mrf.mxu0 }
0x118d   :  { %v1100_v11 = vadd.f32 %v1096_v10, %v1024_v9  ;;  %v2568_v9 = vld [vmem:[%s3767_s8] ss:$0 sm:$0xff] }
0x118e   :  { %v2803_v12 = vpop.f32.mrf.mxu0 }
0x118f   :  { %3007 = vtanh.f32 %v1100_v11  ;;  %v2563_v16 = vmul.f32 -1.442695, %v1100_v11 }
0x1191   :  { %3009 = vpow2.f32 %v2563_v16  ;;  %v1500_v16 = vld [vmem:[%s3770_s11] sm:$0xff] }
0x119c   :  { %v3008_v14 = vpop.eup %3007 }
0x119d   :  { %1110 = vrot.lane.b32.xlu0 %v3008_v14, %s3155_s14  ;;  %v1502_v14 = vld [vmem:[%s3770_s11 + $0x10] sm:$0xff] }
0x119e   :  { %v3010_v17 = vpop.eup %3009 }
0x119f   :  { %v1104_v18 = vadd.f32 1.0, %v3010_v17  ;;  %v3587_v17 = vld [vmem:[%s3774_s15 + $0x18] sm:$0xff] }
0x11a1   :  { %1128 = vperm.xlu0 %2957, %v1126_v15   ;;  %3011 = vrcp.f32 %v1104_v18  ;;  %v1501_v15 = vld [vmem:[%s3770_s11 + $0x8] sm:$0xff]  ;;  %v3592_v18 = vld [vmem:[%s3774_s15 + $0x10] sm:$0xff] }
0x11ae   :  { %v3012_v20 = vpop.eup %3011 }
0x11af   :  { %v1108_v27 = vmul.f32 %v3012_v20, %v1022_v26 }
0x120f   :  { %v1111_v24 = vpop.permute.xlu0 %1110 }
0x1210   :  { %v1113_v25 = vmul.f32 %v3012_v20, %v1111_v24 }
0x1212   :  { %1115 = vrot.lane.b32.xlu1 %v1113_v25, %s3156_s30 }
0x121c   :  { %v1129_v32 = vpop.permute.xlu0 %1128 }
0x121d   :  { %vm1130_vm2 = vcmp.eq.s32.totalorder %v1129_v32, 1 }
0x1284   :  { %v1116_v28 = vpop.permute.xlu1 %1115 }
0x1285   :  { %v1118_v29 = vadd.f32 %v1116_v28, %v1108_v27  ;;  %v3612_v28 = vld [vmem:[%s3774_s15 + $0x8] sm:$0xff] }
0x1287   :  { %3013 = vtanh.f32 %v1118_v29  ;;  %v1132_v49 = vsel %vm1130_vm2, %v1118_v29, %v1022_v26  ;;  %v3620_v29 = vld [vmem:[%s3774_s15] sm:$0xff] }
0x1294   :  { %v3014_v31 = vpop.eup %3013 }
0x1295   :  { %1121 = vrot.lane.b32.xlu1 %v3014_v31, %s3155_s14  ;;  %v2572_v31 = vld [vmem:[%s3771_s12] ss:$0 sm:$0xff] }
0x1307   :  { %v1122_v33 = vpop.permute.xlu1 %1121 }
0x1308   :  { %v1124_v34 = vmul.f32 %v3012_v20, %v1122_v33  ;;  %v2570_v20 = vld [vmem:[%s3769_s10] ss:$0 sm:$0xff] }
0x130a   :  { %v1131_v35 = vsel %vm1130_vm2, %v1124_v34, %v1021_v7  ;;  %v1415_v7 = vld [vmem:[%s3768_s9] sm:$0xff] }
0x130b   :  { %1136 = vrot.lane.b32.xlu0 %v1131_v35, %s3156_s30 }
0x137d   :  { %v1137_v36 = vpop.permute.xlu0 %1136 }
0x137e   :  { %2813 = vmatmul.mubr.msk.f32.vlgmr.msra.gmra.mxu1 %vm92_vm1, %v1137_v36 }
0x137f   :  { %2834 = vmatprep.mubr.msk.f32.mxu1 %vm3153_vm4, %v3152_v13  ;;  %2827 = vmatpush3.msra.mxu1 %v1332_v55 }
0x1380   :  { %2828 = vmatprep.subr.mxu1 %v3152_v13 }
0x1381   :  { %2829 = vmatpush3.msra.mxu1 %v1331_v23 }
0x1382   :  { %2830 = vmatprep.subr.mxu1 %v3152_v13 }
0x1383   :  { %2831 = vmatpush3.msra.mxu1 %v1330_v59 }
0x1384   :  { %2832 = vmatprep.subr.mxu1 %v3152_v13 }
0x1385   :  { %2833 = vmatpush3.msra.mxu1 %v1329_v60 }
0x1386   :  { %2848 = vmatprep.subr.mxu1 %v3152_v13 }
0x143e   :  { %v1206_v38 = vpop.f32.mrf.mxu1 }
0x143f   :  { %v1210_v39 = vadd.f32 %v1206_v38, %v1134_v37 }
0x1440   :  { %v2814_v40 = vpop.f32.mrf.mxu1 }
0x1441   :  { %3015 = vtanh.f32 %v1210_v39  ;;  %v2565_v43 = vmul.f32 -1.442695, %v1210_v39 }
0x1443   :  { %3017 = vpow2.f32 %v2565_v43 }
0x144e   :  { %v3016_v41 = vpop.eup %3015 }
0x144f   :  { %1220 = vrot.lane.b32.xlu1 %v3016_v41, %s3155_s14 }
0x1450   :  { %v3018_v44 = vpop.eup %3017 }
0x1451   :  { %v1214_v45 = vadd.f32 1.0, %v3018_v44 }
0x1453   :  { %1238 = vperm.xlu1 %2958, %v1236_v42   ;;  %3019 = vrcp.f32 %v1214_v45 }
0x1460   :  { %v3020_v46 = vpop.eup %3019 }
0x1461   :  { %v1218_v50 = vmul.f32 %v3020_v46, %v1132_v49 }
0x14c1   :  { %v1221_v47 = vpop.permute.xlu1 %1220 }
0x14c2   :  { %v1223_v48 = vmul.f32 %v3020_v46, %v1221_v47 }
0x14c4   :  { %1225 = vrot.lane.b32.xlu0 %v1223_v48, %s3156_s30 }
0x14ce   :  { %v1239_v56 = vpop.permute.xlu1 %1238 }
0x14cf   :  { %vm1240_vm5 = vcmp.eq.s32.totalorder %v1239_v56, 1 }
0x1536   :  { %v1226_v1 = vpop.permute.xlu0 %1225 }
0x1537   :  { %v1228_v51 = vadd.f32 %v1226_v1, %v1218_v50 }
0x1539   :  { %3021 = vtanh.f32 %v1228_v51 }
0x1546   :  { %v3022_v19 = vpop.eup %3021 }
0x1547   :  { %1231 = vrot.lane.b32.xlu0 %v3022_v19, %s3155_s14 }
0x15b9   :  { %v1232_v21 = vpop.permute.xlu0 %1231 }
0x15ba   :  { %v1234_v22 = vmul.f32 %v3020_v46, %v1232_v21 }
0x15bc   :  { %v1241_v57 = vsel %vm1240_vm5, %v1234_v22, %v1131_v35  ;;  %v1588_v35 = vld [vmem:[#allocation3] sm:$0x3] }
0x15bd   :  { %1254 = vrot.lane.b32.xlu1 %v1241_v57, %s3156_s30 }
0x162f   :  { %v1255_v58 = vpop.permute.xlu1 %1254 }
0x1630   :  { %2824 = vmatmul.mubr.msk.f32.vlgmr.msra.gmra.mxu0 %vm92_vm1, %v1255_v58 }
0x1631   :  { %2845 = vmatprep.mubr.msk.f32.mxu0 %vm3153_vm4, %v3152_v13  ;;  %2838 = vmatpush3.msra.mxu0 %v1418_v61 }
0x1632   :  { %2839 = vmatprep.subr.mxu0 %v3152_v13 }
0x1633   :  { %2840 = vmatpush3.msra.mxu0 %v1417_v62 }
0x1634   :  { %2841 = vmatprep.subr.mxu0 %v3152_v13 }
0x1635   :  { %2842 = vmatpush3.msra.mxu0 %v1416_v6 }
0x1636   :  { %2843 = vmatprep.subr.mxu0 %v3152_v13 }
0x1637   :  { %2844 = vmatpush3.msra.mxu0 %v1415_v7 }
0x1638   :  { %2859 = vmatprep.subr.mxu0 %v3152_v13 }
0x16f0   :  { %v1324_v0 = vpop.f32.mrf.mxu0 }
0x16f1   :  { %v1325_v3 = vadd.f32 %v2566_v63, %v1324_v0 }
0x16f2   :  { %v2825_v4 = vpop.f32.mrf.mxu0 }
0x16f3   :  { %v1328_v5 = vmax.f32 %v1325_v3, 0.0  ;;  %v1798_v3 = vld [vmem:[#allocation3 + $0x4] sm:$0x3] }
0x16f5   :  { %2835 = vmatmul.mubr.msk.f32.vlgmr.msra.gmra.mxu1 %vm92_vm1, %v1328_v5 }
0x16f6   :  { %2856 = vmatprep.mubr.msk.f32.mxu1 %vm3153_vm4, %v3152_v13  ;;  %2849 = vmatpush3.msra.mxu1 %v1503_v8 }
0x16f7   :  { %2850 = vmatprep.subr.mxu1 %v3152_v13 }
0x16f8   :  { %2851 = vmatpush3.msra.mxu1 %v1502_v14 }
0x16f9   :  { %2852 = vmatprep.subr.mxu1 %v3152_v13 }
0x16fa   :  { %2853 = vmatpush3.msra.mxu1 %v1501_v15 }
0x16fb   :  { %2854 = vmatprep.subr.mxu1 %v3152_v13 }
0x16fc   :  { %2855 = vmatpush3.msra.mxu1 %v1500_v16 }
0x16fd   :  { %2870 = vmatprep.subr.mxu1 %v3152_v13 }
0x17b5   :  { %v1409_v10 = vpop.f32.mrf.mxu1 }
0x17b6   :  { %v1410_v11 = vadd.f32 %v2568_v9, %v1409_v10 }
0x17b7   :  { %v2836_v12 = vpop.f32.mrf.mxu1 }
0x17b8   :  { %2846 = vmatmul.mubr.msk.f32.vlgmr.msra.gmra.mxu0 %vm92_vm1, %v1410_v11  ;;  %1414 = vst.msk [vmem:[#allocation5] sm:$0x3] %vm1413_vm6, %v1410_v11 }
0x17b9   :  { %2867 = vmatprep.mubr.msk.f32.mxu0 %vm3153_vm4, %v3152_v13  ;;  %2860 = vmatpush3.msra.mxu0 %v3587_v17 }
0x17ba   :  { %2861 = vmatprep.subr.mxu0 %v3152_v13 }
0x17bb   :  { %2862 = vmatpush3.msra.mxu0 %v3592_v18 }
0x17bc   :  { %2863 = vmatprep.subr.mxu0 %v3152_v13 }
0x17bd   :  { %2864 = vmatpush3.msra.mxu0 %v3612_v28 }
0x17be   :  { %2865 = vmatprep.subr.mxu0 %v3152_v13 }
0x17bf   :  { %2866 = vmatpush3.msra.mxu0 %v3620_v29 }
0x17c0   :  { %2881 = vmatprep.subr.mxu0 %v3152_v13 }
0x1878   :  { %v1495_v24 = vpop.f32.mrf.mxu0 }
0x1879   :  { %v1496_v25 = vadd.f32 %v2570_v20, %v1495_v24 }
0x187a   :  { %v2847_v26 = vpop.f32.mrf.mxu0 }
0x187b   :  { %v1499_v27 = vmax.f32 %v1496_v25, 0.0 }
0x187d   :  { %2857 = vmatmul.mubr.msk.f32.vlgmr.msra.gmra.mxu1 %vm92_vm1, %v1499_v27 }
0x187e   :  { %2871 = vmatpush3.msra.mxu1 %v3587_v17  ;;  %2878 = vmatprep.mubr.msk.f32.mxu1 %vm3153_vm4, %v3152_v13 }
0x187f   :  { %2872 = vmatprep.subr.mxu1 %v3152_v13 }
0x1880   :  { %2873 = vmatpush3.msra.mxu1 %v3592_v18 }
0x1881   :  { %2874 = vmatprep.subr.mxu1 %v3152_v13 }
0x1882   :  { %2875 = vmatpush3.msra.mxu1 %v3612_v28 }
0x1883   :  { %2876 = vmatprep.subr.mxu1 %v3152_v13 }
0x1884   :  { %2877 = vmatpush3.msra.mxu1 %v3620_v29 }
0x1885   :  { %2892 = vmatprep.subr.mxu1 %v3152_v13 }
0x193d   :  { %v1580_v32 = vpop.f32.mrf.mxu1 }
0x193e   :  { %v1581_v33 = vadd.f32 %v2572_v31, %v1580_v32  ;;  %v1903_v31 = vld [vmem:[#allocation3 + $0x6] sm:$0x3] }
0x193f   :  { %v2858_v34 = vpop.f32.mrf.mxu1 }
0x1940   :  { %2868 = vmatmul.mubr.msk.f32.vlgmr.msra.gmra.mxu0 %vm92_vm1, %v1581_v33 }
0x1941   :  { %2882 = vmatpush3.msra.mxu0 %v3587_v17  ;;  %2889 = vmatprep.mubr.msk.f32.mxu0 %vm3153_vm4, %v3152_v13 }
0x1942   :  { %2883 = vmatprep.subr.mxu0 %v3152_v13 }
0x1943   :  { %2884 = vmatpush3.msra.mxu0 %v3592_v18 }
0x1944   :  { %2885 = vmatprep.subr.mxu0 %v3152_v13 }
0x1945   :  { %2886 = vmatpush3.msra.mxu0 %v3612_v28 }
0x1946   :  { %2887 = vmatprep.subr.mxu0 %v3152_v13 }
0x1947   :  { %2888 = vmatpush3.msra.mxu0 %v3620_v29 }
0x1948   :  { %2903 = vmatprep.subr.mxu0 %v3152_v13 }
0x1a00   :  { %v1658_v36 = vpop.f32.mrf.mxu0 }
0x1a01   :  { %v1662_v37 = vadd.f32 %v1658_v36, %v1588_v35 }
0x1a02   :  { %v2869_v38 = vpop.f32.mrf.mxu0 }
0x1a03   :  { %3023 = vtanh.f32 %v1662_v37  ;;  %v2575_v40 = vmul.f32 -1.442695, %v1662_v37 }
0x1a05   :  { %3025 = vpow2.f32 %v2575_v40 }
0x1a10   :  { %v3024_v39 = vpop.eup %3023 }
0x1a11   :  { %1672 = vrot.lane.b32.xlu0 %v3024_v39, %s3155_s14 }
0x1a12   :  { %v3026_v41 = vpop.eup %3025 }
0x1a13   :  { %v1666_v42 = vadd.f32 1.0, %v3026_v41 }
0x1a15   :  { %3027 = vrcp.f32 %v1666_v42 }
0x1a22   :  { %v3028_v43 = vpop.eup %3027 }
0x1a23   :  { %v1670_v46 = vmul.f32 0.0, %v3028_v43 }
0x1a83   :  { %v1673_v44 = vpop.permute.xlu0 %1672 }
0x1a84   :  { %v1675_v45 = vmul.f32 %v3028_v43, %v1673_v44 }
0x1a86   :  { %1677 = vrot.lane.b32.xlu1 %v1675_v45, %s3156_s30 }
0x1af8   :  { %v1678_v47 = vpop.permute.xlu1 %1677 }
0x1af9   :  { %v1680_v48 = vadd.f32 %v1678_v47, %v1670_v46 }
0x1afb   :  { %3029 = vtanh.f32 %v1680_v48 }
0x1b08   :  { %v3030_v49 = vpop.eup %3029 }
0x1b09   :  { %1683 = vrot.lane.b32.xlu0 %v3030_v49, %s3155_s14  ;;  %v2008_v49 = vld [vmem:[#allocation3 + $0x8] sm:$0x3] }
0x1b7b   :  { %v1684_v50 = vpop.permute.xlu0 %1683 }
0x1b7c   :  { %v1686_v1 = vmul.f32 %v3028_v43, %v1684_v50 }
0x1b7e   :  { %1688 = vrot.lane.b32.xlu1 %v1686_v1, %s3156_s30 }
0x1bf0   :  { %v1689_v51 = vpop.permute.xlu1 %1688 }
0x1bf1   :  { %1691 = vst.msk [vmem:[#allocation4] sm:$0x3] %vm1413_vm6, %v1689_v51  ;;  %2879 = vmatmul.mubr.msk.f32.vlgmr.msra.gmra.mxu1 %vm92_vm1, %v1689_v51 }
0x1bf2   :  { %2893 = vmatpush3.msra.mxu1 %v3587_v17  ;;  %2900 = vmatprep.mubr.msk.f32.mxu1 %vm3153_vm4, %v3152_v13 }
0x1bf3   :  { %2894 = vmatprep.subr.mxu1 %v3152_v13 }
0x1bf4   :  { %2895 = vmatpush3.msra.mxu1 %v3592_v18 }
0x1bf5   :  { %2896 = vmatprep.subr.mxu1 %v3152_v13 }
0x1bf6   :  { %2897 = vmatpush3.msra.mxu1 %v3612_v28 }
0x1bf7   :  { %2898 = vmatprep.subr.mxu1 %v3152_v13 }
0x1bf8   :  { %2899 = vmatpush3.msra.mxu1 %v3620_v29 }
0x1bf9   :  { %2914 = vmatprep.subr.mxu1 %v3152_v13 }
0x1cb1   :  { %v1762_v52 = vpop.f32.mrf.mxu1 }
0x1cb2   :  { %v1766_v53 = vadd.f32 %v1762_v52, %v1693_v2 }
0x1cb3   :  { %v2880_v54 = vpop.f32.mrf.mxu1 }
0x1cb4   :  { %3031 = vtanh.f32 %v1766_v53  ;;  %v2577_v55 = vmul.f32 -1.442695, %v1766_v53 }
0x1cb6   :  { %3033 = vpow2.f32 %v2577_v55 }
0x1cc1   :  { %v3032_v19 = vpop.eup %3031 }
0x1cc2   :  { %1776 = vrot.lane.b32.xlu0 %v3032_v19, %s3155_s14 }
0x1cc3   :  { %v3034_v56 = vpop.eup %3033 }
0x1cc4   :  { %v1770_v21 = vadd.f32 1.0, %v3034_v56 }
0x1cc6   :  { %3035 = vrcp.f32 %v1770_v21 }
0x1cd3   :  { %v3036_v22 = vpop.eup %3035 }
0x1cd4   :  { %v1774_v23 = vmul.f32 %v3036_v22, %v1680_v48 }
0x1d34   :  { %v1777_v57 = vpop.permute.xlu0 %1776 }
0x1d35   :  { %v1779_v58 = vmul.f32 %v3036_v22, %v1777_v57 }
0x1d37   :  { %1781 = vrot.lane.b32.xlu1 %v1779_v58, %s3156_s30 }
0x1da9   :  { %v1782_v59 = vpop.permute.xlu1 %1781 }
0x1daa   :  { %v1784_v60 = vadd.f32 %v1782_v59, %v1774_v23  ;;  %v2328_v59 = vld [vmem:[#allocation4] sm:$0x3] }
0x1dac   :  { %3037 = vtanh.f32 %v1784_v60 }
0x1db9   :  { %v3038_v61 = vpop.eup %3037 }
0x1dba   :  { %1787 = vrot.lane.b32.xlu0 %v3038_v61, %s3155_s14 }
0x1e2c   :  { %v1788_v62 = vpop.permute.xlu0 %1787 }
0x1e2d   :  { %v1790_v63 = vmul.f32 %v3036_v22, %v1788_v62 }
0x1e2f   :  { %1792 = vrot.lane.b32.xlu1 %v1790_v63, %s3156_s30 }
0x1ea1   :  { %v1793_v0 = vpop.permute.xlu1 %1792 }
0x1ea2   :  { %1796 = vst.msk [vmem:[#allocation4 + $0x2] sm:$0x3] %vm1413_vm6, %v1793_v0  ;;  %2890 = vmatmul.mubr.msk.f32.vlgmr.msra.gmra.mxu0 %vm92_vm1, %v1793_v0 }
0x1ea3   :  { %2904 = vmatpush3.msra.mxu0 %v3587_v17  ;;  %2911 = vmatprep.mubr.msk.f32.mxu0 %vm3153_vm4, %v3152_v13 }
0x1ea4   :  { %2905 = vmatprep.subr.mxu0 %v3152_v13 }
0x1ea5   :  { %2906 = vmatpush3.msra.mxu0 %v3592_v18 }
0x1ea6   :  { %2907 = vmatprep.subr.mxu0 %v3152_v13 }
0x1ea7   :  { %2908 = vmatpush3.msra.mxu0 %v3612_v28 }
0x1ea8   :  { %2909 = vmatprep.subr.mxu0 %v3152_v13 }
0x1ea9   :  { %2910 = vmatpush3.msra.mxu0 %v3620_v29  ;;  %v2329_v57 = vld [vmem:[#allocation4 + $0x2] sm:$0x3] }
0x1eaa   :  { %2925 = vmatprep.subr.mxu0 %v3152_v13 }
0x1f62   :  { %v1867_v4 = vpop.f32.mrf.mxu0 }
0x1f63   :  { %v1871_v5 = vadd.f32 %v1867_v4, %v1798_v3  ;;  %v2113_v3 = vld [vmem:[#allocation3 + $0xa] sm:$0x3] }
0x1f64   :  { %v2891_v6 = vpop.f32.mrf.mxu0 }
0x1f65   :  { %3039 = vtanh.f32 %v1871_v5  ;;  %v2579_v8 = vmul.f32 -1.442695, %v1871_v5 }
0x1f67   :  { %3041 = vpow2.f32 %v2579_v8 }
0x1f72   :  { %v3040_v7 = vpop.eup %3039 }
0x1f73   :  { %1881 = vrot.lane.b32.xlu0 %v3040_v7, %s3155_s14 }
0x1f74   :  { %v3042_v9 = vpop.eup %3041 }
0x1f75   :  { %v1875_v10 = vadd.f32 1.0, %v3042_v9 }
0x1f77   :  { %3043 = vrcp.f32 %v1875_v10 }
0x1f84   :  { %v3044_v11 = vpop.eup %3043 }
0x1f85   :  { %v1879_v15 = vmul.f32 %v3044_v11, %v1784_v60  ;;  %v2353_v60 = vcombine.low %v2328_v59, %v2329_v57 }
0x1f87   :  { %v2361_v62 = vrot.slane %v2353_v60, %v3375_v30 }
0x1fe5   :  { %v1882_v12 = vpop.permute.xlu0 %1881 }
0x1fe6   :  { %v1884_v14 = vmul.f32 %v3044_v11, %v1882_v12 }
0x1fe8   :  { %1886 = vrot.lane.b32.xlu1 %v1884_v14, %s3156_s30 }
0x205a   :  { %v1887_v16 = vpop.permute.xlu1 %1886 }
0x205b   :  { %v1889_v20 = vadd.f32 %v1887_v16, %v1879_v15 }
0x205d   :  { %3045 = vtanh.f32 %v1889_v20 }
0x206a   :  { %v3046_v24 = vpop.eup %3045 }
0x206b   :  { %1892 = vrot.lane.b32.xlu0 %v3046_v24, %s3155_s14 }
0x20dd   :  { %v1893_v25 = vpop.permute.xlu0 %1892 }
0x20de   :  { %v1895_v26 = vmul.f32 %v3044_v11, %v1893_v25 }
0x20e0   :  { %1897 = vrot.lane.b32.xlu1 %v1895_v26, %s3156_s30 }
0x2152   :  { %v1898_v27 = vpop.permute.xlu1 %1897 }
0x2153   :  { %1901 = vst.msk [vmem:[#allocation4 + $0x4] sm:$0x3] %vm1413_vm6, %v1898_v27  ;;  %2901 = vmatmul.mubr.msk.f32.vlgmr.msra.gmra.mxu1 %vm92_vm1, %v1898_v27 }
0x2154   :  { %2915 = vmatpush3.msra.mxu1 %v3587_v17  ;;  %2922 = vmatprep.mubr.msk.f32.mxu1 %vm3153_vm4, %v3152_v13 }
0x2155   :  { %2916 = vmatprep.subr.mxu1 %v3152_v13 }
0x2156   :  { %2917 = vmatpush3.msra.mxu1 %v3592_v18 }
0x2157   :  { %2918 = vmatprep.subr.mxu1 %v3152_v13 }
0x2158   :  { %2919 = vmatpush3.msra.mxu1 %v3612_v28 }
0x2159   :  { %2920 = vmatprep.subr.mxu1 %v3152_v13 }
0x215a   :  { %2921 = vmatpush3.msra.mxu1 %v3620_v29  ;;  %v2330_v58 = vld [vmem:[#allocation4 + $0x4] sm:$0x3] }
0x2213   :  { %v1972_v32 = vpop.f32.mrf.mxu1 }
0x2214   :  { %v1976_v33 = vadd.f32 %v1972_v32, %v1903_v31  ;;  %v2218_v31 = vld [vmem:[#allocation3 + $0xc] sm:$0x3] }
0x2215   :  { %v2902_v34 = vpop.f32.mrf.mxu1 }
0x2216   :  { %3047 = vtanh.f32 %v1976_v33  ;;  %v2581_v36 = vmul.f32 -1.442695, %v1976_v33 }
0x2218   :  { %3049 = vpow2.f32 %v2581_v36 }
0x2223   :  { %v3048_v35 = vpop.eup %3047 }
0x2224   :  { %1986 = vrot.lane.b32.xlu0 %v3048_v35, %s3155_s14 }
0x2225   :  { %v3050_v37 = vpop.eup %3049 }
0x2226   :  { %v1980_v38 = vadd.f32 1.0, %v3050_v37 }
0x2228   :  { %3051 = vrcp.f32 %v1980_v38 }
0x2235   :  { %v3052_v39 = vpop.eup %3051 }
0x2236   :  { %v1984_v42 = vmul.f32 %v3052_v39, %v1889_v20 }
0x2296   :  { %v1987_v40 = vpop.permute.xlu0 %1986 }
0x2297   :  { %v1989_v41 = vmul.f32 %v3052_v39, %v1987_v40 }
0x2299   :  { %1991 = vrot.lane.b32.xlu1 %v1989_v41, %s3156_s30 }
0x230b   :  { %v1992_v43 = vpop.permute.xlu1 %1991 }
0x230c   :  { %v1994_v44 = vadd.f32 %v1992_v43, %v1984_v42 }
0x230e   :  { %3053 = vtanh.f32 %v1994_v44 }
0x231b   :  { %v3054_v45 = vpop.eup %3053 }
0x231c   :  { %1997 = vrot.lane.b32.xlu0 %v3054_v45, %s3155_s14 }
0x238e   :  { %v1998_v46 = vpop.permute.xlu0 %1997 }
0x238f   :  { %v2000_v47 = vmul.f32 %v3052_v39, %v1998_v46  ;;  %v2338_v46 = vld [vmem:[%s3775_s16 + $0x18] sm:$0xff] }
0x2390   :  { %2936 = vmatprep.subr.mxu1 %v2338_v46 }
0x2391   :  { %2002 = vrot.lane.b32.xlu1 %v2000_v47, %s3156_s30  ;;  %v2337_v47 = vld [vmem:[%s3775_s16 + $0x10] sm:$0xff] }
0x2403   :  { %v2003_v48 = vpop.permute.xlu1 %2002 }
0x2404   :  { %2006 = vst.msk [vmem:[#allocation4 + $0x6] sm:$0x3] %vm1413_vm6, %v2003_v48  ;;  %2912 = vmatmul.mubr.msk.f32.vlgmr.msra.gmra.mxu0 %vm92_vm1, %v2003_v48  ;;  %v2336_v48 = vld [vmem:[%s3775_s16 + $0x8] sm:$0xff] }
0x2405   :  { %2926 = vmatpush3.msra.mxu0 %v3587_v17  ;;  %2933 = vmatprep.mubr.msk.f32.mxu0 %vm3153_vm4, %v3152_v13  ;;  %vm2467_vm4 = vcmask 1045504  }
0x2406   :  { %2927 = vmatprep.subr.mxu0 %v3152_v13 }
0x2407   :  { %2928 = vmatpush3.msra.mxu0 %v3592_v18 }
0x2408   :  { %2929 = vmatprep.subr.mxu0 %v3152_v13 }
0x2409   :  { %2930 = vmatpush3.msra.mxu0 %v3612_v28 }
0x240a   :  { %2931 = vmatprep.subr.mxu0 %v3152_v13 }
0x240b   :  { %2932 = vmatpush3.msra.mxu0 %v3620_v29  ;;  %v2331_v22 = vld [vmem:[#allocation4 + $0x6] sm:$0x3] }
0x240c   :  { %v2354_v23 = vcombine.low %v2330_v58, %v2331_v22 }
0x240e   :  { %v2368_v61 = vrot.slane %v2354_v23, %v3375_v30 }
0x2410   :  { %v2369_v0 = vcombine.low %v2361_v62, %v2368_v61 }
0x24c4   :  { %v2077_v50 = vpop.f32.mrf.mxu0 }
0x24c5   :  { %v2081_v1 = vadd.f32 %v2077_v50, %v2008_v49  ;;  %v2335_v49 = vld [vmem:[%s3775_s16] sm:$0xff] }
0x24c6   :  { %v2913_v51 = vpop.f32.mrf.mxu0 }
0x24c7   :  { %3055 = vtanh.f32 %v2081_v1  ;;  %v2583_v2 = vmul.f32 -1.442695, %v2081_v1 }
0x24c9   :  { %3057 = vpow2.f32 %v2583_v2 }
0x24d4   :  { %v3056_v17 = vpop.eup %3055 }
0x24d5   :  { %2091 = vrot.lane.b32.xlu0 %v3056_v17, %s3155_s14 }
0x24d6   :  { %v3058_v52 = vpop.eup %3057 }
0x24d7   :  { %v2085_v18 = vadd.f32 1.0, %v3058_v52 }
0x24d9   :  { %3059 = vrcp.f32 %v2085_v18 }
0x24e6   :  { %v3060_v53 = vpop.eup %3059 }
0x24e7   :  { %v2089_v13 = vmul.f32 %v3060_v53, %v1994_v44 }
0x2547   :  { %v2092_v54 = vpop.permute.xlu0 %2091 }
0x2548   :  { %v2094_v28 = vmul.f32 %v3060_v53, %v2092_v54 }
0x254a   :  { %2096 = vrot.lane.b32.xlu1 %v2094_v28, %s3156_s30  ;;  %v2588_v28 = vld [vmem:[%s3776_s17] ss:$0 sm:$0xff]  ;;  %s3158_s17 = smov [#allocation7]  }
0x254b   :  { %s2508_s8 = sshll.u32 %s3158_s17, 4  ;;  %s2509_s8 = int_to_ptr.vmem [resolvable:$true] %s2508_s8 }
0x254c   :  { %s3087_s22 = scalar_lea.vmem %s2509_s8, 32  ;;  %p3092_p1 = scmp.lt.s32.totalorder %s2509_s8, %s2509_s8 }
0x254d   :  { %p3088_p0 = scmp.ne.s32.totalorder %s2509_s8, %s3087_s22  ;;  %p3093_p2 = scmp.lt.s32.totalorder %s3087_s22, %s3087_s22 }
0x254f   :  { %p3094_p3 = por %p3093_p2, %p3092_p1 }
0x2551   :  { %p3095_p4 = pnand %p3094_p3, %p3088_p0 }
0x25bc   :  { %v2097_v29 = vpop.permute.xlu1 %2096 }
0x25bd   :  { %v2099_v19 = vadd.f32 %v2097_v29, %v2089_v13 }
0x25bf   :  { %3061 = vtanh.f32 %v2099_v19 }
0x25cc   :  { %v3062_v55 = vpop.eup %3061 }
0x25cd   :  { %2102 = vrot.lane.b32.xlu0 %v3062_v55, %s3155_s14 }
0x263f   :  { %v2103_v56 = vpop.permute.xlu0 %2102 }
0x2640   :  { %v2105_v21 = vmul.f32 %v3060_v53, %v2103_v56 }
0x2642   :  { %2107 = vrot.lane.b32.xlu1 %v2105_v21, %s3156_s30 }
0x26b4   :  { %v2108_v63 = vpop.permute.xlu1 %2107 }
0x26b5   :  { %2111 = vst.msk [vmem:[#allocation4 + $0x8] sm:$0x3] %vm1413_vm6, %v2108_v63  ;;  %2923 = vmatmul.mubr.msk.f32.vlgmr.msra.gmra.mxu1 %vm92_vm1, %v2108_v63 }
0x26b6   :  { %2944 = vmatprep.mubr.msk.f32.mxu1 %vm92_vm1, %v2369_v0  ;;  %2937 = vmatpush3.msra.mxu1 %v2338_v46 }
0x26b7   :  { %2938 = vmatprep.subr.mxu1 %v2337_v47 }
0x26b8   :  { %2939 = vmatpush3.msra.mxu1 %v2337_v47 }
0x26b9   :  { %2940 = vmatprep.subr.mxu1 %v2336_v48 }
0x26ba   :  { %2941 = vmatpush3.msra.mxu1 %v2336_v48 }
0x26bb   :  { %2942 = vmatprep.subr.mxu1 %v2335_v49 }
0x26bc   :  { %2943 = vmatpush3.msra.mxu1 %v2335_v49  ;;  %v2332_v2 = vld [vmem:[#allocation4 + $0x8] sm:$0x3] }
0x2775   :  { %v2182_v4 = vpop.f32.mrf.mxu1 }
0x2776   :  { %v2186_v5 = vadd.f32 %v2182_v4, %v2113_v3 }
0x2777   :  { %v2924_v6 = vpop.f32.mrf.mxu1 }
0x2778   :  { %3063 = vtanh.f32 %v2186_v5  ;;  %v2585_v8 = vmul.f32 -1.442695, %v2186_v5 }
0x277a   :  { %3065 = vpow2.f32 %v2585_v8 }
0x2785   :  { %v3064_v7 = vpop.eup %3063 }
0x2786   :  { %2196 = vrot.lane.b32.xlu0 %v3064_v7, %s3155_s14 }
0x2787   :  { %v3066_v9 = vpop.eup %3065 }
0x2788   :  { %v2190_v10 = vadd.f32 1.0, %v3066_v9 }
0x278a   :  { %3067 = vrcp.f32 %v2190_v10 }
0x2797   :  { %v3068_v11 = vpop.eup %3067 }
0x2798   :  { %v2194_v15 = vmul.f32 %v3068_v11, %v2099_v19 }
0x27f8   :  { %v2197_v12 = vpop.permute.xlu0 %2196 }
0x27f9   :  { %v2199_v14 = vmul.f32 %v3068_v11, %v2197_v12 }
0x27fb   :  { %2201 = vrot.lane.b32.xlu1 %v2199_v14, %s3156_s30 }
0x286d   :  { %v2202_v16 = vpop.permute.xlu1 %2201 }
0x286e   :  { %v2204_v20 = vadd.f32 %v2202_v16, %v2194_v15 }
0x2870   :  { %3069 = vtanh.f32 %v2204_v20 }
0x287d   :  { %v3070_v24 = vpop.eup %3069 }
0x287e   :  { %2207 = vrot.lane.b32.xlu0 %v3070_v24, %s3155_s14 }
0x28f0   :  { %v2208_v25 = vpop.permute.xlu0 %2207 }
0x28f1   :  { %v2210_v26 = vmul.f32 %v3068_v11, %v2208_v25 }
0x28f3   :  { %2212 = vrot.lane.b32.xlu1 %v2210_v26, %s3156_s30 }
0x2965   :  { %v2213_v27 = vpop.permute.xlu1 %2212 }
0x2966   :  { %2216 = vst.msk [vmem:[#allocation4 + $0xa] sm:$0x3] %vm1413_vm6, %v2213_v27  ;;  %2934 = vmatmul.mubr.msk.f32.vlgmr.msra.gmra.mxu0 %vm92_vm1, %v2213_v27 }
0x296d   :  { %v2333_v17 = vld [vmem:[#allocation4 + $0xa] sm:$0x3] }
0x296e   :  { %v2370_v52 = vcombine.low %v2332_v2, %v2333_v17 }
0x2970   :  { %v2377_v18 = vrot.slane %v2370_v52, %v3375_v30 }
0x2a26   :  { %v2287_v32 = vpop.f32.mrf.mxu0 }
0x2a27   :  { %v2291_v33 = vadd.f32 %v2287_v32, %v2218_v31 }
0x2a28   :  { %v2935_v34 = vpop.f32.mrf.mxu0 }
0x2a29   :  { %3071 = vtanh.f32 %v2291_v33  ;;  %v2587_v36 = vmul.f32 -1.442695, %v2291_v33 }
0x2a2b   :  { %3073 = vpow2.f32 %v2587_v36 }
0x2a36   :  { %v3072_v35 = vpop.eup %3071 }
0x2a37   :  { %2301 = vrot.lane.b32.xlu0 %v3072_v35, %s3155_s14 }
0x2a38   :  { %v3074_v37 = vpop.eup %3073 }
0x2a39   :  { %v2295_v38 = vadd.f32 1.0, %v3074_v37 }
0x2a3b   :  { %3075 = vrcp.f32 %v2295_v38 }
0x2a48   :  { %v3076_v39 = vpop.eup %3075 }
0x2a49   :  { %v2299_v42 = vmul.f32 %v3076_v39, %v2204_v20 }
0x2aa9   :  { %v2302_v40 = vpop.permute.xlu0 %2301 }
0x2aaa   :  { %v2304_v41 = vmul.f32 %v3076_v39, %v2302_v40 }
0x2aac   :  { %2306 = vrot.lane.b32.xlu1 %v2304_v41, %s3156_s30 }
0x2b1e   :  { %v2307_v43 = vpop.permute.xlu1 %2306 }
0x2b1f   :  { %v2309_v44 = vadd.f32 %v2307_v43, %v2299_v42 }
0x2b21   :  { %3077 = vtanh.f32 %v2309_v44 }
0x2b2e   :  { %v3078_v45 = vpop.eup %3077 }
0x2b2f   :  { %2312 = vrot.lane.b32.xlu0 %v3078_v45, %s3155_s14 }
0x2ba1   :  { %v2313_v50 = vpop.permute.xlu0 %2312 }
0x2ba2   :  { %v2315_v1 = vmul.f32 %v3076_v39, %v2313_v50 }
0x2ba4   :  { %2317 = vrot.lane.b32.xlu1 %v2315_v1, %s3156_s30  ;;  %s3157_s30 = smov 96  }
0x2c16   :  { %v2318_v51 = vpop.permute.xlu1 %2317 }
0x2c17   :  { %2321 = vst.msk [vmem:[#allocation4 + $0xc] sm:$0x3] %vm1413_vm6, %v2318_v51  ;;  %2322 = vst.msk [vmem:[#allocation7] sm:$0x3] %vm1413_vm6, %v2318_v51 }
0x2c1e   :  { %v2589_v53 = vld.sshfl [vmem:[#allocation4 + $0xc] sm:$0x3 pattern:$0x76325410] }
0x2c1f   :  { %v2385_v54 = vcombine.low %v2377_v18, %v2589_v53 }
0x2c21   :  { %2945 = vmatmul.mubr.msk.f32.vlgmr.msra.gmra.mxu1 %vm92_vm1, %v2385_v54 }
0x2ce1   :  { %v2946_v13 = vpop.f32.mrf.mxu1 }
0x2ce2   :  { %v2462_v29 = vadd.f32 %v2946_v13, %v2588_v28 }
0x2ce3   :  { %v2456_v19 = vpop.f32.mrf.mxu1 }
0x2ce4   :  { %v2457_v55 = vadd.f32 %v2588_v28, %v2456_v19  ;;  %v2468_v56 = vsel %vm2467_vm4, %v2462_v29, -inf }
0x2ce5   :  { %2469 = vmax.xlane.f32.xlu0 %v2468_v56 }
0x2ce6   :  { %2465 = vmax.xlane.f32.xlu1 %v2457_v55 }
0x2cf7   :  { %2324 = vrot.lane.b32.xlu1 %v2309_v44, %s3157_s30 }
0x2d6e   :  { %v2470_v30 = vpop.xlane.xlu0 %2469 }
0x2d6f   :  { %v2472_v21 = vsub.f32 %v2462_v29, %v2470_v30  ;;  %v2466_v22 = vpop.xlane.xlu1 %2465 }
0x2d70   :  { %v2471_v57 = vsub.f32 %v2457_v55, %v2466_v22 }
0x2d71   :  { %v2475_v58 = vmul.f32 1.442695, %v2472_v21 }
0x2d72   :  { %v2473_v23 = vmul.f32 1.442695, %v2471_v57 }
0x2d73   :  { %v2325_v59 = vpop.permute.xlu1 %2324 }
0x2d74   :  { %3079 = vpow2.f32 %v2473_v23  ;;  %2327 = vst.msk [vmem:[#allocation9] sm:$0x3] %vm1413_vm6, %v2325_v59 }
0x2d75   :  { %3081 = vpow2.f32 %v2475_v58 }
0x2d81   :  { %v3080_v60 = vpop.eup %3079 }
0x2d82   :  { %v3082_v61 = vpop.eup %3081  ;;  %2477 = vadd.xlane.f32.xlu0 %v3080_v60 }
0x2d83   :  { %v2479_v62 = vsel %vm2467_vm4, %v3082_v61, 0.0 }
0x2d86   :  { %2480 = vadd.xlane.f32.xlu0 %v2479_v62 }
0x2d87   :  { %3098 = shalt.err (!%p3095_p4)
}
0x2d88   :  { %2511 = dma.vmem_to_hbm [thread:$0]  %s2509_s8, 32, %s3779_s20, [#allocation8]  }
0x2d89   :  { %s3107_s24 = scalar_lea.vmem %s2497_s4, 32  ;;  %p3112_p6 = scmp.lt.s32.totalorder %s2497_s4, %s2497_s4 }
0x2d8a   :  { %p3108_p5 = scmp.ne.s32.totalorder %s2497_s4, %s3107_s24  ;;  %p3113_p7 = scmp.lt.s32.totalorder %s3107_s24, %s3107_s24 }
0x2d8c   :  { %p3114_p8 = por %p3113_p7, %p3112_p6 }
0x2d8e   :  { %p3115_p9 = pnand %p3114_p8, %p3108_p5 }
0x2d90   :  { %3118 = shalt.err (!%p3115_p9)
}
0x2d91   :  { %2499 = dma.vmem_to_hbm [thread:$0]  %s2497_s4, 32, %s3777_s18, [#allocation6]  }
0x2d92   :  { %s3160_s7 = smov [#allocation9]  }
0x2d93   :  { %s2518_s25 = sshll.u32 %s3160_s7, 4  ;;  %s2519_s25 = int_to_ptr.vmem [resolvable:$true] %s2518_s25 }
0x2d94   :  { %s3127_s10 = scalar_lea.vmem %s2519_s25, 32  ;;  %p3132_p11 = scmp.lt.s32.totalorder %s2519_s25, %s2519_s25 }
0x2d95   :  { %p3128_p10 = scmp.ne.s32.totalorder %s2519_s25, %s3127_s10  ;;  %p3133_p12 = scmp.lt.s32.totalorder %s3127_s10, %s3127_s10 }
0x2d97   :  { %p3134_p13 = por %p3133_p12, %p3132_p11 }
0x2d99   :  { %p3135_p0 = pnand %p3134_p13, %p3128_p10 }
0x2d9b   :  { %3138 = shalt.err (!%p3135_p0)
}
0x2d9c   :  { %2521 = dma.vmem_to_hbm [thread:$0]  %s2519_s25, 32, %s3780_s21, [#allocation8]  }
0x2e0b   :  { %v2478_v63 = vpop.xlane.xlu0 %2477 }
0x2e0c   :  { %3083 = vlog2.f32 %v2478_v63 }
0x2e0f   :  { %v2481_v0 = vpop.xlane.xlu0 %2480 }
0x2e10   :  { %3085 = vlog2.f32 %v2481_v0 }
0x2e19   :  { %v3084_v3 = vpop.eup %3083 }
0x2e1a   :  { %v2483_v4 = vmul.f32 0.6931472, %v3084_v3 }
0x2e1c   :  { %v2486_v5 = vsub.f32 %v2471_v57, %v2483_v4 }
0x2e1d   :  { %v3086_v6 = vpop.eup %3085 }
0x2e1e   :  { %2488 = vst [vmem:[%s3778_s19] sm:$0xff] %v2486_v5  ;;  %v2485_v7 = vmul.f32 0.6931472, %v3086_v6 }
0x2e20   :  { %v2487_v8 = vsub.f32 %v2472_v21, %v2485_v7 }
0x2e22   :  { %2489 = vst [vmem:[%s3778_s19 + $0x8] sm:$0x3f] %v2487_v8 }
0x2e23   :  { %3147 = dma.done.wait [#allocation6], 32  }
0x2e24   :  { %3148 = vsyncadd [#allocation6], 4294967264 }
0x2e25   :  { %3149 = dma.done.wait [#allocation8], 64  }
0x2e26   :  { %3150 = vsyncadd [#allocation8], 4294967232 }
0x2e27   :  { %2533 = vsyncpa [#allocation6], 1 }
0x2e28   :  { %2534 = vsyncpa [#allocation8], 1 }

</bundles_post_ra>
